<compile_context>
chip_gen: v5e
topology: v5e:2x2
jax: 0.10.0
libtpu: 0.0.40
codegen_flags: <defaults>
</compile_context>

<pallas_src>
import functools

import jax
import jax.numpy as jnp
from jax.experimental import pallas as pl
from jax.experimental.pallas import tpu as pltpu

NUM_CLASS = 10
N_BANDS = 32        # "frequency" bins produced by the (stand-in) preprocessor
BN_EPS = 1e-5

# (Cin, Cout, taps, pad_same, relu, pool) for conv1 .. conv8.
# conv1 is Conv2d(1,1,5x5,pad=[2,2])+BN2d rewritten as a banded (5*32,32) matmul.
LAYER_CFG = (
    (N_BANDS, N_BANDS, 5, True, False, False),  # conv1 (no ReLU in the reference)
    (32, 64, 3, True, True, True),              # conv2
    (64, 128, 3, True, True, False),            # conv3
    (128, 128, 3, True, True, False),           # conv4
    (128, 128, 3, True, True, True),            # conv5
    (128, 128, 3, True, True, False),           # conv6
    (128, 64, 3, True, True, True),             # conv7
    (64, 32, 3, False, True, False),            # conv8 (padding=0)
)


def preprocess(x):
    # TODO(synk): Preprocessor() is not defined in the provided source; use a
    # deterministic framing reshape [B, T] -> [B, 32, T // 32] as a stand-in.
    B, T = x.shape
    return x.reshape(B, N_BANDS, T // N_BANDS)


# ------------------------------ fused kernel --------------------------------
def _fused_kernel(*refs, bblk, l0, layer_meta):
    n_layers = len(layer_meta)
    x_ref = refs[0]
    lw = refs[1:1 + 3 * n_layers]              # (w, scale, bias) per conv layer
    wfc_ref = refs[1 + 3 * n_layers]
    bfc_ref = refs[2 + 3 * n_layers]
    out_ref = refs[3 + 3 * n_layers]
    scratches = refs[4 + 3 * n_layers:]        # pool scratches + segmax scratch

    h = x_ref[0]                               # (bblk*l0, 32) channels-last, f32
    L = l0                                     # per-sample length (static)
    si = 0
    for li, (cin, cout, taps, pad, relu, pool) in enumerate(layer_meta):
        rows = bblk * L
        half = (taps - 1) // 2
        w_ref, s_ref, b_ref = lw[3 * li], lw[3 * li + 1], lw[3 * li + 2]

        # Per-sample row index; computed once per layer (hoisted out of the
        # tap loop, and there is no per-sample unroll any more).
        row = jax.lax.broadcasted_iota(jnp.int32, (rows, cin), 0) % L

        # Per-tap matmul accumulation (K-split).  piece_t[r] = h[r + t - half]
        # within the sample, zero outside the sample ('same' padding).
        acc = None
        for t in range(taps):
            sh = t - half
            if sh == 0:
                piece = h
            else:
                shifted = pltpu.roll(h, shift=(-sh) % rows, axis=0)   # XLU
                piece = jnp.where((row >= -sh) & (row < L - sh), shifted, 0.0)
            part = jnp.dot(piece, w_ref[t * cin:(t + 1) * cin, :],
                           preferred_element_type=jnp.float32)
            acc = part if acc is None else acc + part

        y = acc * s_ref[...] + b_ref[...]      # folded eval-mode BN + conv bias
        if relu:
            y = jnp.maximum(y, 0.0)
        if not pad:
            # padding=0 emulated as 'same' conv + zeroed per-sample edge rows;
            # exact because this layer is ReLU'd (>=0) and only feeds the
            # global max over time.
            rowo = jax.lax.broadcasted_iota(jnp.int32, (rows, cout), 0) % L
            y = jnp.where((rowo >= half) & (rowo < L - half), y, 0.0)
        if pool:
            scr = scratches[si]
            si += 1
            m = jnp.maximum(y, pltpu.roll(y, shift=rows - 1, axis=0))  # pairwise max
            scr[...] = m
            y = scr[pl.ds(0, rows // 2, 2), :]   # single stride-2 sublane read
            L //= 2
        h = y

    # Per-sample global max over time (batched), then ONE batched Linear.
    seg = scratches[si]                        # (bblk*L_final, 32)
    seg[...] = h
    emb = seg[pl.ds(0, bblk, L), :]            # row 0 of every sample
    for j in range(1, L):                      # L_final is small (e.g. 4)
        emb = jnp.maximum(emb, seg[pl.ds(j, bblk, L), :])
    logits = jnp.dot(emb, wfc_ref[...],
                     preferred_element_type=jnp.float32) + bfc_ref[...]
    out_ref[0] = logits                        # (bblk, num_class) — one store


# --------------------------------- wrapper ----------------------------------
def _num_tensorcores():
    """Best-effort TensorCore count; conservative default 1 (v5e/v6e)."""
    try:
        info = pltpu.get_tpu_info()
        for attr in ("num_cores", "core_count", "num_tensorcores", "tensorcore_count"):
            v = getattr(info, attr, None)
            if isinstance(v, int) and v > 0:
                return v
    except Exception:
        pass
    try:
        v = getattr(jax.devices()[0], "num_cores", None)
        if isinstance(v, int) and v > 0:
            return v
    except Exception:
        pass
    return 1


def raw_audio_cnn_forward(x, params):
    # x: [B, 1, T] waveform  ->  logits [B, num_class]
    B, _, T = x.shape
    assert T % N_BANDS == 0
    h = preprocess(x[:, 0, :])                 # [B, 32, L0]  (x.squeeze(1))
    h = jnp.transpose(h, (0, 2, 1))            # [B, L0, 32]  channels-last
    L0 = h.shape[1]
    assert L0 % 8 == 0, "frame count must be sublane-aligned"

    layers = params["layers"]                  # list of (w, scale, bias)
    wfc, bfc = params["fc"]
    n_class = wfc.shape[1]

    # padding=0 layers are only supported as the last conv (edge-mask trick).
    for i, (_, _, _, pad, relu, pool) in enumerate(LAYER_CFG):
        if not pad:
            assert relu and not pool and i == len(LAYER_CFG) - 1

    # Grid: 1 step on single-TC chips; 2 "parallel" steps when 2 TCs exist.
    n_steps = 2 if (_num_tensorcores() >= 2 and B >= 2) else 1
    B_pad = ((B + n_steps - 1) // n_steps) * n_steps
    if B_pad != B:
        h = jnp.concatenate(
            [h, jnp.zeros((B_pad - B, L0, N_BANDS), h.dtype)], axis=0)
    bblk = B_pad // n_steps
    h = h.reshape(n_steps, bblk * L0, N_BANDS)     # batch folded into matmul M

    # Walk the length chain to size the (tiny) pool / segmax scratches.
    scratch_shapes = []
    L = L0
    for (_, cout, taps, pad, _, pool) in LAYER_CFG:
        if not pad:
            assert L - (taps - 1) >= 1, "input too short for the conv stack"
        if pool:
            assert L % 2 == 0
            scratch_shapes.append(pltpu.VMEM((bblk * L, cout), jnp.float32))
            L //= 2
    scratch_shapes.append(pltpu.VMEM((bblk * L, LAYER_CFG[-1][1]), jnp.float32))

    const2d = lambda g: (0, 0)
    in_specs = [pl.BlockSpec((1, bblk * L0, N_BANDS), lambda g: (g, 0, 0))]
    args = [h]
    for (w, s, b) in layers:                   # weights stay VMEM-resident
        in_specs += [pl.BlockSpec(w.shape, const2d),
                     pl.BlockSpec(s.shape, const2d),
                     pl.BlockSpec(b.shape, const2d)]
        args += [w, s, b]
    in_specs += [pl.BlockSpec(wfc.shape, const2d), pl.BlockSpec(bfc.shape, const2d)]
    args += [wfc, bfc]

    kernel = functools.partial(_fused_kernel, bblk=bblk, l0=L0,
                               layer_meta=LAYER_CFG)
    out = pl.pallas_call(
        kernel,
        out_shape=jax.ShapeDtypeStruct((n_steps, bblk, n_class), jnp.float32),
        grid=(n_steps,),
        in_specs=in_specs,
        out_specs=pl.BlockSpec((1, bblk, n_class), lambda g: (g, 0, 0)),
        scratch_shapes=scratch_shapes,
        compiler_params=pltpu.CompilerParams(dimension_semantics=("parallel",)),
    )(*args)
    return out.reshape(B_pad, n_class)[:B]


# -------- parameter init (deterministic, PyTorch-default-like) --------------
def init_params(key, num_class=NUM_CLASS):
    bn_scale = float(1.0 / jnp.sqrt(1.0 + BN_EPS))  # gamma=1, var=1, mean=0, beta=0
    layers = []

    # conv1: Conv2d(1,1,5x5,pad=2) + BN2d, rebuilt as a banded channels-last
    # weight Wb[(dw*32 + c_in), c_out] = K[c_in - c_out + 2, dw].
    key, kw, kb = jax.random.split(key, 3)
    bound = 1.0 / (25 ** 0.5)
    k2d = jax.random.uniform(kw, (5, 5), jnp.float32, -bound, bound)
    b2d = jax.random.uniform(kb, (), jnp.float32, -bound, bound)
    wb = jnp.zeros((5 * N_BANDS, N_BANDS), jnp.float32)
    for dw in range(5):
        band = jnp.zeros((N_BANDS, N_BANDS), jnp.float32)
        for dh in range(5):
            band = band + k2d[dh, dw] * jnp.eye(N_BANDS, k=2 - dh, dtype=jnp.float32)
        wb = wb.at[dw * N_BANDS:(dw + 1) * N_BANDS, :].set(band)
    scale = jnp.full((1, N_BANDS), bn_scale, jnp.float32)
    bias = (b2d * bn_scale) * jnp.ones((1, N_BANDS), jnp.float32)
    layers.append((wb, scale, bias))

    # conv2 .. conv8: Conv1d(k=3) + BN1d, weight reshaped to (3*Cin, Cout)
    # (rows [t*Cin:(t+1)*Cin] = tap-t weight, channels-last).
    for (cin, cout, taps, pad, relu, pool) in LAYER_CFG[1:]:
        key, kw, kb = jax.random.split(key, 3)
        bound = 1.0 / ((cin * taps) ** 0.5)
        w = jax.random.uniform(kw, (cout, cin, taps), jnp.float32, -bound, bound)
        b = jax.random.uniform(kb, (cout,), jnp.float32, -bound, bound)
        w_cat = jnp.transpose(w, (2, 1, 0)).reshape(taps * cin, cout)
        scale = jnp.full((1, cout), bn_scale, jnp.float32)
        bias = (b * bn_scale).reshape(1, cout)
        layers.append((w_cat, scale, bias))

    key, kw, kb = jax.random.split(key, 3)
    bound = 1.0 / (32 ** 0.5)
    w_fc = jax.random.uniform(kw, (num_class, 32), jnp.float32, -bound, bound)
    b_fc = jax.random.uniform(kb, (num_class,), jnp.float32, -bound, bound)
    return {"layers": layers,
            "fc": (jnp.transpose(w_fc), b_fc.reshape(1, num_class))}


if __name__ == "__main__":
    B, T = 2, 1024
    key = jax.random.PRNGKey(0)
    key, kx = jax.random.split(key)
    x = jax.random.normal(kx, (B, 1, T), jnp.float32)
    params = init_params(key)

    logits = jax.jit(raw_audio_cnn_forward)(x, params)
    logits = jax.block_until_ready(logits)
    assert logits.shape == (B, NUM_CLASS), logits.shape
    print("KERNEL_OK")
</pallas_src>

<mosaic_0001>
module attributes {stable_mosaic.version = 11 : i64} {
  func.func @_fused_kernel(%arg0: i32, %arg1: memref<1x64x32xf32, #tpu.memory_space<vmem>>, %arg2: memref<160x32xf32, #tpu.memory_space<vmem>>, %arg3: memref<1x32xf32, #tpu.memory_space<vmem>>, %arg4: memref<1x32xf32, #tpu.memory_space<vmem>>, %arg5: memref<96x64xf32, #tpu.memory_space<vmem>>, %arg6: memref<1x64xf32, #tpu.memory_space<vmem>>, %arg7: memref<1x64xf32, #tpu.memory_space<vmem>>, %arg8: memref<192x128xf32, #tpu.memory_space<vmem>>, %arg9: memref<1x128xf32, #tpu.memory_space<vmem>>, %arg10: memref<1x128xf32, #tpu.memory_space<vmem>>, %arg11: memref<384x128xf32, #tpu.memory_space<vmem>>, %arg12: memref<1x128xf32, #tpu.memory_space<vmem>>, %arg13: memref<1x128xf32, #tpu.memory_space<vmem>>, %arg14: memref<384x128xf32, #tpu.memory_space<vmem>>, %arg15: memref<1x128xf32, #tpu.memory_space<vmem>>, %arg16: memref<1x128xf32, #tpu.memory_space<vmem>>, %arg17: memref<384x128xf32, #tpu.memory_space<vmem>>, %arg18: memref<1x128xf32, #tpu.memory_space<vmem>>, %arg19: memref<1x128xf32, #tpu.memory_space<vmem>>, %arg20: memref<384x64xf32, #tpu.memory_space<vmem>>, %arg21: memref<1x64xf32, #tpu.memory_space<vmem>>, %arg22: memref<1x64xf32, #tpu.memory_space<vmem>>, %arg23: memref<192x32xf32, #tpu.memory_space<vmem>>, %arg24: memref<1x32xf32, #tpu.memory_space<vmem>>, %arg25: memref<1x32xf32, #tpu.memory_space<vmem>>, %arg26: memref<32x10xf32, #tpu.memory_space<vmem>>, %arg27: memref<1x10xf32, #tpu.memory_space<vmem>>, %arg28: memref<1x2x10xf32, #tpu.memory_space<vmem>>, %arg29: memref<64x64xf32, #tpu.memory_space<vmem>>, %arg30: memref<32x128xf32, #tpu.memory_space<vmem>>, %arg31: memref<16x64xf32, #tpu.memory_space<vmem>>, %arg32: memref<8x32xf32, #tpu.memory_space<vmem>>) attributes {dimension_semantics = [#tpu.dimension_semantics<parallel>], iteration_bounds = array<i64: 1>, scalar_prefetch = 0 : i64, scratch_operands = 4 : i64, tpu.core_type = #tpu.core_type<tc>, window_params = [{transform_indices = @transform_0, window_bounds = array<i64: 1, 64, 32>}, {pipeline_mode = #tpu.pipeline_mode<synchronous>, transform_indices = @transform_1, window_bounds = array<i64: 160, 32>}, {pipeline_mode = #tpu.pipeline_mode<synchronous>, transform_indices = @transform_2, window_bounds = array<i64: 1, 32>}, {pipeline_mode = #tpu.pipeline_mode<synchronous>, transform_indices = @transform_3, window_bounds = array<i64: 1, 32>}, {pipeline_mode = #tpu.pipeline_mode<synchronous>, transform_indices = @transform_4, window_bounds = array<i64: 96, 64>}, {pipeline_mode = #tpu.pipeline_mode<synchronous>, transform_indices = @transform_5, window_bounds = array<i64: 1, 64>}, {pipeline_mode = #tpu.pipeline_mode<synchronous>, transform_indices = @transform_6, window_bounds = array<i64: 1, 64>}, {pipeline_mode = #tpu.pipeline_mode<synchronous>, transform_indices = @transform_7, window_bounds = array<i64: 192, 128>}, {pipeline_mode = #tpu.pipeline_mode<synchronous>, transform_indices = @transform_8, window_bounds = array<i64: 1, 128>}, {pipeline_mode = #tpu.pipeline_mode<synchronous>, transform_indices = @transform_9, window_bounds = array<i64: 1, 128>}, {pipeline_mode = #tpu.pipeline_mode<synchronous>, transform_indices = @transform_10, window_bounds = array<i64: 384, 128>}, {pipeline_mode = #tpu.pipeline_mode<synchronous>, transform_indices = @transform_11, window_bounds = array<i64: 1, 128>}, {pipeline_mode = #tpu.pipeline_mode<synchronous>, transform_indices = @transform_12, window_bounds = array<i64: 1, 128>}, {pipeline_mode = #tpu.pipeline_mode<synchronous>, transform_indices = @transform_13, window_bounds = array<i64: 384, 128>}, {pipeline_mode = #tpu.pipeline_mode<synchronous>, transform_indices = @transform_14, window_bounds = array<i64: 1, 128>}, {pipeline_mode = #tpu.pipeline_mode<synchronous>, transform_indices = @transform_15, window_bounds = array<i64: 1, 128>}, {pipeline_mode = #tpu.pipeline_mode<synchronous>, transform_indices = @transform_16, window_bounds = array<i64: 384, 128>}, {pipeline_mode = #tpu.pipeline_mode<synchronous>, transform_indices = @transform_17, window_bounds = array<i64: 1, 128>}, {pipeline_mode = #tpu.pipeline_mode<synchronous>, transform_indices = @transform_18, window_bounds = array<i64: 1, 128>}, {pipeline_mode = #tpu.pipeline_mode<synchronous>, transform_indices = @transform_19, window_bounds = array<i64: 384, 64>}, {pipeline_mode = #tpu.pipeline_mode<synchronous>, transform_indices = @transform_20, window_bounds = array<i64: 1, 64>}, {pipeline_mode = #tpu.pipeline_mode<synchronous>, transform_indices = @transform_21, window_bounds = array<i64: 1, 64>}, {pipeline_mode = #tpu.pipeline_mode<synchronous>, transform_indices = @transform_22, window_bounds = array<i64: 192, 32>}, {pipeline_mode = #tpu.pipeline_mode<synchronous>, transform_indices = @transform_23, window_bounds = array<i64: 1, 32>}, {pipeline_mode = #tpu.pipeline_mode<synchronous>, transform_indices = @transform_24, window_bounds = array<i64: 1, 32>}, {pipeline_mode = #tpu.pipeline_mode<synchronous>, transform_indices = @transform_25, window_bounds = array<i64: 32, 10>}, {pipeline_mode = #tpu.pipeline_mode<synchronous>, transform_indices = @transform_26, window_bounds = array<i64: 1, 10>}, {transform_indices = @transform_27, window_bounds = array<i64: 1, 2, 10>}]} {
    %c0 = arith.constant 0 : index
    %c0_0 = arith.constant 0 : index
    %c0_1 = arith.constant 0 : index
    %0 = vector.load %arg1[%c0, %c0_0, %c0_1] : memref<1x64x32xf32, #tpu.memory_space<vmem>>, vector<1x64x32xf32>
    %1 = vector.shape_cast %0 : vector<1x64x32xf32> to vector<64x32xf32>
    %2 = tpu.iota {dimensions = array<i32: 0>} : vector<64x32xi32>
    %c32_i32 = arith.constant 32 : i32
    %c0_i32 = arith.constant 0 : i32
    %3 = arith.cmpi eq, %c32_i32, %c0_i32 : i32
    %c1_i32 = arith.constant 1 : i32
    %4 = arith.select %3, %c1_i32, %c32_i32 : i32
    %5 = vector.broadcast %4 : i32 to vector<64x32xi32>
    %6 = arith.remsi %2, %5 : vector<64x32xi32>
    %c0_i32_2 = arith.constant 0 : i32
    %7 = vector.broadcast %c0_i32_2 : i32 to vector<64x32xi32>
    %8 = arith.cmpi ne, %6, %7 : vector<64x32xi32>
    %c0_i32_3 = arith.constant 0 : i32
    %9 = vector.broadcast %c0_i32_3 : i32 to vector<64x32xi32>
    %10 = arith.cmpi slt, %6, %9 : vector<64x32xi32>
    %c0_i32_4 = arith.constant 0 : i32
    %11 = arith.cmpi slt, %4, %c0_i32_4 : i32
    %12 = vector.broadcast %11 : i1 to vector<64x32xi1>
    %13 = vector.broadcast %12 : vector<64x32xi1> to vector<64x32xi1>
    %14 = arith.xori %10, %13 : vector<64x32xi1>
    %15 = arith.andi %14, %8 : vector<64x32xi1>
    %16 = vector.broadcast %4 : i32 to vector<64x32xi32>
    %17 = arith.addi %6, %16 : vector<64x32xi32>
    %18 = arith.select %15, %17, %6 : vector<64x32xi1>, vector<64x32xi32>
    %c2_i32 = arith.constant 2 : i32
    %19 = tpu.dynamic_rotate %1 by %c2_i32 dim 0 : vector<64x32xf32>, i32 -> vector<64x32xf32>
    %c2_i32_5 = arith.constant 2 : i32
    %20 = vector.broadcast %c2_i32_5 : i32 to vector<64x32xi32>
    %21 = arith.cmpi sge, %18, %20 : vector<64x32xi32>
    %c34_i32 = arith.constant 34 : i32
    %22 = vector.broadcast %c34_i32 : i32 to vector<64x32xi32>
    %23 = arith.cmpi slt, %18, %22 : vector<64x32xi32>
    %24 = arith.andi %21, %23 : vector<64x32xi1>
    %cst = arith.constant 0.000000e+00 : f32
    %25 = vector.broadcast %cst : f32 to vector<64x32xf32>
    %26 = arith.select %24, %19, %25 : vector<64x32xi1>, vector<64x32xf32>
    %c0_6 = arith.constant 0 : index
    %c0_7 = arith.constant 0 : index
    %27 = vector.load %arg2[%c0_6, %c0_7] : memref<160x32xf32, #tpu.memory_space<vmem>>, vector<32x32xf32>
    %cst_8 = arith.constant dense<0.000000e+00> : vector<64x32xf32>
    %28 = tpu.matmul %26, %27, %cst_8 {dimension_numbers = #tpu.dot_dimension_numbers<[1], [0], [0], [1], [0, 0, 1, 1], [], []>} : vector<64x32xf32>, vector<32x32xf32>, vector<64x32xf32> -> vector<64x32xf32>
    %c1_i32_9 = arith.constant 1 : i32
    %29 = tpu.dynamic_rotate %1 by %c1_i32_9 dim 0 : vector<64x32xf32>, i32 -> vector<64x32xf32>
    %c1_i32_10 = arith.constant 1 : i32
    %30 = vector.broadcast %c1_i32_10 : i32 to vector<64x32xi32>
    %31 = arith.cmpi sge, %18, %30 : vector<64x32xi32>
    %c33_i32 = arith.constant 33 : i32
    %32 = vector.broadcast %c33_i32 : i32 to vector<64x32xi32>
    %33 = arith.cmpi slt, %18, %32 : vector<64x32xi32>
    %34 = arith.andi %31, %33 : vector<64x32xi1>
    %cst_11 = arith.constant 0.000000e+00 : f32
    %35 = vector.broadcast %cst_11 : f32 to vector<64x32xf32>
    %36 = arith.select %34, %29, %35 : vector<64x32xi1>, vector<64x32xf32>
    %c32 = arith.constant 32 : index
    %c0_12 = arith.constant 0 : index
    %37 = vector.load %arg2[%c32, %c0_12] : memref<160x32xf32, #tpu.memory_space<vmem>>, vector<32x32xf32>
    %cst_13 = arith.constant dense<0.000000e+00> : vector<64x32xf32>
    %38 = tpu.matmul %36, %37, %cst_13 {dimension_numbers = #tpu.dot_dimension_numbers<[1], [0], [0], [1], [0, 0, 1, 1], [], []>} : vector<64x32xf32>, vector<32x32xf32>, vector<64x32xf32> -> vector<64x32xf32>
    %39 = arith.addf %28, %38 : vector<64x32xf32>
    %c64 = arith.constant 64 : index
    %c0_14 = arith.constant 0 : index
    %40 = vector.load %arg2[%c64, %c0_14] : memref<160x32xf32, #tpu.memory_space<vmem>>, vector<32x32xf32>
    %cst_15 = arith.constant dense<0.000000e+00> : vector<64x32xf32>
    %41 = tpu.matmul %1, %40, %cst_15 {dimension_numbers = #tpu.dot_dimension_numbers<[1], [0], [0], [1], [0, 0, 1, 1], [], []>} : vector<64x32xf32>, vector<32x32xf32>, vector<64x32xf32> -> vector<64x32xf32>
    %42 = arith.addf %39, %41 : vector<64x32xf32>
    %c63_i32 = arith.constant 63 : i32
    %43 = tpu.dynamic_rotate %1 by %c63_i32 dim 0 : vector<64x32xf32>, i32 -> vector<64x32xf32>
    %c-1_i32 = arith.constant -1 : i32
    %44 = vector.broadcast %c-1_i32 : i32 to vector<64x32xi32>
    %45 = arith.cmpi sge, %18, %44 : vector<64x32xi32>
    %c31_i32 = arith.constant 31 : i32
    %46 = vector.broadcast %c31_i32 : i32 to vector<64x32xi32>
    %47 = arith.cmpi slt, %18, %46 : vector<64x32xi32>
    %48 = arith.andi %45, %47 : vector<64x32xi1>
    %cst_16 = arith.constant 0.000000e+00 : f32
    %49 = vector.broadcast %cst_16 : f32 to vector<64x32xf32>
    %50 = arith.select %48, %43, %49 : vector<64x32xi1>, vector<64x32xf32>
    %c96 = arith.constant 96 : index
    %c0_17 = arith.constant 0 : index
    %51 = vector.load %arg2[%c96, %c0_17] : memref<160x32xf32, #tpu.memory_space<vmem>>, vector<32x32xf32>
    %cst_18 = arith.constant dense<0.000000e+00> : vector<64x32xf32>
    %52 = tpu.matmul %50, %51, %cst_18 {dimension_numbers = #tpu.dot_dimension_numbers<[1], [0], [0], [1], [0, 0, 1, 1], [], []>} : vector<64x32xf32>, vector<32x32xf32>, vector<64x32xf32> -> vector<64x32xf32>
    %53 = arith.addf %42, %52 : vector<64x32xf32>
    %c62_i32 = arith.constant 62 : i32
    %54 = tpu.dynamic_rotate %1 by %c62_i32 dim 0 : vector<64x32xf32>, i32 -> vector<64x32xf32>
    %c-2_i32 = arith.constant -2 : i32
    %55 = vector.broadcast %c-2_i32 : i32 to vector<64x32xi32>
    %56 = arith.cmpi sge, %18, %55 : vector<64x32xi32>
    %c30_i32 = arith.constant 30 : i32
    %57 = vector.broadcast %c30_i32 : i32 to vector<64x32xi32>
    %58 = arith.cmpi slt, %18, %57 : vector<64x32xi32>
    %59 = arith.andi %56, %58 : vector<64x32xi1>
    %cst_19 = arith.constant 0.000000e+00 : f32
    %60 = vector.broadcast %cst_19 : f32 to vector<64x32xf32>
    %61 = arith.select %59, %54, %60 : vector<64x32xi1>, vector<64x32xf32>
    %c128 = arith.constant 128 : index
    %c0_20 = arith.constant 0 : index
    %62 = vector.load %arg2[%c128, %c0_20] : memref<160x32xf32, #tpu.memory_space<vmem>>, vector<32x32xf32>
    %cst_21 = arith.constant dense<0.000000e+00> : vector<64x32xf32>
    %63 = tpu.matmul %61, %62, %cst_21 {dimension_numbers = #tpu.dot_dimension_numbers<[1], [0], [0], [1], [0, 0, 1, 1], [], []>} : vector<64x32xf32>, vector<32x32xf32>, vector<64x32xf32> -> vector<64x32xf32>
    %64 = arith.addf %53, %63 : vector<64x32xf32>
    %c0_22 = arith.constant 0 : index
    %c0_23 = arith.constant 0 : index
    %65 = vector.load %arg3[%c0_22, %c0_23] : memref<1x32xf32, #tpu.memory_space<vmem>>, vector<1x32xf32>
    %66 = vector.broadcast %65 : vector<1x32xf32> to vector<64x32xf32>
    %67 = arith.mulf %64, %66 : vector<64x32xf32>
    %c0_24 = arith.constant 0 : index
    %c0_25 = arith.constant 0 : index
    %68 = vector.load %arg4[%c0_24, %c0_25] : memref<1x32xf32, #tpu.memory_space<vmem>>, vector<1x32xf32>
    %69 = vector.broadcast %68 : vector<1x32xf32> to vector<64x32xf32>
    %70 = arith.addf %67, %69 : vector<64x32xf32>
    %71 = tpu.iota {dimensions = array<i32: 0>} : vector<64x32xi32>
    %c32_i32_26 = arith.constant 32 : i32
    %c0_i32_27 = arith.constant 0 : i32
    %72 = arith.cmpi eq, %c32_i32_26, %c0_i32_27 : i32
    %c1_i32_28 = arith.constant 1 : i32
    %73 = arith.select %72, %c1_i32_28, %c32_i32_26 : i32
    %74 = vector.broadcast %73 : i32 to vector<64x32xi32>
    %75 = arith.remsi %71, %74 : vector<64x32xi32>
    %c0_i32_29 = arith.constant 0 : i32
    %76 = vector.broadcast %c0_i32_29 : i32 to vector<64x32xi32>
    %77 = arith.cmpi ne, %75, %76 : vector<64x32xi32>
    %c0_i32_30 = arith.constant 0 : i32
    %78 = vector.broadcast %c0_i32_30 : i32 to vector<64x32xi32>
    %79 = arith.cmpi slt, %75, %78 : vector<64x32xi32>
    %c0_i32_31 = arith.constant 0 : i32
    %80 = arith.cmpi slt, %73, %c0_i32_31 : i32
    %81 = vector.broadcast %80 : i1 to vector<64x32xi1>
    %82 = vector.broadcast %81 : vector<64x32xi1> to vector<64x32xi1>
    %83 = arith.xori %79, %82 : vector<64x32xi1>
    %84 = arith.andi %83, %77 : vector<64x32xi1>
    %85 = vector.broadcast %73 : i32 to vector<64x32xi32>
    %86 = arith.addi %75, %85 : vector<64x32xi32>
    %87 = arith.select %84, %86, %75 : vector<64x32xi1>, vector<64x32xi32>
    %c1_i32_32 = arith.constant 1 : i32
    %88 = tpu.dynamic_rotate %70 by %c1_i32_32 dim 0 : vector<64x32xf32>, i32 -> vector<64x32xf32>
    %c1_i32_33 = arith.constant 1 : i32
    %89 = vector.broadcast %c1_i32_33 : i32 to vector<64x32xi32>
    %90 = arith.cmpi sge, %87, %89 : vector<64x32xi32>
    %c33_i32_34 = arith.constant 33 : i32
    %91 = vector.broadcast %c33_i32_34 : i32 to vector<64x32xi32>
    %92 = arith.cmpi slt, %87, %91 : vector<64x32xi32>
    %93 = arith.andi %90, %92 : vector<64x32xi1>
    %cst_35 = arith.constant 0.000000e+00 : f32
    %94 = vector.broadcast %cst_35 : f32 to vector<64x32xf32>
    %95 = arith.select %93, %88, %94 : vector<64x32xi1>, vector<64x32xf32>
    %c0_36 = arith.constant 0 : index
    %c0_37 = arith.constant 0 : index
    %96 = vector.load %arg5[%c0_36, %c0_37] : memref<96x64xf32, #tpu.memory_space<vmem>>, vector<32x64xf32>
    %cst_38 = arith.constant dense<0.000000e+00> : vector<64x64xf32>
    %97 = tpu.matmul %95, %96, %cst_38 {dimension_numbers = #tpu.dot_dimension_numbers<[1], [0], [0], [1], [0, 0, 1, 1], [], []>} : vector<64x32xf32>, vector<32x64xf32>, vector<64x64xf32> -> vector<64x64xf32>
    %c32_39 = arith.constant 32 : index
    %c0_40 = arith.constant 0 : index
    %98 = vector.load %arg5[%c32_39, %c0_40] : memref<96x64xf32, #tpu.memory_space<vmem>>, vector<32x64xf32>
    %cst_41 = arith.constant dense<0.000000e+00> : vector<64x64xf32>
    %99 = tpu.matmul %70, %98, %cst_41 {dimension_numbers = #tpu.dot_dimension_numbers<[1], [0], [0], [1], [0, 0, 1, 1], [], []>} : vector<64x32xf32>, vector<32x64xf32>, vector<64x64xf32> -> vector<64x64xf32>
    %100 = arith.addf %97, %99 : vector<64x64xf32>
    %c63_i32_42 = arith.constant 63 : i32
    %101 = tpu.dynamic_rotate %70 by %c63_i32_42 dim 0 : vector<64x32xf32>, i32 -> vector<64x32xf32>
    %c-1_i32_43 = arith.constant -1 : i32
    %102 = vector.broadcast %c-1_i32_43 : i32 to vector<64x32xi32>
    %103 = arith.cmpi sge, %87, %102 : vector<64x32xi32>
    %c31_i32_44 = arith.constant 31 : i32
    %104 = vector.broadcast %c31_i32_44 : i32 to vector<64x32xi32>
    %105 = arith.cmpi slt, %87, %104 : vector<64x32xi32>
    %106 = arith.andi %103, %105 : vector<64x32xi1>
    %cst_45 = arith.constant 0.000000e+00 : f32
    %107 = vector.broadcast %cst_45 : f32 to vector<64x32xf32>
    %108 = arith.select %106, %101, %107 : vector<64x32xi1>, vector<64x32xf32>
    %c64_46 = arith.constant 64 : index
    %c0_47 = arith.constant 0 : index
    %109 = vector.load %arg5[%c64_46, %c0_47] : memref<96x64xf32, #tpu.memory_space<vmem>>, vector<32x64xf32>
    %cst_48 = arith.constant dense<0.000000e+00> : vector<64x64xf32>
    %110 = tpu.matmul %108, %109, %cst_48 {dimension_numbers = #tpu.dot_dimension_numbers<[1], [0], [0], [1], [0, 0, 1, 1], [], []>} : vector<64x32xf32>, vector<32x64xf32>, vector<64x64xf32> -> vector<64x64xf32>
    %111 = arith.addf %100, %110 : vector<64x64xf32>
    %c0_49 = arith.constant 0 : index
    %c0_50 = arith.constant 0 : index
    %112 = vector.load %arg6[%c0_49, %c0_50] : memref<1x64xf32, #tpu.memory_space<vmem>>, vector<1x64xf32>
    %113 = vector.broadcast %112 : vector<1x64xf32> to vector<64x64xf32>
    %114 = arith.mulf %111, %113 : vector<64x64xf32>
    %c0_51 = arith.constant 0 : index
    %c0_52 = arith.constant 0 : index
    %115 = vector.load %arg7[%c0_51, %c0_52] : memref<1x64xf32, #tpu.memory_space<vmem>>, vector<1x64xf32>
    %116 = vector.broadcast %115 : vector<1x64xf32> to vector<64x64xf32>
    %117 = arith.addf %114, %116 : vector<64x64xf32>
    %cst_53 = arith.constant 0.000000e+00 : f32
    %118 = vector.broadcast %cst_53 : f32 to vector<64x64xf32>
    %119 = arith.maximumf %117, %118 : vector<64x64xf32>
    %c63_i32_54 = arith.constant 63 : i32
    %120 = tpu.dynamic_rotate %119 by %c63_i32_54 dim 0 : vector<64x64xf32>, i32 -> vector<64x64xf32>
    %121 = arith.maximumf %119, %120 : vector<64x64xf32>
    %c0_55 = arith.constant 0 : index
    %c0_56 = arith.constant 0 : index
    %122 = vector.load %arg29[%c0_55, %c0_56] : memref<64x64xf32, #tpu.memory_space<vmem>>, vector<64x64xf32>
    tpu.vector_store %arg29[%c0_55, %c0_56], %121 {strides = array<i32>} : memref<64x64xf32, #tpu.memory_space<vmem>>, vector<64x64xf32>,
    %c0_57 = arith.constant 0 : index
    %c0_58 = arith.constant 0 : index
    %123 = tpu.strided_load %arg29[%c0_57, %c0_58] {strides = array<i32: 2, 1>} : memref<64x64xf32, #tpu.memory_space<vmem>>, vector<32x64xf32>
    %124 = tpu.iota {dimensions = array<i32: 0>} : vector<32x64xi32>
    %c16_i32 = arith.constant 16 : i32
    %c0_i32_59 = arith.constant 0 : i32
    %125 = arith.cmpi eq, %c16_i32, %c0_i32_59 : i32
    %c1_i32_60 = arith.constant 1 : i32
    %126 = arith.select %125, %c1_i32_60, %c16_i32 : i32
    %127 = vector.broadcast %126 : i32 to vector<32x64xi32>
    %128 = arith.remsi %124, %127 : vector<32x64xi32>
    %c0_i32_61 = arith.constant 0 : i32
    %129 = vector.broadcast %c0_i32_61 : i32 to vector<32x64xi32>
    %130 = arith.cmpi ne, %128, %129 : vector<32x64xi32>
    %c0_i32_62 = arith.constant 0 : i32
    %131 = vector.broadcast %c0_i32_62 : i32 to vector<32x64xi32>
    %132 = arith.cmpi slt, %128, %131 : vector<32x64xi32>
    %c0_i32_63 = arith.constant 0 : i32
    %133 = arith.cmpi slt, %126, %c0_i32_63 : i32
    %134 = vector.broadcast %133 : i1 to vector<32x64xi1>
    %135 = vector.broadcast %134 : vector<32x64xi1> to vector<32x64xi1>
    %136 = arith.xori %132, %135 : vector<32x64xi1>
    %137 = arith.andi %136, %130 : vector<32x64xi1>
    %138 = vector.broadcast %126 : i32 to vector<32x64xi32>
    %139 = arith.addi %128, %138 : vector<32x64xi32>
    %140 = arith.select %137, %139, %128 : vector<32x64xi1>, vector<32x64xi32>
    %c1_i32_64 = arith.constant 1 : i32
    %141 = tpu.dynamic_rotate %123 by %c1_i32_64 dim 0 : vector<32x64xf32>, i32 -> vector<32x64xf32>
    %c1_i32_65 = arith.constant 1 : i32
    %142 = vector.broadcast %c1_i32_65 : i32 to vector<32x64xi32>
    %143 = arith.cmpi sge, %140, %142 : vector<32x64xi32>
    %c17_i32 = arith.constant 17 : i32
    %144 = vector.broadcast %c17_i32 : i32 to vector<32x64xi32>
    %145 = arith.cmpi slt, %140, %144 : vector<32x64xi32>
    %146 = arith.andi %143, %145 : vector<32x64xi1>
    %cst_66 = arith.constant 0.000000e+00 : f32
    %147 = vector.broadcast %cst_66 : f32 to vector<32x64xf32>
    %148 = arith.select %146, %141, %147 : vector<32x64xi1>, vector<32x64xf32>
    %c0_67 = arith.constant 0 : index
    %c0_68 = arith.constant 0 : index
    %149 = vector.load %arg8[%c0_67, %c0_68] : memref<192x128xf32, #tpu.memory_space<vmem>>, vector<64x128xf32>
    %cst_69 = arith.constant dense<0.000000e+00> : vector<32x128xf32>
    %150 = tpu.matmul %148, %149, %cst_69 {dimension_numbers = #tpu.dot_dimension_numbers<[1], [0], [0], [1], [0, 0, 1, 1], [], []>} : vector<32x64xf32>, vector<64x128xf32>, vector<32x128xf32> -> vector<32x128xf32>
    %c64_70 = arith.constant 64 : index
    %c0_71 = arith.constant 0 : index
    %151 = vector.load %arg8[%c64_70, %c0_71] : memref<192x128xf32, #tpu.memory_space<vmem>>, vector<64x128xf32>
    %cst_72 = arith.constant dense<0.000000e+00> : vector<32x128xf32>
    %152 = tpu.matmul %123, %151, %cst_72 {dimension_numbers = #tpu.dot_dimension_numbers<[1], [0], [0], [1], [0, 0, 1, 1], [], []>} : vector<32x64xf32>, vector<64x128xf32>, vector<32x128xf32> -> vector<32x128xf32>
    %153 = arith.addf %150, %152 : vector<32x128xf32>
    %c31_i32_73 = arith.constant 31 : i32
    %154 = tpu.dynamic_rotate %123 by %c31_i32_73 dim 0 : vector<32x64xf32>, i32 -> vector<32x64xf32>
    %c-1_i32_74 = arith.constant -1 : i32
    %155 = vector.broadcast %c-1_i32_74 : i32 to vector<32x64xi32>
    %156 = arith.cmpi sge, %140, %155 : vector<32x64xi32>
    %c15_i32 = arith.constant 15 : i32
    %157 = vector.broadcast %c15_i32 : i32 to vector<32x64xi32>
    %158 = arith.cmpi slt, %140, %157 : vector<32x64xi32>
    %159 = arith.andi %156, %158 : vector<32x64xi1>
    %cst_75 = arith.constant 0.000000e+00 : f32
    %160 = vector.broadcast %cst_75 : f32 to vector<32x64xf32>
    %161 = arith.select %159, %154, %160 : vector<32x64xi1>, vector<32x64xf32>
    %c128_76 = arith.constant 128 : index
    %c0_77 = arith.constant 0 : index
    %162 = vector.load %arg8[%c128_76, %c0_77] : memref<192x128xf32, #tpu.memory_space<vmem>>, vector<64x128xf32>
    %cst_78 = arith.constant dense<0.000000e+00> : vector<32x128xf32>
    %163 = tpu.matmul %161, %162, %cst_78 {dimension_numbers = #tpu.dot_dimension_numbers<[1], [0], [0], [1], [0, 0, 1, 1], [], []>} : vector<32x64xf32>, vector<64x128xf32>, vector<32x128xf32> -> vector<32x128xf32>
    %164 = arith.addf %153, %163 : vector<32x128xf32>
    %c0_79 = arith.constant 0 : index
    %c0_80 = arith.constant 0 : index
    %165 = vector.load %arg9[%c0_79, %c0_80] : memref<1x128xf32, #tpu.memory_space<vmem>>, vector<1x128xf32>
    %166 = vector.broadcast %165 : vector<1x128xf32> to vector<32x128xf32>
    %167 = arith.mulf %164, %166 : vector<32x128xf32>
    %c0_81 = arith.constant 0 : index
    %c0_82 = arith.constant 0 : index
    %168 = vector.load %arg10[%c0_81, %c0_82] : memref<1x128xf32, #tpu.memory_space<vmem>>, vector<1x128xf32>
    %169 = vector.broadcast %168 : vector<1x128xf32> to vector<32x128xf32>
    %170 = arith.addf %167, %169 : vector<32x128xf32>
    %cst_83 = arith.constant 0.000000e+00 : f32
    %171 = vector.broadcast %cst_83 : f32 to vector<32x128xf32>
    %172 = arith.maximumf %170, %171 : vector<32x128xf32>
    %173 = tpu.iota {dimensions = array<i32: 0>} : vector<32x128xi32>
    %c16_i32_84 = arith.constant 16 : i32
    %c0_i32_85 = arith.constant 0 : i32
    %174 = arith.cmpi eq, %c16_i32_84, %c0_i32_85 : i32
    %c1_i32_86 = arith.constant 1 : i32
    %175 = arith.select %174, %c1_i32_86, %c16_i32_84 : i32
    %176 = vector.broadcast %175 : i32 to vector<32x128xi32>
    %177 = arith.remsi %173, %176 : vector<32x128xi32>
    %c0_i32_87 = arith.constant 0 : i32
    %178 = vector.broadcast %c0_i32_87 : i32 to vector<32x128xi32>
    %179 = arith.cmpi ne, %177, %178 : vector<32x128xi32>
    %c0_i32_88 = arith.constant 0 : i32
    %180 = vector.broadcast %c0_i32_88 : i32 to vector<32x128xi32>
    %181 = arith.cmpi slt, %177, %180 : vector<32x128xi32>
    %c0_i32_89 = arith.constant 0 : i32
    %182 = arith.cmpi slt, %175, %c0_i32_89 : i32
    %183 = vector.broadcast %182 : i1 to vector<32x128xi1>
    %184 = vector.broadcast %183 : vector<32x128xi1> to vector<32x128xi1>
    %185 = arith.xori %181, %184 : vector<32x128xi1>
    %186 = arith.andi %185, %179 : vector<32x128xi1>
    %187 = vector.broadcast %175 : i32 to vector<32x128xi32>
    %188 = arith.addi %177, %187 : vector<32x128xi32>
    %189 = arith.select %186, %188, %177 : vector<32x128xi1>, vector<32x128xi32>
    %c1_i32_90 = arith.constant 1 : i32
    %190 = tpu.dynamic_rotate %172 by %c1_i32_90 dim 0 : vector<32x128xf32>, i32 -> vector<32x128xf32>
    %c1_i32_91 = arith.constant 1 : i32
    %191 = vector.broadcast %c1_i32_91 : i32 to vector<32x128xi32>
    %192 = arith.cmpi sge, %189, %191 : vector<32x128xi32>
    %c17_i32_92 = arith.constant 17 : i32
    %193 = vector.broadcast %c17_i32_92 : i32 to vector<32x128xi32>
    %194 = arith.cmpi slt, %189, %193 : vector<32x128xi32>
    %195 = arith.andi %192, %194 : vector<32x128xi1>
    %cst_93 = arith.constant 0.000000e+00 : f32
    %196 = vector.broadcast %cst_93 : f32 to vector<32x128xf32>
    %197 = arith.select %195, %190, %196 : vector<32x128xi1>, vector<32x128xf32>
    %c0_94 = arith.constant 0 : index
    %c0_95 = arith.constant 0 : index
    %198 = vector.load %arg11[%c0_94, %c0_95] : memref<384x128xf32, #tpu.memory_space<vmem>>, vector<128x128xf32>
    %cst_96 = arith.constant dense<0.000000e+00> : vector<32x128xf32>
    %199 = tpu.matmul %197, %198, %cst_96 {dimension_numbers = #tpu.dot_dimension_numbers<[1], [0], [0], [1], [0, 0, 1, 1], [], []>} : vector<32x128xf32>, vector<128x128xf32>, vector<32x128xf32> -> vector<32x128xf32>
    %c128_97 = arith.constant 128 : index
    %c0_98 = arith.constant 0 : index
    %200 = vector.load %arg11[%c128_97, %c0_98] : memref<384x128xf32, #tpu.memory_space<vmem>>, vector<128x128xf32>
    %cst_99 = arith.constant dense<0.000000e+00> : vector<32x128xf32>
    %201 = tpu.matmul %172, %200, %cst_99 {dimension_numbers = #tpu.dot_dimension_numbers<[1], [0], [0], [1], [0, 0, 1, 1], [], []>} : vector<32x128xf32>, vector<128x128xf32>, vector<32x128xf32> -> vector<32x128xf32>
    %202 = arith.addf %199, %201 : vector<32x128xf32>
    %c31_i32_100 = arith.constant 31 : i32
    %203 = tpu.dynamic_rotate %172 by %c31_i32_100 dim 0 : vector<32x128xf32>, i32 -> vector<32x128xf32>
    %c-1_i32_101 = arith.constant -1 : i32
    %204 = vector.broadcast %c-1_i32_101 : i32 to vector<32x128xi32>
    %205 = arith.cmpi sge, %189, %204 : vector<32x128xi32>
    %c15_i32_102 = arith.constant 15 : i32
    %206 = vector.broadcast %c15_i32_102 : i32 to vector<32x128xi32>
    %207 = arith.cmpi slt, %189, %206 : vector<32x128xi32>
    %208 = arith.andi %205, %207 : vector<32x128xi1>
    %cst_103 = arith.constant 0.000000e+00 : f32
    %209 = vector.broadcast %cst_103 : f32 to vector<32x128xf32>
    %210 = arith.select %208, %203, %209 : vector<32x128xi1>, vector<32x128xf32>
    %c256 = arith.constant 256 : index
    %c0_104 = arith.constant 0 : index
    %211 = vector.load %arg11[%c256, %c0_104] : memref<384x128xf32, #tpu.memory_space<vmem>>, vector<128x128xf32>
    %cst_105 = arith.constant dense<0.000000e+00> : vector<32x128xf32>
    %212 = tpu.matmul %210, %211, %cst_105 {dimension_numbers = #tpu.dot_dimension_numbers<[1], [0], [0], [1], [0, 0, 1, 1], [], []>} : vector<32x128xf32>, vector<128x128xf32>, vector<32x128xf32> -> vector<32x128xf32>
    %213 = arith.addf %202, %212 : vector<32x128xf32>
    %c0_106 = arith.constant 0 : index
    %c0_107 = arith.constant 0 : index
    %214 = vector.load %arg12[%c0_106, %c0_107] : memref<1x128xf32, #tpu.memory_space<vmem>>, vector<1x128xf32>
    %215 = vector.broadcast %214 : vector<1x128xf32> to vector<32x128xf32>
    %216 = arith.mulf %213, %215 : vector<32x128xf32>
    %c0_108 = arith.constant 0 : index
    %c0_109 = arith.constant 0 : index
    %217 = vector.load %arg13[%c0_108, %c0_109] : memref<1x128xf32, #tpu.memory_space<vmem>>, vector<1x128xf32>
    %218 = vector.broadcast %217 : vector<1x128xf32> to vector<32x128xf32>
    %219 = arith.addf %216, %218 : vector<32x128xf32>
    %cst_110 = arith.constant 0.000000e+00 : f32
    %220 = vector.broadcast %cst_110 : f32 to vector<32x128xf32>
    %221 = arith.maximumf %219, %220 : vector<32x128xf32>
    %222 = tpu.iota {dimensions = array<i32: 0>} : vector<32x128xi32>
    %c16_i32_111 = arith.constant 16 : i32
    %c0_i32_112 = arith.constant 0 : i32
    %223 = arith.cmpi eq, %c16_i32_111, %c0_i32_112 : i32
    %c1_i32_113 = arith.constant 1 : i32
    %224 = arith.select %223, %c1_i32_113, %c16_i32_111 : i32
    %225 = vector.broadcast %224 : i32 to vector<32x128xi32>
    %226 = arith.remsi %222, %225 : vector<32x128xi32>
    %c0_i32_114 = arith.constant 0 : i32
    %227 = vector.broadcast %c0_i32_114 : i32 to vector<32x128xi32>
    %228 = arith.cmpi ne, %226, %227 : vector<32x128xi32>
    %c0_i32_115 = arith.constant 0 : i32
    %229 = vector.broadcast %c0_i32_115 : i32 to vector<32x128xi32>
    %230 = arith.cmpi slt, %226, %229 : vector<32x128xi32>
    %c0_i32_116 = arith.constant 0 : i32
    %231 = arith.cmpi slt, %224, %c0_i32_116 : i32
    %232 = vector.broadcast %231 : i1 to vector<32x128xi1>
    %233 = vector.broadcast %232 : vector<32x128xi1> to vector<32x128xi1>
    %234 = arith.xori %230, %233 : vector<32x128xi1>
    %235 = arith.andi %234, %228 : vector<32x128xi1>
    %236 = vector.broadcast %224 : i32 to vector<32x128xi32>
    %237 = arith.addi %226, %236 : vector<32x128xi32>
    %238 = arith.select %235, %237, %226 : vector<32x128xi1>, vector<32x128xi32>
    %c1_i32_117 = arith.constant 1 : i32
    %239 = tpu.dynamic_rotate %221 by %c1_i32_117 dim 0 : vector<32x128xf32>, i32 -> vector<32x128xf32>
    %c1_i32_118 = arith.constant 1 : i32
    %240 = vector.broadcast %c1_i32_118 : i32 to vector<32x128xi32>
    %241 = arith.cmpi sge, %238, %240 : vector<32x128xi32>
    %c17_i32_119 = arith.constant 17 : i32
    %242 = vector.broadcast %c17_i32_119 : i32 to vector<32x128xi32>
    %243 = arith.cmpi slt, %238, %242 : vector<32x128xi32>
    %244 = arith.andi %241, %243 : vector<32x128xi1>
    %cst_120 = arith.constant 0.000000e+00 : f32
    %245 = vector.broadcast %cst_120 : f32 to vector<32x128xf32>
    %246 = arith.select %244, %239, %245 : vector<32x128xi1>, vector<32x128xf32>
    %c0_121 = arith.constant 0 : index
    %c0_122 = arith.constant 0 : index
    %247 = vector.load %arg14[%c0_121, %c0_122] : memref<384x128xf32, #tpu.memory_space<vmem>>, vector<128x128xf32>
    %cst_123 = arith.constant dense<0.000000e+00> : vector<32x128xf32>
    %248 = tpu.matmul %246, %247, %cst_123 {dimension_numbers = #tpu.dot_dimension_numbers<[1], [0], [0], [1], [0, 0, 1, 1], [], []>} : vector<32x128xf32>, vector<128x128xf32>, vector<32x128xf32> -> vector<32x128xf32>
    %c128_124 = arith.constant 128 : index
    %c0_125 = arith.constant 0 : index
    %249 = vector.load %arg14[%c128_124, %c0_125] : memref<384x128xf32, #tpu.memory_space<vmem>>, vector<128x128xf32>
    %cst_126 = arith.constant dense<0.000000e+00> : vector<32x128xf32>
    %250 = tpu.matmul %221, %249, %cst_126 {dimension_numbers = #tpu.dot_dimension_numbers<[1], [0], [0], [1], [0, 0, 1, 1], [], []>} : vector<32x128xf32>, vector<128x128xf32>, vector<32x128xf32> -> vector<32x128xf32>
    %251 = arith.addf %248, %250 : vector<32x128xf32>
    %c31_i32_127 = arith.constant 31 : i32
    %252 = tpu.dynamic_rotate %221 by %c31_i32_127 dim 0 : vector<32x128xf32>, i32 -> vector<32x128xf32>
    %c-1_i32_128 = arith.constant -1 : i32
    %253 = vector.broadcast %c-1_i32_128 : i32 to vector<32x128xi32>
    %254 = arith.cmpi sge, %238, %253 : vector<32x128xi32>
    %c15_i32_129 = arith.constant 15 : i32
    %255 = vector.broadcast %c15_i32_129 : i32 to vector<32x128xi32>
    %256 = arith.cmpi slt, %238, %255 : vector<32x128xi32>
    %257 = arith.andi %254, %256 : vector<32x128xi1>
    %cst_130 = arith.constant 0.000000e+00 : f32
    %258 = vector.broadcast %cst_130 : f32 to vector<32x128xf32>
    %259 = arith.select %257, %252, %258 : vector<32x128xi1>, vector<32x128xf32>
    %c256_131 = arith.constant 256 : index
    %c0_132 = arith.constant 0 : index
    %260 = vector.load %arg14[%c256_131, %c0_132] : memref<384x128xf32, #tpu.memory_space<vmem>>, vector<128x128xf32>
    %cst_133 = arith.constant dense<0.000000e+00> : vector<32x128xf32>
    %261 = tpu.matmul %259, %260, %cst_133 {dimension_numbers = #tpu.dot_dimension_numbers<[1], [0], [0], [1], [0, 0, 1, 1], [], []>} : vector<32x128xf32>, vector<128x128xf32>, vector<32x128xf32> -> vector<32x128xf32>
    %262 = arith.addf %251, %261 : vector<32x128xf32>
    %c0_134 = arith.constant 0 : index
    %c0_135 = arith.constant 0 : index
    %263 = vector.load %arg15[%c0_134, %c0_135] : memref<1x128xf32, #tpu.memory_space<vmem>>, vector<1x128xf32>
    %264 = vector.broadcast %263 : vector<1x128xf32> to vector<32x128xf32>
    %265 = arith.mulf %262, %264 : vector<32x128xf32>
    %c0_136 = arith.constant 0 : index
    %c0_137 = arith.constant 0 : index
    %266 = vector.load %arg16[%c0_136, %c0_137] : memref<1x128xf32, #tpu.memory_space<vmem>>, vector<1x128xf32>
    %267 = vector.broadcast %266 : vector<1x128xf32> to vector<32x128xf32>
    %268 = arith.addf %265, %267 : vector<32x128xf32>
    %cst_138 = arith.constant 0.000000e+00 : f32
    %269 = vector.broadcast %cst_138 : f32 to vector<32x128xf32>
    %270 = arith.maximumf %268, %269 : vector<32x128xf32>
    %c31_i32_139 = arith.constant 31 : i32
    %271 = tpu.dynamic_rotate %270 by %c31_i32_139 dim 0 : vector<32x128xf32>, i32 -> vector<32x128xf32>
    %272 = arith.maximumf %270, %271 : vector<32x128xf32>
    %c0_140 = arith.constant 0 : index
    %c0_141 = arith.constant 0 : index
    %273 = vector.load %arg30[%c0_140, %c0_141] : memref<32x128xf32, #tpu.memory_space<vmem>>, vector<32x128xf32>
    tpu.vector_store %arg30[%c0_140, %c0_141], %272 {strides = array<i32>} : memref<32x128xf32, #tpu.memory_space<vmem>>, vector<32x128xf32>,
    %c0_142 = arith.constant 0 : index
    %c0_143 = arith.constant 0 : index
    %274 = tpu.strided_load %arg30[%c0_142, %c0_143] {strides = array<i32: 2, 1>} : memref<32x128xf32, #tpu.memory_space<vmem>>, vector<16x128xf32>
    %275 = tpu.iota {dimensions = array<i32: 0>} : vector<16x128xi32>
    %c8_i32 = arith.constant 8 : i32
    %c0_i32_144 = arith.constant 0 : i32
    %276 = arith.cmpi eq, %c8_i32, %c0_i32_144 : i32
    %c1_i32_145 = arith.constant 1 : i32
    %277 = arith.select %276, %c1_i32_145, %c8_i32 : i32
    %278 = vector.broadcast %277 : i32 to vector<16x128xi32>
    %279 = arith.remsi %275, %278 : vector<16x128xi32>
    %c0_i32_146 = arith.constant 0 : i32
    %280 = vector.broadcast %c0_i32_146 : i32 to vector<16x128xi32>
    %281 = arith.cmpi ne, %279, %280 : vector<16x128xi32>
    %c0_i32_147 = arith.constant 0 : i32
    %282 = vector.broadcast %c0_i32_147 : i32 to vector<16x128xi32>
    %283 = arith.cmpi slt, %279, %282 : vector<16x128xi32>
    %c0_i32_148 = arith.constant 0 : i32
    %284 = arith.cmpi slt, %277, %c0_i32_148 : i32
    %285 = vector.broadcast %284 : i1 to vector<16x128xi1>
    %286 = vector.broadcast %285 : vector<16x128xi1> to vector<16x128xi1>
    %287 = arith.xori %283, %286 : vector<16x128xi1>
    %288 = arith.andi %287, %281 : vector<16x128xi1>
    %289 = vector.broadcast %277 : i32 to vector<16x128xi32>
    %290 = arith.addi %279, %289 : vector<16x128xi32>
    %291 = arith.select %288, %290, %279 : vector<16x128xi1>, vector<16x128xi32>
    %c1_i32_149 = arith.constant 1 : i32
    %292 = tpu.dynamic_rotate %274 by %c1_i32_149 dim 0 : vector<16x128xf32>, i32 -> vector<16x128xf32>
    %c1_i32_150 = arith.constant 1 : i32
    %293 = vector.broadcast %c1_i32_150 : i32 to vector<16x128xi32>
    %294 = arith.cmpi sge, %291, %293 : vector<16x128xi32>
    %c9_i32 = arith.constant 9 : i32
    %295 = vector.broadcast %c9_i32 : i32 to vector<16x128xi32>
    %296 = arith.cmpi slt, %291, %295 : vector<16x128xi32>
    %297 = arith.andi %294, %296 : vector<16x128xi1>
    %cst_151 = arith.constant 0.000000e+00 : f32
    %298 = vector.broadcast %cst_151 : f32 to vector<16x128xf32>
    %299 = arith.select %297, %292, %298 : vector<16x128xi1>, vector<16x128xf32>
    %c0_152 = arith.constant 0 : index
    %c0_153 = arith.constant 0 : index
    %300 = vector.load %arg17[%c0_152, %c0_153] : memref<384x128xf32, #tpu.memory_space<vmem>>, vector<128x128xf32>
    %cst_154 = arith.constant dense<0.000000e+00> : vector<16x128xf32>
    %301 = tpu.matmul %299, %300, %cst_154 {dimension_numbers = #tpu.dot_dimension_numbers<[1], [0], [0], [1], [0, 0, 1, 1], [], []>} : vector<16x128xf32>, vector<128x128xf32>, vector<16x128xf32> -> vector<16x128xf32>
    %c128_155 = arith.constant 128 : index
    %c0_156 = arith.constant 0 : index
    %302 = vector.load %arg17[%c128_155, %c0_156] : memref<384x128xf32, #tpu.memory_space<vmem>>, vector<128x128xf32>
    %cst_157 = arith.constant dense<0.000000e+00> : vector<16x128xf32>
    %303 = tpu.matmul %274, %302, %cst_157 {dimension_numbers = #tpu.dot_dimension_numbers<[1], [0], [0], [1], [0, 0, 1, 1], [], []>} : vector<16x128xf32>, vector<128x128xf32>, vector<16x128xf32> -> vector<16x128xf32>
    %304 = arith.addf %301, %303 : vector<16x128xf32>
    %c15_i32_158 = arith.constant 15 : i32
    %305 = tpu.dynamic_rotate %274 by %c15_i32_158 dim 0 : vector<16x128xf32>, i32 -> vector<16x128xf32>
    %c-1_i32_159 = arith.constant -1 : i32
    %306 = vector.broadcast %c-1_i32_159 : i32 to vector<16x128xi32>
    %307 = arith.cmpi sge, %291, %306 : vector<16x128xi32>
    %c7_i32 = arith.constant 7 : i32
    %308 = vector.broadcast %c7_i32 : i32 to vector<16x128xi32>
    %309 = arith.cmpi slt, %291, %308 : vector<16x128xi32>
    %310 = arith.andi %307, %309 : vector<16x128xi1>
    %cst_160 = arith.constant 0.000000e+00 : f32
    %311 = vector.broadcast %cst_160 : f32 to vector<16x128xf32>
    %312 = arith.select %310, %305, %311 : vector<16x128xi1>, vector<16x128xf32>
    %c256_161 = arith.constant 256 : index
    %c0_162 = arith.constant 0 : index
    %313 = vector.load %arg17[%c256_161, %c0_162] : memref<384x128xf32, #tpu.memory_space<vmem>>, vector<128x128xf32>
    %cst_163 = arith.constant dense<0.000000e+00> : vector<16x128xf32>
    %314 = tpu.matmul %312, %313, %cst_163 {dimension_numbers = #tpu.dot_dimension_numbers<[1], [0], [0], [1], [0, 0, 1, 1], [], []>} : vector<16x128xf32>, vector<128x128xf32>, vector<16x128xf32> -> vector<16x128xf32>
    %315 = arith.addf %304, %314 : vector<16x128xf32>
    %c0_164 = arith.constant 0 : index
    %c0_165 = arith.constant 0 : index
    %316 = vector.load %arg18[%c0_164, %c0_165] : memref<1x128xf32, #tpu.memory_space<vmem>>, vector<1x128xf32>
    %317 = vector.broadcast %316 : vector<1x128xf32> to vector<16x128xf32>
    %318 = arith.mulf %315, %317 : vector<16x128xf32>
    %c0_166 = arith.constant 0 : index
    %c0_167 = arith.constant 0 : index
    %319 = vector.load %arg19[%c0_166, %c0_167] : memref<1x128xf32, #tpu.memory_space<vmem>>, vector<1x128xf32>
    %320 = vector.broadcast %319 : vector<1x128xf32> to vector<16x128xf32>
    %321 = arith.addf %318, %320 : vector<16x128xf32>
    %cst_168 = arith.constant 0.000000e+00 : f32
    %322 = vector.broadcast %cst_168 : f32 to vector<16x128xf32>
    %323 = arith.maximumf %321, %322 : vector<16x128xf32>
    %324 = tpu.iota {dimensions = array<i32: 0>} : vector<16x128xi32>
    %c8_i32_169 = arith.constant 8 : i32
    %c0_i32_170 = arith.constant 0 : i32
    %325 = arith.cmpi eq, %c8_i32_169, %c0_i32_170 : i32
    %c1_i32_171 = arith.constant 1 : i32
    %326 = arith.select %325, %c1_i32_171, %c8_i32_169 : i32
    %327 = vector.broadcast %326 : i32 to vector<16x128xi32>
    %328 = arith.remsi %324, %327 : vector<16x128xi32>
    %c0_i32_172 = arith.constant 0 : i32
    %329 = vector.broadcast %c0_i32_172 : i32 to vector<16x128xi32>
    %330 = arith.cmpi ne, %328, %329 : vector<16x128xi32>
    %c0_i32_173 = arith.constant 0 : i32
    %331 = vector.broadcast %c0_i32_173 : i32 to vector<16x128xi32>
    %332 = arith.cmpi slt, %328, %331 : vector<16x128xi32>
    %c0_i32_174 = arith.constant 0 : i32
    %333 = arith.cmpi slt, %326, %c0_i32_174 : i32
    %334 = vector.broadcast %333 : i1 to vector<16x128xi1>
    %335 = vector.broadcast %334 : vector<16x128xi1> to vector<16x128xi1>
    %336 = arith.xori %332, %335 : vector<16x128xi1>
    %337 = arith.andi %336, %330 : vector<16x128xi1>
    %338 = vector.broadcast %326 : i32 to vector<16x128xi32>
    %339 = arith.addi %328, %338 : vector<16x128xi32>
    %340 = arith.select %337, %339, %328 : vector<16x128xi1>, vector<16x128xi32>
    %c1_i32_175 = arith.constant 1 : i32
    %341 = tpu.dynamic_rotate %323 by %c1_i32_175 dim 0 : vector<16x128xf32>, i32 -> vector<16x128xf32>
    %c1_i32_176 = arith.constant 1 : i32
    %342 = vector.broadcast %c1_i32_176 : i32 to vector<16x128xi32>
    %343 = arith.cmpi sge, %340, %342 : vector<16x128xi32>
    %c9_i32_177 = arith.constant 9 : i32
    %344 = vector.broadcast %c9_i32_177 : i32 to vector<16x128xi32>
    %345 = arith.cmpi slt, %340, %344 : vector<16x128xi32>
    %346 = arith.andi %343, %345 : vector<16x128xi1>
    %cst_178 = arith.constant 0.000000e+00 : f32
    %347 = vector.broadcast %cst_178 : f32 to vector<16x128xf32>
    %348 = arith.select %346, %341, %347 : vector<16x128xi1>, vector<16x128xf32>
    %c0_179 = arith.constant 0 : index
    %c0_180 = arith.constant 0 : index
    %349 = vector.load %arg20[%c0_179, %c0_180] : memref<384x64xf32, #tpu.memory_space<vmem>>, vector<128x64xf32>
    %cst_181 = arith.constant dense<0.000000e+00> : vector<16x64xf32>
    %350 = tpu.matmul %348, %349, %cst_181 {dimension_numbers = #tpu.dot_dimension_numbers<[1], [0], [0], [1], [0, 0, 1, 1], [], []>} : vector<16x128xf32>, vector<128x64xf32>, vector<16x64xf32> -> vector<16x64xf32>
    %c128_182 = arith.constant 128 : index
    %c0_183 = arith.constant 0 : index
    %351 = vector.load %arg20[%c128_182, %c0_183] : memref<384x64xf32, #tpu.memory_space<vmem>>, vector<128x64xf32>
    %cst_184 = arith.constant dense<0.000000e+00> : vector<16x64xf32>
    %352 = tpu.matmul %323, %351, %cst_184 {dimension_numbers = #tpu.dot_dimension_numbers<[1], [0], [0], [1], [0, 0, 1, 1], [], []>} : vector<16x128xf32>, vector<128x64xf32>, vector<16x64xf32> -> vector<16x64xf32>
    %353 = arith.addf %350, %352 : vector<16x64xf32>
    %c15_i32_185 = arith.constant 15 : i32
    %354 = tpu.dynamic_rotate %323 by %c15_i32_185 dim 0 : vector<16x128xf32>, i32 -> vector<16x128xf32>
    %c-1_i32_186 = arith.constant -1 : i32
    %355 = vector.broadcast %c-1_i32_186 : i32 to vector<16x128xi32>
    %356 = arith.cmpi sge, %340, %355 : vector<16x128xi32>
    %c7_i32_187 = arith.constant 7 : i32
    %357 = vector.broadcast %c7_i32_187 : i32 to vector<16x128xi32>
    %358 = arith.cmpi slt, %340, %357 : vector<16x128xi32>
    %359 = arith.andi %356, %358 : vector<16x128xi1>
    %cst_188 = arith.constant 0.000000e+00 : f32
    %360 = vector.broadcast %cst_188 : f32 to vector<16x128xf32>
    %361 = arith.select %359, %354, %360 : vector<16x128xi1>, vector<16x128xf32>
    %c256_189 = arith.constant 256 : index
    %c0_190 = arith.constant 0 : index
    %362 = vector.load %arg20[%c256_189, %c0_190] : memref<384x64xf32, #tpu.memory_space<vmem>>, vector<128x64xf32>
    %cst_191 = arith.constant dense<0.000000e+00> : vector<16x64xf32>
    %363 = tpu.matmul %361, %362, %cst_191 {dimension_numbers = #tpu.dot_dimension_numbers<[1], [0], [0], [1], [0, 0, 1, 1], [], []>} : vector<16x128xf32>, vector<128x64xf32>, vector<16x64xf32> -> vector<16x64xf32>
    %364 = arith.addf %353, %363 : vector<16x64xf32>
    %c0_192 = arith.constant 0 : index
    %c0_193 = arith.constant 0 : index
    %365 = vector.load %arg21[%c0_192, %c0_193] : memref<1x64xf32, #tpu.memory_space<vmem>>, vector<1x64xf32>
    %366 = vector.broadcast %365 : vector<1x64xf32> to vector<16x64xf32>
    %367 = arith.mulf %364, %366 : vector<16x64xf32>
    %c0_194 = arith.constant 0 : index
    %c0_195 = arith.constant 0 : index
    %368 = vector.load %arg22[%c0_194, %c0_195] : memref<1x64xf32, #tpu.memory_space<vmem>>, vector<1x64xf32>
    %369 = vector.broadcast %368 : vector<1x64xf32> to vector<16x64xf32>
    %370 = arith.addf %367, %369 : vector<16x64xf32>
    %cst_196 = arith.constant 0.000000e+00 : f32
    %371 = vector.broadcast %cst_196 : f32 to vector<16x64xf32>
    %372 = arith.maximumf %370, %371 : vector<16x64xf32>
    %c15_i32_197 = arith.constant 15 : i32
    %373 = tpu.dynamic_rotate %372 by %c15_i32_197 dim 0 : vector<16x64xf32>, i32 -> vector<16x64xf32>
    %374 = arith.maximumf %372, %373 : vector<16x64xf32>
    %c0_198 = arith.constant 0 : index
    %c0_199 = arith.constant 0 : index
    %375 = vector.load %arg31[%c0_198, %c0_199] : memref<16x64xf32, #tpu.memory_space<vmem>>, vector<16x64xf32>
    tpu.vector_store %arg31[%c0_198, %c0_199], %374 {strides = array<i32>} : memref<16x64xf32, #tpu.memory_space<vmem>>, vector<16x64xf32>,
    %c0_200 = arith.constant 0 : index
    %c0_201 = arith.constant 0 : index
    %376 = tpu.strided_load %arg31[%c0_200, %c0_201] {strides = array<i32: 2, 1>} : memref<16x64xf32, #tpu.memory_space<vmem>>, vector<8x64xf32>
    %377 = tpu.iota {dimensions = array<i32: 0>} : vector<8x64xi32>
    %c4_i32 = arith.constant 4 : i32
    %c0_i32_202 = arith.constant 0 : i32
    %378 = arith.cmpi eq, %c4_i32, %c0_i32_202 : i32
    %c1_i32_203 = arith.constant 1 : i32
    %379 = arith.select %378, %c1_i32_203, %c4_i32 : i32
    %380 = vector.broadcast %379 : i32 to vector<8x64xi32>
    %381 = arith.remsi %377, %380 : vector<8x64xi32>
    %c0_i32_204 = arith.constant 0 : i32
    %382 = vector.broadcast %c0_i32_204 : i32 to vector<8x64xi32>
    %383 = arith.cmpi ne, %381, %382 : vector<8x64xi32>
    %c0_i32_205 = arith.constant 0 : i32
    %384 = vector.broadcast %c0_i32_205 : i32 to vector<8x64xi32>
    %385 = arith.cmpi slt, %381, %384 : vector<8x64xi32>
    %c0_i32_206 = arith.constant 0 : i32
    %386 = arith.cmpi slt, %379, %c0_i32_206 : i32
    %387 = vector.broadcast %386 : i1 to vector<8x64xi1>
    %388 = vector.broadcast %387 : vector<8x64xi1> to vector<8x64xi1>
    %389 = arith.xori %385, %388 : vector<8x64xi1>
    %390 = arith.andi %389, %383 : vector<8x64xi1>
    %391 = vector.broadcast %379 : i32 to vector<8x64xi32>
    %392 = arith.addi %381, %391 : vector<8x64xi32>
    %393 = arith.select %390, %392, %381 : vector<8x64xi1>, vector<8x64xi32>
    %c1_i32_207 = arith.constant 1 : i32
    %394 = tpu.dynamic_rotate %376 by %c1_i32_207 dim 0 : vector<8x64xf32>, i32 -> vector<8x64xf32>
    %c1_i32_208 = arith.constant 1 : i32
    %395 = vector.broadcast %c1_i32_208 : i32 to vector<8x64xi32>
    %396 = arith.cmpi sge, %393, %395 : vector<8x64xi32>
    %c5_i32 = arith.constant 5 : i32
    %397 = vector.broadcast %c5_i32 : i32 to vector<8x64xi32>
    %398 = arith.cmpi slt, %393, %397 : vector<8x64xi32>
    %399 = arith.andi %396, %398 : vector<8x64xi1>
    %cst_209 = arith.constant 0.000000e+00 : f32
    %400 = vector.broadcast %cst_209 : f32 to vector<8x64xf32>
    %401 = arith.select %399, %394, %400 : vector<8x64xi1>, vector<8x64xf32>
    %c0_210 = arith.constant 0 : index
    %c0_211 = arith.constant 0 : index
    %402 = vector.load %arg23[%c0_210, %c0_211] : memref<192x32xf32, #tpu.memory_space<vmem>>, vector<64x32xf32>
    %cst_212 = arith.constant dense<0.000000e+00> : vector<8x32xf32>
    %403 = tpu.matmul %401, %402, %cst_212 {dimension_numbers = #tpu.dot_dimension_numbers<[1], [0], [0], [1], [0, 0, 1, 1], [], []>} : vector<8x64xf32>, vector<64x32xf32>, vector<8x32xf32> -> vector<8x32xf32>
    %c64_213 = arith.constant 64 : index
    %c0_214 = arith.constant 0 : index
    %404 = vector.load %arg23[%c64_213, %c0_214] : memref<192x32xf32, #tpu.memory_space<vmem>>, vector<64x32xf32>
    %cst_215 = arith.constant dense<0.000000e+00> : vector<8x32xf32>
    %405 = tpu.matmul %376, %404, %cst_215 {dimension_numbers = #tpu.dot_dimension_numbers<[1], [0], [0], [1], [0, 0, 1, 1], [], []>} : vector<8x64xf32>, vector<64x32xf32>, vector<8x32xf32> -> vector<8x32xf32>
    %406 = arith.addf %403, %405 : vector<8x32xf32>
    %c7_i32_216 = arith.constant 7 : i32
    %407 = tpu.dynamic_rotate %376 by %c7_i32_216 dim 0 : vector<8x64xf32>, i32 -> vector<8x64xf32>
    %c-1_i32_217 = arith.constant -1 : i32
    %408 = vector.broadcast %c-1_i32_217 : i32 to vector<8x64xi32>
    %409 = arith.cmpi sge, %393, %408 : vector<8x64xi32>
    %c3_i32 = arith.constant 3 : i32
    %410 = vector.broadcast %c3_i32 : i32 to vector<8x64xi32>
    %411 = arith.cmpi slt, %393, %410 : vector<8x64xi32>
    %412 = arith.andi %409, %411 : vector<8x64xi1>
    %cst_218 = arith.constant 0.000000e+00 : f32
    %413 = vector.broadcast %cst_218 : f32 to vector<8x64xf32>
    %414 = arith.select %412, %407, %413 : vector<8x64xi1>, vector<8x64xf32>
    %c128_219 = arith.constant 128 : index
    %c0_220 = arith.constant 0 : index
    %415 = vector.load %arg23[%c128_219, %c0_220] : memref<192x32xf32, #tpu.memory_space<vmem>>, vector<64x32xf32>
    %cst_221 = arith.constant dense<0.000000e+00> : vector<8x32xf32>
    %416 = tpu.matmul %414, %415, %cst_221 {dimension_numbers = #tpu.dot_dimension_numbers<[1], [0], [0], [1], [0, 0, 1, 1], [], []>} : vector<8x64xf32>, vector<64x32xf32>, vector<8x32xf32> -> vector<8x32xf32>
    %417 = arith.addf %406, %416 : vector<8x32xf32>
    %c0_222 = arith.constant 0 : index
    %c0_223 = arith.constant 0 : index
    %418 = vector.load %arg24[%c0_222, %c0_223] : memref<1x32xf32, #tpu.memory_space<vmem>>, vector<1x32xf32>
    %419 = vector.broadcast %418 : vector<1x32xf32> to vector<8x32xf32>
    %420 = arith.mulf %417, %419 : vector<8x32xf32>
    %c0_224 = arith.constant 0 : index
    %c0_225 = arith.constant 0 : index
    %421 = vector.load %arg25[%c0_224, %c0_225] : memref<1x32xf32, #tpu.memory_space<vmem>>, vector<1x32xf32>
    %422 = vector.broadcast %421 : vector<1x32xf32> to vector<8x32xf32>
    %423 = arith.addf %420, %422 : vector<8x32xf32>
    %cst_226 = arith.constant 0.000000e+00 : f32
    %424 = vector.broadcast %cst_226 : f32 to vector<8x32xf32>
    %425 = arith.maximumf %423, %424 : vector<8x32xf32>
    %426 = tpu.iota {dimensions = array<i32: 0>} : vector<8x32xi32>
    %c4_i32_227 = arith.constant 4 : i32
    %c0_i32_228 = arith.constant 0 : i32
    %427 = arith.cmpi eq, %c4_i32_227, %c0_i32_228 : i32
    %c1_i32_229 = arith.constant 1 : i32
    %428 = arith.select %427, %c1_i32_229, %c4_i32_227 : i32
    %429 = vector.broadcast %428 : i32 to vector<8x32xi32>
    %430 = arith.remsi %426, %429 : vector<8x32xi32>
    %c0_i32_230 = arith.constant 0 : i32
    %431 = vector.broadcast %c0_i32_230 : i32 to vector<8x32xi32>
    %432 = arith.cmpi ne, %430, %431 : vector<8x32xi32>
    %c0_i32_231 = arith.constant 0 : i32
    %433 = vector.broadcast %c0_i32_231 : i32 to vector<8x32xi32>
    %434 = arith.cmpi slt, %430, %433 : vector<8x32xi32>
    %c0_i32_232 = arith.constant 0 : i32
    %435 = arith.cmpi slt, %428, %c0_i32_232 : i32
    %436 = vector.broadcast %435 : i1 to vector<8x32xi1>
    %437 = vector.broadcast %436 : vector<8x32xi1> to vector<8x32xi1>
    %438 = arith.xori %434, %437 : vector<8x32xi1>
    %439 = arith.andi %438, %432 : vector<8x32xi1>
    %440 = vector.broadcast %428 : i32 to vector<8x32xi32>
    %441 = arith.addi %430, %440 : vector<8x32xi32>
    %442 = arith.select %439, %441, %430 : vector<8x32xi1>, vector<8x32xi32>
    %c1_i32_233 = arith.constant 1 : i32
    %443 = vector.broadcast %c1_i32_233 : i32 to vector<8x32xi32>
    %444 = arith.cmpi sge, %442, %443 : vector<8x32xi32>
    %c3_i32_234 = arith.constant 3 : i32
    %445 = vector.broadcast %c3_i32_234 : i32 to vector<8x32xi32>
    %446 = arith.cmpi slt, %442, %445 : vector<8x32xi32>
    %447 = arith.andi %444, %446 : vector<8x32xi1>
    %cst_235 = arith.constant 0.000000e+00 : f32
    %448 = vector.broadcast %cst_235 : f32 to vector<8x32xf32>
    %449 = arith.select %447, %425, %448 : vector<8x32xi1>, vector<8x32xf32>
    %c0_236 = arith.constant 0 : index
    %c0_237 = arith.constant 0 : index
    %450 = vector.load %arg32[%c0_236, %c0_237] : memref<8x32xf32, #tpu.memory_space<vmem>>, vector<8x32xf32>
    tpu.vector_store %arg32[%c0_236, %c0_237], %449 {strides = array<i32>} : memref<8x32xf32, #tpu.memory_space<vmem>>, vector<8x32xf32>,
    %c0_238 = arith.constant 0 : index
    %c0_239 = arith.constant 0 : index
    %451 = tpu.strided_load %arg32[%c0_238, %c0_239] {strides = array<i32: 4, 1>} : memref<8x32xf32, #tpu.memory_space<vmem>>, vector<2x32xf32>
    %c1 = arith.constant 1 : index
    %c0_240 = arith.constant 0 : index
    %452 = tpu.strided_load %arg32[%c1, %c0_240] {strides = array<i32: 4, 1>} : memref<8x32xf32, #tpu.memory_space<vmem>>, vector<2x32xf32>
    %453 = arith.maximumf %451, %452 : vector<2x32xf32>
    %c2 = arith.constant 2 : index
    %c0_241 = arith.constant 0 : index
    %454 = tpu.strided_load %arg32[%c2, %c0_241] {strides = array<i32: 4, 1>} : memref<8x32xf32, #tpu.memory_space<vmem>>, vector<2x32xf32>
    %455 = arith.maximumf %453, %454 : vector<2x32xf32>
    %c3 = arith.constant 3 : index
    %c0_242 = arith.constant 0 : index
    %456 = tpu.strided_load %arg32[%c3, %c0_242] {strides = array<i32: 4, 1>} : memref<8x32xf32, #tpu.memory_space<vmem>>, vector<2x32xf32>
    %457 = arith.maximumf %455, %456 : vector<2x32xf32>
    %c0_243 = arith.constant 0 : index
    %c0_244 = arith.constant 0 : index
    %458 = vector.load %arg26[%c0_243, %c0_244] : memref<32x10xf32, #tpu.memory_space<vmem>>, vector<32x10xf32>
    %cst_245 = arith.constant dense<0.000000e+00> : vector<2x10xf32>
    %459 = tpu.matmul %457, %458, %cst_245 {dimension_numbers = #tpu.dot_dimension_numbers<[1], [0], [0], [1], [0, 0, 1, 1], [], []>} : vector<2x32xf32>, vector<32x10xf32>, vector<2x10xf32> -> vector<2x10xf32>
    %c0_246 = arith.constant 0 : index
    %c0_247 = arith.constant 0 : index
    %460 = vector.load %arg27[%c0_246, %c0_247] : memref<1x10xf32, #tpu.memory_space<vmem>>, vector<1x10xf32>
    %461 = vector.broadcast %460 : vector<1x10xf32> to vector<2x10xf32>
    %462 = arith.addf %459, %461 : vector<2x10xf32>
    %c0_248 = arith.constant 0 : index
    %c0_249 = arith.constant 0 : index
    %c0_250 = arith.constant 0 : index
    %463 = vector.load %arg28[%c0_248, %c0_249, %c0_250] : memref<1x2x10xf32, #tpu.memory_space<vmem>>, vector<1x2x10xf32>
    %464 = vector.shape_cast %463 : vector<1x2x10xf32> to vector<2x10xf32>
    %465 = vector.shape_cast %462 : vector<2x10xf32> to vector<1x2x10xf32>
    tpu.vector_store %arg28[%c0_248, %c0_249, %c0_250], %465 {strides = array<i32>} : memref<1x2x10xf32, #tpu.memory_space<vmem>>, vector<1x2x10xf32>,
    return
  }
  func.func @transform_0(%arg0: i32) -> (i32, i32, i32) {
    %c0_i32 = arith.constant 0 : i32
    %c0_i32_0 = arith.constant 0 : i32
    %c0_i32_1 = arith.constant 0 : i32
    return %arg0, %c0_i32, %c0_i32_0 : i32, i32, i32
  }
  func.func @transform_1(%arg0: i32) -> (i32, i32) {
    %c0_i32 = arith.constant 0 : i32
    %c0_i32_0 = arith.constant 0 : i32
    %c0_i32_1 = arith.constant 0 : i32
    return %c0_i32, %c0_i32_0 : i32, i32
  }
  func.func @transform_2(%arg0: i32) -> (i32, i32) {
    %c0_i32 = arith.constant 0 : i32
    %c0_i32_0 = arith.constant 0 : i32
    %c0_i32_1 = arith.constant 0 : i32
    return %c0_i32, %c0_i32_0 : i32, i32
  }
  func.func @transform_3(%arg0: i32) -> (i32, i32) {
    %c0_i32 = arith.constant 0 : i32
    %c0_i32_0 = arith.constant 0 : i32
    %c0_i32_1 = arith.constant 0 : i32
    return %c0_i32, %c0_i32_0 : i32, i32
  }
  func.func @transform_4(%arg0: i32) -> (i32, i32) {
    %c0_i32 = arith.constant 0 : i32
    %c0_i32_0 = arith.constant 0 : i32
    %c0_i32_1 = arith.constant 0 : i32
    return %c0_i32, %c0_i32_0 : i32, i32
  }
  func.func @transform_5(%arg0: i32) -> (i32, i32) {
    %c0_i32 = arith.constant 0 : i32
    %c0_i32_0 = arith.constant 0 : i32
    %c0_i32_1 = arith.constant 0 : i32
    return %c0_i32, %c0_i32_0 : i32, i32
  }
  func.func @transform_6(%arg0: i32) -> (i32, i32) {
    %c0_i32 = arith.constant 0 : i32
    %c0_i32_0 = arith.constant 0 : i32
    %c0_i32_1 = arith.constant 0 : i32
    return %c0_i32, %c0_i32_0 : i32, i32
  }
  func.func @transform_7(%arg0: i32) -> (i32, i32) {
    %c0_i32 = arith.constant 0 : i32
    %c0_i32_0 = arith.constant 0 : i32
    %c0_i32_1 = arith.constant 0 : i32
    return %c0_i32, %c0_i32_0 : i32, i32
  }
  func.func @transform_8(%arg0: i32) -> (i32, i32) {
    %c0_i32 = arith.constant 0 : i32
    %c0_i32_0 = arith.constant 0 : i32
    %c0_i32_1 = arith.constant 0 : i32
    return %c0_i32, %c0_i32_0 : i32, i32
  }
  func.func @transform_9(%arg0: i32) -> (i32, i32) {
    %c0_i32 = arith.constant 0 : i32
    %c0_i32_0 = arith.constant 0 : i32
    %c0_i32_1 = arith.constant 0 : i32
    return %c0_i32, %c0_i32_0 : i32, i32
  }
  func.func @transform_10(%arg0: i32) -> (i32, i32) {
    %c0_i32 = arith.constant 0 : i32
    %c0_i32_0 = arith.constant 0 : i32
    %c0_i32_1 = arith.constant 0 : i32
    return %c0_i32, %c0_i32_0 : i32, i32
  }
  func.func @transform_11(%arg0: i32) -> (i32, i32) {
    %c0_i32 = arith.constant 0 : i32
    %c0_i32_0 = arith.constant 0 : i32
    %c0_i32_1 = arith.constant 0 : i32
    return %c0_i32, %c0_i32_0 : i32, i32
  }
  func.func @transform_12(%arg0: i32) -> (i32, i32) {
    %c0_i32 = arith.constant 0 : i32
    %c0_i32_0 = arith.constant 0 : i32
    %c0_i32_1 = arith.constant 0 : i32
    return %c0_i32, %c0_i32_0 : i32, i32
  }
  func.func @transform_13(%arg0: i32) -> (i32, i32) {
    %c0_i32 = arith.constant 0 : i32
    %c0_i32_0 = arith.constant 0 : i32
    %c0_i32_1 = arith.constant 0 : i32
    return %c0_i32, %c0_i32_0 : i32, i32
  }
  func.func @transform_14(%arg0: i32) -> (i32, i32) {
    %c0_i32 = arith.constant 0 : i32
    %c0_i32_0 = arith.constant 0 : i32
    %c0_i32_1 = arith.constant 0 : i32
    return %c0_i32, %c0_i32_0 : i32, i32
  }
  func.func @transform_15(%arg0: i32) -> (i32, i32) {
    %c0_i32 = arith.constant 0 : i32
    %c0_i32_0 = arith.constant 0 : i32
    %c0_i32_1 = arith.constant 0 : i32
    return %c0_i32, %c0_i32_0 : i32, i32
  }
  func.func @transform_16(%arg0: i32) -> (i32, i32) {
    %c0_i32 = arith.constant 0 : i32
    %c0_i32_0 = arith.constant 0 : i32
    %c0_i32_1 = arith.constant 0 : i32
    return %c0_i32, %c0_i32_0 : i32, i32
  }
  func.func @transform_17(%arg0: i32) -> (i32, i32) {
    %c0_i32 = arith.constant 0 : i32
    %c0_i32_0 = arith.constant 0 : i32
    %c0_i32_1 = arith.constant 0 : i32
    return %c0_i32, %c0_i32_0 : i32, i32
  }
  func.func @transform_18(%arg0: i32) -> (i32, i32) {
    %c0_i32 = arith.constant 0 : i32
    %c0_i32_0 = arith.constant 0 : i32
    %c0_i32_1 = arith.constant 0 : i32
    return %c0_i32, %c0_i32_0 : i32, i32
  }
  func.func @transform_19(%arg0: i32) -> (i32, i32) {
    %c0_i32 = arith.constant 0 : i32
    %c0_i32_0 = arith.constant 0 : i32
    %c0_i32_1 = arith.constant 0 : i32
    return %c0_i32, %c0_i32_0 : i32, i32
  }
  func.func @transform_20(%arg0: i32) -> (i32, i32) {
    %c0_i32 = arith.constant 0 : i32
    %c0_i32_0 = arith.constant 0 : i32
    %c0_i32_1 = arith.constant 0 : i32
    return %c0_i32, %c0_i32_0 : i32, i32
  }
  func.func @transform_21(%arg0: i32) -> (i32, i32) {
    %c0_i32 = arith.constant 0 : i32
    %c0_i32_0 = arith.constant 0 : i32
    %c0_i32_1 = arith.constant 0 : i32
    return %c0_i32, %c0_i32_0 : i32, i32
  }
  func.func @transform_22(%arg0: i32) -> (i32, i32) {
    %c0_i32 = arith.constant 0 : i32
    %c0_i32_0 = arith.constant 0 : i32
    %c0_i32_1 = arith.constant 0 : i32
    return %c0_i32, %c0_i32_0 : i32, i32
  }
  func.func @transform_23(%arg0: i32) -> (i32, i32) {
    %c0_i32 = arith.constant 0 : i32
    %c0_i32_0 = arith.constant 0 : i32
    %c0_i32_1 = arith.constant 0 : i32
    return %c0_i32, %c0_i32_0 : i32, i32
  }
  func.func @transform_24(%arg0: i32) -> (i32, i32) {
    %c0_i32 = arith.constant 0 : i32
    %c0_i32_0 = arith.constant 0 : i32
    %c0_i32_1 = arith.constant 0 : i32
    return %c0_i32, %c0_i32_0 : i32, i32
  }
  func.func @transform_25(%arg0: i32) -> (i32, i32) {
    %c0_i32 = arith.constant 0 : i32
    %c0_i32_0 = arith.constant 0 : i32
    %c0_i32_1 = arith.constant 0 : i32
    return %c0_i32, %c0_i32_0 : i32, i32
  }
  func.func @transform_26(%arg0: i32) -> (i32, i32) {
    %c0_i32 = arith.constant 0 : i32
    %c0_i32_0 = arith.constant 0 : i32
    %c0_i32_1 = arith.constant 0 : i32
    return %c0_i32, %c0_i32_0 : i32, i32
  }
  func.func @transform_27(%arg0: i32) -> (i32, i32, i32) {
    %c0_i32 = arith.constant 0 : i32
    %c0_i32_0 = arith.constant 0 : i32
    %c0_i32_1 = arith.constant 0 : i32
    return %arg0, %c0_i32, %c0_i32_0 : i32, i32, i32
  }
}

</mosaic_0001>

<bundles_post_ra>
// kernel: squeeze.1
= control target key start
LH: loop header
LB: loop body
LE: loop exit
PB: predicated region body
PF: predicated region fallthrough
CT: control target
= control target key end

     0   :  { %vm35_vm0 = vcmask 261120   ;;  %vm90_vm1 = vcmask 1047556   ;;  %s179_s10 = smov 64   ;;  %s180_s15 = smov 96   ;;  %s310_s0 = inlined_call_operand.vmem [shape: f32[2,1024], index: 0, kind: input, shape index: {}]   ;;  %s311_s1 = inlined_call_operand.vmem [shape: f32[2,32,32], index: 1, kind: output, shape index: {}]  }
   0x1   :  { %v148_v0 = vld [vmem:[%s310_s0 + $0xe] sm:$0x3]  ;;  %v149_v1 = vld [vmem:[%s310_s0 + $0xc] sm:$0x3]  ;;  %v150_v2 = vld [vmem:[%s310_s0 + $0xa] sm:$0x3] }
   0x2   :  { %7 = vst [vmem:[#allocation0 + $0x38] sm:$0x3] %v148_v0  ;;  %v151_v3 = vld [vmem:[%s310_s0 + $0x8] sm:$0x3]  ;;  %v152_v4 = vld [vmem:[%s310_s0 + $0x6] sm:$0x3] }
   0x3   :  { %11 = vst [vmem:[#allocation0 + $0x30] sm:$0x3] %v149_v1  ;;  %v153_v5 = vld [vmem:[%s310_s0 + $0x4] sm:$0x3]  ;;  %v154_v6 = vld [vmem:[%s310_s0 + $0x2] sm:$0x3] }
   0x4   :  { %15 = vst [vmem:[#allocation0 + $0x28] sm:$0x3] %v150_v2  ;;  %v32_v7 = vld [vmem:[%s310_s0] sm:$0x3]  ;;  %s181_s25 = smov 32  }
   0x5   :  { %19 = vst [vmem:[#allocation0 + $0x20] sm:$0x3] %v151_v3 }
   0x6   :  { %23 = vst [vmem:[#allocation0 + $0x18] sm:$0x3] %v152_v4 }
   0x7   :  { %27 = vst [vmem:[#allocation0 + $0x10] sm:$0x3] %v153_v5 }
   0x8   :  { %31 = vst [vmem:[#allocation0 + $0x8] sm:$0x3] %v154_v6 }
   0x9   :  { %33 = vst [vmem:[#allocation0] sm:$0x3] %v32_v7  ;;  %v82_v8 = vld [vmem:[#allocation0 + $0x38] sm:$0x3]  }
   0xa   :  { %v75_v9 = vld [vmem:[#allocation0 + $0x30] sm:$0x3]   ;;  %168 = vst.msk [vmem:[%s311_s1 + $0x1c] sm:$0x1] %vm35_vm0, %v82_v8  }
   0xb   :  { %166 = vst.msk [vmem:[%s311_s1 + $0x18] sm:$0x1] %vm35_vm0, %v75_v9   ;;  %v68_v18 = vld [vmem:[#allocation0 + $0x28] sm:$0x3]  }
   0xc   :  { %v61_v10 = vld [vmem:[#allocation0 + $0x20] sm:$0x3]   ;;  %164 = vst.msk [vmem:[%s311_s1 + $0x14] sm:$0x1] %vm35_vm0, %v68_v18  }
   0xd   :  { %v54_v11 = vld [vmem:[#allocation0 + $0x18] sm:$0x3]   ;;  %162 = vst.msk [vmem:[%s311_s1 + $0x10] sm:$0x1] %vm35_vm0, %v61_v10  }
   0xe   :  { %v109_v12 = vld [vmem:[#allocation0] ss:$8 sm:$0xf0]   ;;  %160 = vst.msk [vmem:[%s311_s1 + $0xc] sm:$0x1] %vm35_vm0, %v54_v11  }
   0xf   :  { %v47_v13 = vld [vmem:[#allocation0 + $0x10] sm:$0x3]   ;;  %v40_v14 = vld [vmem:[#allocation0 + $0x8] sm:$0x3]   ;;  %161 = vst.msk [vmem:[%s311_s1 + $0x2b] sm:$0x2] %vm35_vm0, %v54_v11  }
  0x10   :  { %158 = vst.msk [vmem:[%s311_s1 + $0x8] sm:$0x1] %vm35_vm0, %v47_v13   ;;  %v34_v15 = vld [vmem:[#allocation0] sm:$0x3]  }
  0x11   :  { %156 = vst.msk [vmem:[%s311_s1 + $0x4] sm:$0x1] %vm35_vm0, %v40_v14   ;;  %v108_v16 = vld [vmem:[#allocation0] ss:$8 sm:$0xf]  }
  0x12   :  { %36 = vst.msk [vmem:[%s311_s1] sm:$0x1] %vm35_vm0, %v34_v15   ;;  %v111_v17 = vsel %vm90_vm1, %v109_v12, %v108_v16  ;;  %v88_v19 = vld [vmem:[#allocation0] ss:$8 sm:$0xf]  }
  0x13   :  { %155 = vst.msk [vmem:[%s311_s1 + $0x1f] sm:$0x2] %vm35_vm0, %v34_v15   ;;  %112 = vrot.lane.b32.xlu1 %v111_v17, %s179_s10  ;;  %v89_v20 = vld [vmem:[#allocation0] ss:$8 sm:$0xf0]  }
  0x14   :  { %157 = vst.msk [vmem:[%s311_s1 + $0x23] sm:$0x2] %vm35_vm0, %v40_v14   ;;  %v91_v21 = vsel %vm90_vm1, %v89_v20, %v88_v19  ;;  %v118_v22 = vld [vmem:[#allocation0 + $0x1] ss:$8 sm:$0xf]  }
  0x15   :  { %159 = vst.msk [vmem:[%s311_s1 + $0x27] sm:$0x2] %vm35_vm0, %v47_v13   ;;  %92 = vrot.lane.b32.xlu0 %v91_v21, %s180_s15  ;;  %v120_v23 = vld [vmem:[#allocation0 + $0x1] ss:$8 sm:$0xf0]  }
  0x16   :  { %163 = vst.msk [vmem:[%s311_s1 + $0x2f] sm:$0x2] %vm35_vm0, %v61_v10   ;;  %v98_v24 = vld [vmem:[#allocation0 + $0x1] ss:$8 sm:$0xf]   ;;  %v122_v26 = vsel %vm90_vm1, %v120_v23, %v118_v22 }
  0x17   :  { %v100_v25 = vld [vmem:[#allocation0 + $0x1] ss:$8 sm:$0xf0]   ;;  %165 = vst.msk [vmem:[%s311_s1 + $0x33] sm:$0x2] %vm35_vm0, %v68_v18  }
  0x18   :  { %v128_v27 = vld [vmem:[#allocation0] ss:$8 sm:$0xf]   ;;  %167 = vst.msk [vmem:[%s311_s1 + $0x37] sm:$0x2] %vm35_vm0, %v75_v9   ;;  %v102_v29 = vsel %vm90_vm1, %v100_v25, %v98_v24 }
  0x19   :  { %v129_v28 = vld [vmem:[#allocation0] ss:$8 sm:$0xf0]   ;;  %169 = vst.msk [vmem:[%s311_s1 + $0x3b] sm:$0x2] %vm35_vm0, %v82_v8  }
  0x1a   :  { %v131_v30 = vsel %vm90_vm1, %v129_v28, %v128_v27  ;;  %v138_v31 = vld [vmem:[#allocation0 + $0x1] ss:$8 sm:$0xf]  }
  0x1b   :  { %123 = vrot.lane.b32.xlu1 %v122_v26, %s179_s10  ;;  %132 = vrot.lane.b32.xlu2 %v131_v30, %s181_s25  ;;  %v140_v32 = vld [vmem:[#allocation0 + $0x1] ss:$8 sm:$0xf0]  }
  0x1c   :  { %v142_v33 = vsel %vm90_vm1, %v140_v32, %v138_v31 }
  0x1d   :  { %103 = vrot.lane.b32.xlu0 %v102_v29, %s180_s15 }
  0x23   :  { %143 = vrot.lane.b32.xlu2 %v142_v33, %s181_s25 }
  0x75   :  { %v133_v34 = vpop.permute.xlu2 %132  }
  0x76   :  { %174 = vst.msk [vmem:[%s311_s1 + $0x3] ss:$4 sm:$0xff] %vm35_vm0, %v133_v34  }
  0x7d   :  { %v144_v35 = vpop.permute.xlu2 %143  }
  0x7e   :  { %175 = vst.msk [vmem:[%s311_s1 + $0x23] ss:$4 sm:$0xff] %vm35_vm0, %v144_v35  }
  0x85   :  { %v113_v36 = vpop.permute.xlu1 %112  }
  0x86   :  { %172 = vst.msk [vmem:[%s311_s1 + $0x2] ss:$4 sm:$0xff] %vm35_vm0, %v113_v36  }
  0x87   :  { %v93_v37 = vpop.permute.xlu0 %92  }
  0x88   :  { %170 = vst.msk [vmem:[%s311_s1 + $0x1] ss:$4 sm:$0xff] %vm35_vm0, %v93_v37  }
  0x8d   :  { %v124_v38 = vpop.permute.xlu1 %123  }
  0x8e   :  { %173 = vst.msk [vmem:[%s311_s1 + $0x22] ss:$4 sm:$0xff] %vm35_vm0, %v124_v38  }
  0x8f   :  { %v104_v39 = vpop.permute.xlu0 %103  }
  0x90   :  { %171 = vst.msk [vmem:[%s311_s1 + $0x21] ss:$4 sm:$0xff] %vm35_vm0, %v104_v39  }

// kernel: raw_audio_cnn_forward.1
= control target key start
LH: loop header
LB: loop body
LE: loop exit
PB: predicated region body
PF: predicated region fallthrough
CT: control target
= control target key end

     0   :  { %s3988_s0 = inlined_call_operand.vmem [shape: f32[1,64,32], index: 0, kind: input, shape index: {}]   ;;  %s3989_s1 = inlined_call_operand.vmem [shape: f32[160,32], index: 1, kind: input, shape index: {}]   ;;  %s3990_s2 = inlined_call_operand.vmem [shape: f32[1,32], index: 2, kind: input, shape index: {}]   ;;  %s3991_s3 = inlined_call_operand.vmem [shape: f32[1,32], index: 3, kind: input, shape index: {}]   ;;  %s3992_s4 = inlined_call_operand.vmem [shape: f32[96,64], index: 4, kind: input, shape index: {}]   ;;  %s3993_s5 = inlined_call_operand.vmem [shape: f32[1,64], index: 5, kind: input, shape index: {}]   ;;  %s3994_s6 = inlined_call_operand.vmem [shape: f32[1,64], index: 6, kind: input, shape index: {}]   ;;  %s3995_s7 = inlined_call_operand.vmem [shape: f32[192,128], index: 7, kind: input, shape index: {}]   ;;  %s3996_s8 = inlined_call_operand.vmem [shape: f32[1,128], index: 8, kind: input, shape index: {}]   ;;  %s3997_s9 = inlined_call_operand.vmem [shape: f32[1,128], index: 9, kind: input, shape index: {}]   ;;  %s3998_s10 = inlined_call_operand.vmem [shape: f32[384,128], index: 10, kind: input, shape index: {}]   ;;  %s3999_s11 = inlined_call_operand.vmem [shape: f32[1,128], index: 11, kind: input, shape index: {}]   ;;  %s4000_s12 = inlined_call_operand.vmem [shape: f32[1,128], index: 12, kind: input, shape index: {}]   ;;  %s4001_s13 = inlined_call_operand.vmem [shape: f32[384,128], index: 13, kind: input, shape index: {}]   ;;  %s4002_s14 = inlined_call_operand.vmem [shape: f32[1,128], index: 14, kind: input, shape index: {}]   ;;  %s4003_s15 = inlined_call_operand.vmem [shape: f32[1,128], index: 15, kind: input, shape index: {}]   ;;  %s4004_s16 = inlined_call_operand.hbm [shape: f32[384,128], index: 16, kind: input, shape index: {}]   ;;  %s4005_s17 = inlined_call_operand.vmem [shape: f32[1,128], index: 17, kind: input, shape index: {}]   ;;  %s4006_s18 = inlined_call_operand.vmem [shape: f32[1,128], index: 18, kind: input, shape index: {}]   ;;  %s4007_s19 = inlined_call_operand.vmem [shape: f32[384,64], index: 19, kind: input, shape index: {}]   ;;  %s4008_s20 = inlined_call_operand.vmem [shape: f32[1,64], index: 20, kind: input, shape index: {}]   ;;  %s4009_s21 = inlined_call_operand.vmem [shape: f32[1,64], index: 21, kind: input, shape index: {}]   ;;  %s4010_s22 = inlined_call_operand.vmem [shape: f32[192,32], index: 22, kind: input, shape index: {}]   ;;  %s4011_s23 = inlined_call_operand.vmem [shape: f32[1,32], index: 23, kind: input, shape index: {}]   ;;  %s4012_s24 = inlined_call_operand.vmem [shape: f32[1,32], index: 24, kind: input, shape index: {}]   ;;  %s4013_s25 = inlined_call_operand.vmem [shape: f32[32,10], index: 25, kind: input, shape index: {}]   ;;  %s4014_s26 = inlined_call_operand.vmem [shape: f32[1,10], index: 26, kind: input, shape index: {}]   ;;  %s4015_s27 = inlined_call_operand.hbm [shape: f32[1,2,10], index: 27, kind: output, shape index: {}]  }
   0x1   :  { %4021 = sst [smem:[#allocation12_spill]] %s3988_s0 }
   0x2   :  { %4022 = sst [smem:[#allocation13_spill]] %s3989_s1 }
   0x3   :  { %4023 = sst [smem:[#allocation14_spill]] %s3990_s2 }
   0x4   :  { %4024 = sst [smem:[#allocation15_spill]] %s3991_s3 }
   0x5   :  { %4025 = sst [smem:[#allocation16_spill]] %s3992_s4 }
   0x6   :  { %4026 = sst [smem:[#allocation17_spill]] %s3993_s5 }
   0x7   :  { %4027 = sst [smem:[#allocation18_spill]] %s3994_s6 }
   0x8   :  { %4028 = sst [smem:[#allocation19_spill]] %s3995_s7 }
   0x9   :  { %4029 = sst [smem:[#allocation20_spill]] %s3996_s8 }
   0xa   :  { %4030 = sst [smem:[#allocation21_spill]] %s3997_s9 }
   0xb   :  { %4031 = sst [smem:[#allocation22_spill]] %s3998_s10 }
   0xc   :  { %4032 = sst [smem:[#allocation23_spill]] %s3999_s11 }
   0xd   :  { %32 = vsyncpa [#allocation7], 0 }
   0xe   :  { %33 = vsyncpa [#allocation8], 0  ;;  %s70_s8 = sshll.u32 %s4004_s16, 4  ;;  %s2487_s30 = smov [#allocation6]   ;;  %s71_s8 = int_to_ptr.hbm [resolvable:$true] %s70_s8 }
   0xf   :  { %s72_s9 = sshll.u32 %s2487_s30, 4  ;;  %s2488_s5 = smov 128   ;;  %s73_s9 = int_to_ptr.vmem [resolvable:$true] %s72_s9 }
  0x10   :  { %s2489_s28 = smov 8  }
  0x11   :  { %78 = dma.hbm_to_vmem [thread:$0]  %s71_s8, 6144, %s73_s9, [#allocation7], %s2488_s5, %s2488_s5, %s2489_s28  }
  0x12   :  { %2483 = dma.done.wait [#allocation7], 6144  }
  0x13   :  { %2484 = vsyncadd [#allocation7], 4294961152  ;;  %v111_v0 = vlaneseq  ;;  %s4033_s29 = sld [smem:[#allocation13_spill]]  ;;  %vm322_vm1 = vcmask 261120   ;;  %vm1125_vm13 = vcmask 523264  }
  0x14   :  { %s4034_s1 = sld [smem:[#allocation12_spill]] }
  0x15   :  { %v2634_v1 = vshrl.u32 %v111_v0, 7  ;;  %s4045_s5 = sld [smem:[#allocation16_spill]] }
  0x16   :  { %s4046_s11 = sld [smem:[#allocation14_spill]] }
  0x17   :  { %v124_v8 = vand.u32 31, %v2634_v1  ;;  %vm277_vm0 = vcmp.lt.s32.totalorder %v2634_v1, 1  ;;  %vm538_vm2 = vcmp.lt.s32.totalorder %v2634_v1, 7  ;;  %vm224_vm4 = vcmp.lt.s32.totalorder %v2634_v1, 2  ;;  %s4047_s7 = sld [smem:[#allocation15_spill]] }
  0x18   :  { %v2775_v49 = vadd.s32 24, %v2634_v1  ;;  %v116_v59 = vadd.s32 32, %v2634_v1  ;;  %vm664_vm10 = vcmp.lt.s32.totalorder %v2634_v1, 6  ;;  %s4048_s9 = sld [smem:[#allocation19_spill]] }
  0x19   :  { %v321_v2 = vld [vmem:[%s4033_s29 + $0x38] sm:$0xff]  ;;  %v320_v5 = vld [vmem:[%s4033_s29 + $0x30] sm:$0xff]  ;;  %v319_v10 = vld [vmem:[%s4033_s29 + $0x28] sm:$0xff]  ;;  %vm2694_vm3 = vcmp.ge.s32.totalorder %v124_v8, 1  ;;  %vm2699_vm5 = vcmp.ge.s32.totalorder %v124_v8, 2  ;;  %s4050_s2 = sld [smem:[#allocation18_spill]] }
  0x1a   :  { %v268_v3 = vld [vmem:[%s4033_s29 + $0x18] sm:$0xff]  ;;  %359 = vmatpush.msra.mxu0 %v321_v2  ;;  %v267_v6 = vld [vmem:[%s4033_s29 + $0x10] sm:$0xff]  ;;  %v266_v11 = vld [vmem:[%s4033_s29 + $0x8] sm:$0xff]  ;;  %v145_v54 = vand.u32 31, %v2775_v49  ;;  %v152_v0 = vand.u32 31, %v116_v59  ;;  %s4061_s0 = sld [smem:[#allocation21_spill]] }
  0x1b   :  { %v456_v4 = vld [vmem:[%s4033_s29 + $0x58] sm:$0xff]  ;;  %424 = vmatpush.msra.mxu1 %v268_v3  ;;  %v455_v7 = vld [vmem:[%s4033_s29 + $0x50] sm:$0xff]  ;;  %v454_v12 = vld [vmem:[%s4033_s29 + $0x48] sm:$0xff] }
  0x1c   :  { %493 = vmatpush.msra.mxu2 %v456_v4  ;;  %v582_v9 = vld [vmem:[%s4033_s29 + $0x78] sm:$0xff]  ;;  %360 = vmatpush.msra.mxu0 %v320_v5  ;;  %v581_v13 = vld [vmem:[%s4033_s29 + $0x70] sm:$0xff]  ;;  %v318_v14 = vld [vmem:[%s4033_s29 + $0x20] sm:$0xff]  ;;  %vm2805_vm6 = vcmp.lt.s32.totalorder %v145_v54, 31  ;;  %vm2829_vm7 = vcmp.ge.s32.totalorder %v152_v0, 1  ;;  %vm237_vm8 = vcmp.ge.s32.totalorder %v152_v0, 2 }
  0x1d   :  { %425 = vmatpush.msra.mxu1 %v267_v6  ;;  %619 = vmatpush.msra.mxu3 %v582_v9  ;;  %v265_v15 = vld [vmem:[%s4033_s29] sm:$0xff]  ;;  %v580_v17 = vld [vmem:[%s4033_s29 + $0x68] sm:$0xff]  ;;  %v2692_v19 = vld [vmem:[%s4034_s1 + $0x38] sm:$0xff]  ;;  %vm684_vm11 = vcmp.lt.s32.totalorder %v145_v54, 30 }
  0x1e   :  { %494 = vmatpush.msra.mxu2 %v455_v7  ;;  %v453_v16 = vld [vmem:[%s4033_s29 + $0x40] sm:$0xff]  ;;  %361 = vmatpush.msra.mxu0 %v319_v10  ;;  %v276_v23 = vrot.slane %v2692_v19, 7  ;;  %v223_v25 = vrot.slane %v2692_v19, 6  ;;  %v708_v26 = vld [vmem:[%s4033_s29 + $0x98] sm:$0xff]  ;;  %v2713_v27 = vld [vmem:[%s4034_s1 + $0x8] sm:$0xff] }
  0x1f   :  { %426 = vmatpush.msra.mxu1 %v266_v11  ;;  %v2687_v18 = vld [vmem:[%s4034_s1] sm:$0xff]  ;;  %620 = vmatpush.msra.mxu3 %v581_v13  ;;  %v531_v29 = vrot.slane %v2713_v27, 1  ;;  %v2731_v33 = vld [vmem:[%s4034_s1 + $0x10] sm:$0xff]  ;;  %v706_v38 = vld [vmem:[%s4033_s29 + $0x88] sm:$0xff]  ;;  %v270_v39 = vrot.slane %v2713_v27, 7  ;;  %v217_v40 = vrot.slane %v2713_v27, 6 }
  0x20   :  { %495 = vmatpush.msra.mxu2 %v454_v12  ;;  %v269_v22 = vrot.slane %v2687_v18, 7  ;;  %v216_v24 = vrot.slane %v2687_v18, 6  ;;  %362 = vmatpush.msra.mxu0 %v318_v14  ;;  %v530_v28 = vrot.slane %v2687_v18, 1  ;;  %v579_v32 = vld [vmem:[%s4033_s29 + $0x60] sm:$0xff]  ;;  %v707_v34 = vld [vmem:[%s4033_s29 + $0x90] sm:$0xff]  ;;  %v532_v41 = vrot.slane %v2731_v33, 1 }
  0x21   :  { %427 = vmatpush.msra.mxu1 %v265_v15  ;;  %621 = vmatpush.msra.mxu3 %v580_v17  ;;  %v2768_v45 = vld [vmem:[%s4034_s1 + $0x18] sm:$0xff]  ;;  %v271_v46 = vrot.slane %v2731_v33, 7  ;;  %v218_v47 = vrot.slane %v2731_v33, 6  ;;  %v2784_v52 = vld [vmem:[%s4034_s1 + $0x20] sm:$0xff]  ;;  %v2824_v5 = vld [vmem:[%s4034_s1 + $0x28] sm:$0xff] }
  0x22   :  { %496 = vmatpush.msra.mxu2 %v453_v16  ;;  %v285_v30 = vsel %vm277_vm0, %v276_v23, %v269_v22  ;;  %v232_v31 = vsel %vm224_vm4, %v223_v25, %v216_v24  ;;  %745 = vmatpush.msrb.mxu0 %v708_v26  ;;  %v545_v37 = vsel %vm538_vm2, %v530_v28, %v531_v29  ;;  %v533_v48 = vrot.slane %v2768_v45, 1  ;;  %v705_v56 = vld [vmem:[%s4033_s29 + $0x80] sm:$0xff]  ;;  %v109_v13 = vld [vmem:[%s4034_s1 + $0x30] sm:$0xff]  ;;  %s4049_s1 = sld [smem:[#allocation17_spill]] }
  0x23   :  { %v310_v35 = vsel %vm2694_vm3, %v285_v30, 0.0  ;;  %v257_v36 = vsel %vm2699_vm5, %v232_v31, 0.0  ;;  %2334 = vmatmul.msk.f32.vlgmr.msra.gmra.mxu2 %vm322_vm1, %v2687_v18  ;;  %622 = vmatpush.msra.mxu3 %v579_v32  ;;  %v284_v42 = vsel %vm277_vm0, %v269_v22, %v270_v39  ;;  %v231_v43 = vsel %vm224_vm4, %v216_v24, %v217_v40  ;;  %v836_v59 = vld [vmem:[%s4045_s5 + $0x30] sm:$0xff]  ;;  %v834_v0 = vld [vmem:[%s4045_s5 + $0x20] sm:$0xff] }
  0x24   :  { %2318 = vmatmul.msk.f32.vlgmr.msra.gmra.mxu0 %vm322_vm1, %v310_v35  ;;  %2326 = vmatmul.msk.f32.vlgmr.msra.gmra.mxu1 %vm322_vm1, %v257_v36  ;;  %v544_v44 = vsel %vm538_vm2, %v531_v29, %v532_v41  ;;  %v283_v50 = vsel %vm277_vm0, %v270_v39, %v271_v46  ;;  %v230_v51 = vsel %vm224_vm4, %v217_v40, %v218_v47  ;;  %v534_v55 = vrot.slane %v2784_v52, 1 }
  0x25   :  { %746 = vmatpush.msrb.mxu0 %v707_v34  ;;  %2342 = vmatmul.msk.f32.vlgmr.msra.gmra.mxu3 %vm322_vm1, %v545_v37  ;;  %v543_v53 = vsel %vm538_vm2, %v532_v41, %v533_v48  ;;  %v272_v57 = vrot.slane %v2768_v45, 7  ;;  %v219_v58 = vrot.slane %v2768_v45, 6  ;;  %v273_v2 = vrot.slane %v2784_v52, 7 }
  0x26   :  { %v542_v60 = vsel %vm538_vm2, %v533_v48, %v534_v55  ;;  %v220_v3 = vrot.slane %v2784_v52, 6  ;;  %v535_v9 = vrot.slane %v2824_v5, 1  ;;  %v274_v14 = vrot.slane %v2824_v5, 7 }
  0x27   :  { %747 = vmatpush.msrb.mxu0 %v706_v38  ;;  %v282_v62 = vsel %vm277_vm0, %v271_v46, %v272_v57  ;;  %v229_v63 = vsel %vm224_vm4, %v218_v47, %v219_v58  ;;  %v574_v4 = vsel %vm2805_vm6, %v542_v60, 0.0  ;;  %v281_v6 = vsel %vm277_vm0, %v272_v57, %v273_v2  ;;  %v835_v60 = vld [vmem:[%s4045_s5 + $0x28] sm:$0xff] }
  0x28   :  { %v228_v8 = vsel %vm224_vm4, %v219_v58, %v220_v3  ;;  %v314_v10 = vsel %vm2829_vm7, %v281_v6, 0.0  ;;  %v541_v12 = vsel %vm538_vm2, %v534_v55, %v535_v9  ;;  %v221_v15 = vrot.slane %v2824_v5, 6 }
  0x29   :  { %748 = vmatpush.msrb.mxu0 %v705_v56  ;;  %v261_v11 = vsel %vm237_vm8, %v228_v8, 0.0  ;;  %v536_v16 = vrot.slane %v109_v13, 1  ;;  %v280_v17 = vsel %vm277_vm0, %v273_v2, %v274_v14  ;;  %v275_v24 = vrot.slane %v109_v13, 7  ;;  %v993_v8 = vld [vmem:[%s4045_s5 + $0x48] sm:$0xff] }
  0x2a   :  { %v227_v21 = vsel %vm224_vm4, %v220_v3, %v221_v15  ;;  %v222_v26 = vrot.slane %v109_v13, 6  ;;  %v537_v29 = vrot.slane %v2692_v19, 1  ;;  %v119_v30 = vadd.s32 56, %v2634_v1 }
  0x2b   :  { %2335 = vmatmul.msk.f32.gmra.mxu2 %vm322_vm1, %v2713_v27  ;;  %v540_v22 = vsel %vm538_vm2, %v535_v9, %v536_v16  ;;  %v279_v31 = vsel %vm277_vm0, %v274_v14, %v275_v24  ;;  %v278_v38 = vsel %vm277_vm0, %v275_v24, %v276_v23  ;;  %v656_v40 = vrot.slane %v2687_v18, 2 }
  0x2c   :  { %2319 = vmatmul.msk.f32.gmra.mxu0 %vm322_vm1, %v284_v42  ;;  %2327 = vmatmul.msk.f32.gmra.mxu1 %vm322_vm1, %v231_v43  ;;  %v226_v32 = vsel %vm224_vm4, %v221_v15, %v222_v26  ;;  %v539_v34 = vsel %vm538_vm2, %v536_v16, %v537_v29  ;;  %v173_v35 = vand.u32 31, %v119_v30  ;;  %v546_v36 = vsel %vm538_vm2, %v537_v29, %v530_v28 }
  0x2d   :  { %2343 = vmatmul.msk.f32.gmra.mxu3 %vm322_vm1, %v544_v44  ;;  %v225_v39 = vsel %vm224_vm4, %v222_v26, %v223_v25  ;;  %v657_v41 = vrot.slane %v2713_v27, 2  ;;  %v658_v25 = vrot.slane %v2731_v33, 2  ;;  %v659_v18 = vrot.slane %v2768_v45, 2  ;;  %v2973_v26 = vld [vmem:[%s4046_s11] ss:$0 sm:$0xff] }
  0x2e   :  { %vm2877_vm9 = vcmp.lt.s32.totalorder %v173_v35, 31  ;;  %v660_v43 = vrot.slane %v2784_v52, 2  ;;  %v661_v46 = vrot.slane %v2824_v5, 2  ;;  %v662_v47 = vrot.slane %v109_v13, 2 }
  0x2f   :  { %v578_v28 = vsel %vm2877_vm9, %v546_v36, 0.0  ;;  %v671_v23 = vsel %vm664_vm10, %v656_v40, %v657_v41  ;;  %v670_v42 = vsel %vm664_vm10, %v657_v41, %v658_v25  ;;  %v669_v27 = vsel %vm664_vm10, %v658_v25, %v659_v18 }
  0x30   :  { %v668_v44 = vsel %vm664_vm10, %v659_v18, %v660_v43  ;;  %v666_v48 = vsel %vm664_vm10, %v661_v46, %v662_v47  ;;  %vm688_vm12 = vcmp.lt.s32.totalorder %v173_v35, 30 }
  0x33   :  { %2336 = vmatmul.msk.f32.gmra.mxu2 %vm322_vm1, %v2731_v33  ;;  %v700_v33 = vsel %vm684_vm11, %v668_v44, 0.0 }
  0x34   :  { %2320 = vmatmul.msk.f32.gmra.mxu0 %vm322_vm1, %v283_v50  ;;  %2328 = vmatmul.msk.f32.gmra.mxu1 %vm322_vm1, %v230_v51  ;;  %v663_v50 = vrot.slane %v2692_v19, 2 }
  0x35   :  { %2344 = vmatmul.msk.f32.gmra.mxu3 %vm322_vm1, %v543_v53 }
  0x36   :  { %v665_v51 = vsel %vm664_vm10, %v662_v47, %v663_v50 }
  0x3b   :  { %2337 = vmatmul.msk.f32.gmra.mxu2 %vm322_vm1, %v2768_v45  ;;  %v667_v45 = vsel %vm664_vm10, %v660_v43, %v661_v46 }
  0x3c   :  { %2321 = vmatmul.msk.f32.gmra.mxu0 %vm322_vm1, %v282_v62  ;;  %2329 = vmatmul.msk.f32.gmra.mxu1 %vm322_vm1, %v229_v63  ;;  %v833_v62 = vld [vmem:[%s4045_s5 + $0x18] sm:$0xff] }
  0x3d   :  { %2345 = vmatmul.msk.f32.gmra.mxu3 %vm322_vm1, %v574_v4  ;;  %v995_v63 = vld [vmem:[%s4045_s5 + $0x58] sm:$0xff]  ;;  %939 = vmatpush.msrb.mxu2 %v833_v62 }
  0x3e   :  { %1032 = vmatpush.msrb.mxu3 %v995_v63 }
  0x43   :  { %2338 = vmatmul.msk.f32.gmra.mxu2 %vm322_vm1, %v2784_v52  ;;  %v672_v52 = vsel %vm664_vm10, %v663_v50, %v656_v40  ;;  %vm2299_vm10 = vcmask 74752  }
  0x44   :  { %2322 = vmatmul.msk.f32.gmra.mxu0 %vm322_vm1, %v314_v10  ;;  %2330 = vmatmul.msk.f32.gmra.mxu1 %vm322_vm1, %v261_v11  ;;  %v704_v53 = vsel %vm688_vm12, %v672_v52, 0.0  ;;  %v992_v10 = vld [vmem:[%s4045_s5 + $0x40] sm:$0xff] }
  0x45   :  { %2346 = vmatmul.msk.f32.gmra.mxu3 %vm322_vm1, %v541_v12  ;;  %v832_v12 = vld [vmem:[%s4045_s5 + $0x10] sm:$0xff] }
  0x46   :  { %940 = vmatpush.msrb.mxu2 %v832_v12 }
  0x4b   :  { %2339 = vmatmul.msk.f32.gmra.mxu2 %vm322_vm1, %v2824_v5  ;;  %v994_v5 = vld [vmem:[%s4045_s5 + $0x50] sm:$0xff] }
  0x4c   :  { %2323 = vmatmul.msk.f32.gmra.mxu0 %vm322_vm1, %v280_v17  ;;  %2331 = vmatmul.msk.f32.gmra.mxu1 %vm322_vm1, %v227_v21 }
  0x4d   :  { %2347 = vmatmul.msk.f32.gmra.mxu3 %vm322_vm1, %v540_v22 }
  0x4e   :  { %1033 = vmatpush.msrb.mxu3 %v994_v5 }
  0x50   :  { %1034 = vmatpush.msrb.mxu3 %v993_v8 }
  0x52   :  { %1035 = vmatpush.msrb.mxu3 %v992_v10 }
  0x53   :  { %2340 = vmatmul.msk.f32.gmra.mxu2 %vm322_vm1, %v109_v13 }
  0x54   :  { %2324 = vmatmul.msk.f32.gmra.mxu0 %vm322_vm1, %v279_v31  ;;  %2332 = vmatmul.msk.f32.gmra.mxu1 %vm322_vm1, %v226_v32  ;;  %v2978_v32 = vld [vmem:[%s4047_s7] ss:$0 sm:$0xff]  ;;  %s4059_s7 = sld [smem:[#allocation22_spill]] }
  0x55   :  { %2348 = vmatmul.msk.f32.gmra.mxu3 %vm322_vm1, %v539_v34 }
  0x5b   :  { %2341 = vmatmul.msk.f32.gmra.mxu2 %vm322_vm1, %v2692_v19  ;;  %v837_v19 = vld [vmem:[%s4045_s5 + $0x38] sm:$0xff] }
  0x5c   :  { %2325 = vmatmul.msk.f32.gmra.mxu0 %vm322_vm1, %v278_v38  ;;  %2333 = vmatmul.msk.f32.gmra.mxu1 %vm322_vm1, %v225_v39  ;;  %v831_v38 = vld [vmem:[%s4045_s5 + $0x8] sm:$0xff] }
  0x5d   :  { %2349 = vmatmul.msk.f32.gmra.mxu3 %vm322_vm1, %v578_v28  ;;  %874 = vmatpush.msrb.mxu1 %v837_v19 }
  0x5e   :  { %941 = vmatpush.msrb.mxu2 %v831_v38 }
  0x5f   :  { %875 = vmatpush.msrb.mxu1 %v836_v59 }
  0x61   :  { %876 = vmatpush.msrb.mxu1 %v835_v60 }
  0x63   :  { %877 = vmatpush.msrb.mxu1 %v834_v0 }
  0x64   :  { %2350 = vmatmul.msk.f32.vlgmr.msrb.gmra.mxu0 %vm322_vm1, %v671_v23 }
  0x6c   :  { %2351 = vmatmul.msk.f32.gmra.mxu0 %vm322_vm1, %v670_v42 }
  0x74   :  { %2352 = vmatmul.msk.f32.gmra.mxu0 %vm322_vm1, %v669_v27 }
  0x7c   :  { %2353 = vmatmul.msk.f32.gmra.mxu0 %vm322_vm1, %v700_v33 }
  0x84   :  { %2354 = vmatmul.msk.f32.gmra.mxu0 %vm322_vm1, %v667_v45 }
  0x8c   :  { %2355 = vmatmul.msk.f32.gmra.mxu0 %vm322_vm1, %v666_v48 }
  0x94   :  { %2356 = vmatmul.msk.f32.gmra.mxu0 %vm322_vm1, %v665_v51 }
  0x9c   :  { %2357 = vmatmul.msk.f32.gmra.mxu0 %vm322_vm1, %v704_v53 }
  0xa1   :  { %v364_v54 = vpop.f32.mrf.mxu0  ;;  %v429_v2 = vpop.f32.mrf.mxu1 }
  0xa2   :  { %v430_v16 = vadd.f32 %v429_v2, %v364_v54 }
  0xa6   :  { %v498_v4 = vpop.f32.mrf.mxu2 }
  0xa7   :  { %v522_v17 = vadd.f32 %v498_v4, %v430_v16 }
  0xa8   :  { %v624_v6 = vpop.f32.mrf.mxu3 }
  0xa9   :  { %v367_v55 = vpop.f32.mrf.mxu0  ;;  %v432_v11 = vpop.f32.mrf.mxu1  ;;  %v648_v24 = vadd.f32 %v624_v6, %v522_v17 }
  0xaa   :  { %v433_v30 = vadd.f32 %v432_v11, %v367_v55 }
  0xae   :  { %v501_v13 = vpop.f32.mrf.mxu2 }
  0xaf   :  { %v523_v35 = vadd.f32 %v501_v13, %v433_v30 }
  0xb0   :  { %v627_v14 = vpop.f32.mrf.mxu3 }
  0xb1   :  { %v370_v56 = vpop.f32.mrf.mxu0  ;;  %v435_v21 = vpop.f32.mrf.mxu1  ;;  %v649_v40 = vadd.f32 %v627_v14, %v523_v35 }
  0xb2   :  { %v436_v25 = vadd.f32 %v435_v21, %v370_v56  ;;  %v830_v56 = vld [vmem:[%s4045_s5] sm:$0xff]  ;;  %s4060_s5 = sld [smem:[#allocation20_spill]] }
  0xb3   :  { %942 = vmatpush.msrb.mxu2 %v830_v56 }
  0xb6   :  { %v504_v22 = vpop.f32.mrf.mxu2 }
  0xb7   :  { %v524_v18 = vadd.f32 %v504_v22, %v436_v25 }
  0xb8   :  { %v630_v34 = vpop.f32.mrf.mxu3 }
  0xb9   :  { %v2930_v57 = vpop.f32.mrf.mxu0  ;;  %v438_v28 = vpop.f32.mrf.mxu1  ;;  %v650_v33 = vadd.f32 %v630_v34, %v524_v18 }
  0xba   :  { %v439_v50 = vadd.f32 %v438_v28, %v2930_v57 }
  0xbe   :  { %v507_v41 = vpop.f32.mrf.mxu2 }
  0xbf   :  { %v525_v54 = vadd.f32 %v507_v41, %v439_v50 }
  0xc0   :  { %v633_v43 = vpop.f32.mrf.mxu3 }
  0xc1   :  { %v2932_v58 = vpop.f32.mrf.mxu0  ;;  %v441_v47 = vpop.f32.mrf.mxu1  ;;  %v651_v59 = vadd.f32 %v633_v43, %v525_v54 }
  0xc2   :  { %v442_v63 = vadd.f32 %v441_v47, %v2932_v58 }
  0xc6   :  { %v510_v53 = vpop.f32.mrf.mxu2 }
  0xc7   :  { %v526_v5 = vadd.f32 %v510_v53, %v442_v63 }
  0xc8   :  { %v636_v57 = vpop.f32.mrf.mxu3 }
  0xc9   :  { %v2952_v3 = vpop.f32.mrf.mxu0  ;;  %v444_v4 = vpop.f32.mrf.mxu1  ;;  %v652_v11 = vadd.f32 %v636_v57, %v526_v5 }
  0xca   :  { %v445_v14 = vadd.f32 %v444_v4, %v2952_v3 }
  0xce   :  { %v513_v8 = vpop.f32.mrf.mxu2 }
  0xcf   :  { %v527_v21 = vadd.f32 %v513_v8, %v445_v14  ;;  %v1228_v14 = vld [vmem:[%s4048_s9 + $0x78] sm:$0xff] }
  0xd0   :  { %v639_v12 = vpop.f32.mrf.mxu3  ;;  %1249 = vmatpush.msra.mxu0 %v1228_v14 }
  0xd1   :  { %v2960_v9 = vpop.f32.mrf.mxu0 }
  0xd6   :  { %v516_v30 = vpop.f32.mrf.mxu2 }
  0xd8   :  { %v642_v28 = vpop.f32.mrf.mxu3 }
  0xd9   :  { %v2968_v15 = vpop.f32.mrf.mxu0 }
  0xe0   :  { %v645_v50 = vpop.f32.mrf.mxu3 }
  0xe1   :  { %v750_v29 = vpop.f32.mrf.mxu0 }
  0xe2   :  { %v774_v31 = vadd.f32 %v750_v29, %v648_v24  ;;  %v447_v24 = vpop.f32.mrf.mxu1 }
  0xe3   :  { %v448_v35 = vadd.f32 %v447_v24, %v2960_v9  ;;  %v1225_v24 = vld [vmem:[%s4048_s9 + $0x60] sm:$0xff] }
  0xe4   :  { %v786_v36 = vmul.f32 %v2973_v26, %v774_v31  ;;  %v653_v31 = vadd.f32 %v639_v12, %v527_v21  ;;  %v1226_v21 = vld [vmem:[%s4048_s9 + $0x68] sm:$0xff] }
  0xe5   :  { %v528_v41 = vadd.f32 %v516_v30, %v448_v35  ;;  %v1342_v30 = vld [vmem:[%s4048_s9 + $0xb8] sm:$0xff] }
  0xe6   :  { %v2985_v39 = vadd.f32 %v2978_v32, %v786_v36  ;;  %1363 = vmatpush.msra.mxu2 %v1342_v30 }
  0xe7   :  { %v654_v18 = vadd.f32 %v642_v28, %v528_v41  ;;  %v1222_v28 = vld [vmem:[%s4048_s9 + $0x48] sm:$0xff] }
  0xe8   :  { %2358 = vmatmul.msk.f32.vlgmr.msrb.gmra.mxu1 %vm322_vm1, %v2985_v39  ;;  %v968_v46 = vrot.slane %v2985_v39, 1 }
  0xe9   :  { %v753_v23 = vpop.f32.mrf.mxu0 }
  0xea   :  { %v775_v42 = vadd.f32 %v753_v23, %v649_v40 }
  0xec   :  { %v787_v27 = vmul.f32 %v2973_v26, %v775_v42  ;;  %v450_v42 = vpop.f32.mrf.mxu1 }
  0xee   :  { %v2991_v44 = vadd.f32 %v2978_v32, %v787_v27  ;;  %v519_v27 = vpop.f32.mrf.mxu2 }
  0xf0   :  { %2359 = vmatmul.msk.f32.gmra.mxu1 %vm322_vm1, %v2991_v44  ;;  %v969_v45 = vrot.slane %v2991_v44, 1 }
  0xf1   :  { %v756_v48 = vpop.f32.mrf.mxu0 }
  0xf2   :  { %v776_v51 = vadd.f32 %v756_v48, %v650_v33  ;;  %v982_v52 = vsel %vm538_vm2, %v968_v46, %v969_v45  ;;  %v451_v33 = vadd.f32 %v450_v42, %v2968_v15 }
  0xf3   :  { %2374 = vmatmul.msk.f32.vlgmr.msrb.gmra.mxu3 %vm322_vm1, %v982_v52 }
  0xf4   :  { %v788_v55 = vmul.f32 %v2973_v26, %v776_v51  ;;  %v529_v47 = vadd.f32 %v519_v27, %v451_v33  ;;  %v1219_v27 = vld [vmem:[%s4048_s9 + $0x30] sm:$0xff] }
  0xf6   :  { %v3008_v19 = vadd.f32 %v2978_v32, %v788_v55  ;;  %v655_v52 = vadd.f32 %v645_v50, %v529_v47 }
  0xf8   :  { %2360 = vmatmul.msk.f32.gmra.mxu1 %vm322_vm1, %v3008_v19  ;;  %v970_v60 = vrot.slane %v3008_v19, 1  ;;  %v808_v20 = vrot.slane %v3008_v19, 7 }
  0xf9   :  { %v759_v62 = vpop.f32.mrf.mxu0 }
  0xfa   :  { %v777_v0 = vadd.f32 %v759_v62, %v651_v59  ;;  %v981_v2 = vsel %vm538_vm2, %v969_v45, %v970_v60 }
  0xfb   :  { %2375 = vmatmul.msk.f32.gmra.mxu3 %vm322_vm1, %v981_v2 }
  0xfc   :  { %v789_v6 = vmul.f32 %v2973_v26, %v777_v0 }
  0xfe   :  { %v3019_v10 = vadd.f32 %v2978_v32, %v789_v6 }
 0x100   :  { %2361 = vmatmul.msk.f32.gmra.mxu1 %vm322_vm1, %v3019_v10  ;;  %v971_v58 = vrot.slane %v3019_v10, 1 }
 0x101   :  { %v762_v13 = vpop.f32.mrf.mxu0 }
 0x102   :  { %v778_v16 = vadd.f32 %v762_v13, %v652_v11  ;;  %v980_v17 = vsel %vm538_vm2, %v970_v60, %v971_v58  ;;  %v806_v60 = vrot.slane %v2985_v39, 7  ;;  %v809_v39 = vrot.slane %v3019_v10, 7 }
 0x103   :  { %2376 = vmatmul.msk.f32.gmra.mxu3 %vm322_vm1, %v980_v17 }
 0x104   :  { %v790_v22 = vmul.f32 %v2973_v26, %v778_v16  ;;  %v1227_v16 = vld [vmem:[%s4048_s9 + $0x70] sm:$0xff] }
 0x105   :  { %1250 = vmatpush.msra.mxu0 %v1227_v16 }
 0x106   :  { %v3030_v29 = vadd.f32 %v2978_v32, %v790_v22 }
 0x107   :  { %1251 = vmatpush.msra.mxu0 %v1226_v21 }
 0x108   :  { %2362 = vmatmul.msk.f32.gmra.mxu1 %vm322_vm1, %v3030_v29  ;;  %v972_v3 = vrot.slane %v3030_v29, 1  ;;  %v810_v37 = vrot.slane %v3030_v29, 7 }
 0x109   :  { %v765_v34 = vpop.f32.mrf.mxu0  ;;  %1252 = vmatpush.msra.mxu0 %v1225_v24 }
 0x10a   :  { %v779_v36 = vadd.f32 %v765_v34, %v653_v31  ;;  %v979_v38 = vsel %vm538_vm2, %v971_v58, %v972_v3  ;;  %v817_v6 = vsel %vm277_vm0, %v809_v39, %v810_v37  ;;  %v1220_v31 = vld [vmem:[%s4048_s9 + $0x38] sm:$0xff] }
 0x10b   :  { %v987_v40 = vsel %vm2805_vm6, %v979_v38, 0.0  ;;  %v826_v19 = vsel %vm2829_vm7, %v817_v6, 0.0  ;;  %1290 = vmatpush.msra.mxu1 %v1220_v31  ;;  %v1224_v34 = vld [vmem:[%s4048_s9 + $0x58] sm:$0xff]  ;;  %v1223_v38 = vld [vmem:[%s4048_s9 + $0x50] sm:$0xff] }
 0x10c   :  { %v791_v23 = vmul.f32 %v2973_v26, %v779_v36  ;;  %2377 = vmatmul.msk.f32.gmra.mxu3 %vm322_vm1, %v987_v40  ;;  %1253 = vmatpush.msra.mxu0 %v1224_v34  ;;  %v3124_v36 = vld [vmem:[%s4049_s1] ss:$0 sm:$0xff] }
 0x10d   :  { %1291 = vmatpush.msra.mxu1 %v1219_v27 }
 0x10e   :  { %v803_v25 = vadd.f32 %v2978_v32, %v791_v23  ;;  %1254 = vmatpush.msra.mxu0 %v1223_v38  ;;  %v3136_v23 = vld [vmem:[%s4050_s2] ss:$0 sm:$0xff] }
 0x110   :  { %2363 = vmatmul.msk.f32.gmra.mxu1 %vm322_vm1, %v803_v25  ;;  %v973_v9 = vrot.slane %v803_v25, 1  ;;  %v811_v8 = vrot.slane %v803_v25, 7  ;;  %1255 = vmatpush.msra.mxu0 %v1222_v28  ;;  %v1221_v25 = vld [vmem:[%s4048_s9 + $0x40] sm:$0xff] }
 0x111   :  { %v768_v43 = vpop.f32.mrf.mxu0 }
 0x112   :  { %v780_v45 = vadd.f32 %v768_v43, %v654_v18  ;;  %v978_v61 = vsel %vm538_vm2, %v972_v3, %v973_v9  ;;  %v816_v11 = vsel %vm277_vm0, %v810_v37, %v811_v8  ;;  %1256 = vmatpush.msra.mxu0 %v1221_v25  ;;  %v1335_v37 = vld [vmem:[%s4048_s9 + $0x80] sm:$0xff] }
 0x114   :  { %v792_v48 = vmul.f32 %v2973_v26, %v780_v45  ;;  %2378 = vmatmul.msk.f32.gmra.mxu3 %vm322_vm1, %v978_v61 }
 0x116   :  { %v804_v51 = vadd.f32 %v2978_v32, %v792_v48 }
 0x118   :  { %2364 = vmatmul.msk.f32.gmra.mxu1 %vm322_vm1, %v804_v51  ;;  %v974_v53 = vrot.slane %v804_v51, 1  ;;  %v812_v10 = vrot.slane %v804_v51, 7 }
 0x119   :  { %v771_v54 = vpop.f32.mrf.mxu0 }
 0x11a   :  { %v781_v55 = vadd.f32 %v771_v54, %v655_v52  ;;  %v977_v15 = vsel %vm538_vm2, %v973_v9, %v974_v53  ;;  %v815_v58 = vsel %vm277_vm0, %v811_v8, %v812_v10  ;;  %v1341_v9 = vld [vmem:[%s4048_s9 + $0xb0] sm:$0xff]  ;;  %v1340_v52 = vld [vmem:[%s4048_s9 + $0xa8] sm:$0xff] }
 0x11b   :  { %1364 = vmatpush.msra.mxu2 %v1341_v9 }
 0x11c   :  { %v793_v56 = vmul.f32 %v2973_v26, %v781_v55  ;;  %2379 = vmatmul.msk.f32.gmra.mxu3 %vm322_vm1, %v977_v15  ;;  %v807_v26 = vrot.slane %v2991_v44, 7 }
 0x11d   :  { %1365 = vmatpush.msra.mxu2 %v1340_v52 }
 0x11e   :  { %v805_v57 = vadd.f32 %v2978_v32, %v793_v56  ;;  %v820_v4 = vsel %vm277_vm0, %v806_v60, %v807_v26  ;;  %v819_v44 = vsel %vm277_vm0, %v807_v26, %v808_v20  ;;  %v1339_v56 = vld [vmem:[%s4048_s9 + $0xa0] sm:$0xff]  ;;  %v1337_v26 = vld [vmem:[%s4048_s9 + $0x90] sm:$0xff] }
 0x11f   :  { %1366 = vmatpush.msra.mxu2 %v1339_v56 }
 0x120   :  { %v813_v59 = vrot.slane %v805_v57, 7  ;;  %2365 = vmatmul.msk.f32.gmra.mxu1 %vm322_vm1, %v805_v57  ;;  %v975_v62 = vrot.slane %v805_v57, 1 }
 0x122   :  { %v821_v63 = vsel %vm277_vm0, %v813_v59, %v806_v60  ;;  %v976_v0 = vsel %vm538_vm2, %v974_v53, %v975_v62  ;;  %v983_v32 = vsel %vm538_vm2, %v975_v62, %v968_v46  ;;  %v818_v46 = vsel %vm277_vm0, %v808_v20, %v809_v39  ;;  %v1218_v53 = vld [vmem:[%s4048_s9 + $0x28] sm:$0xff]  ;;  %v1338_v62 = vld [vmem:[%s4048_s9 + $0x98] sm:$0xff] }
 0x123   :  { %v822_v2 = vsel %vm2694_vm3, %v821_v63, 0.0  ;;  %v991_v5 = vsel %vm2877_vm9, %v983_v32, 0.0  ;;  %v814_v12 = vsel %vm277_vm0, %v812_v10, %v813_v59  ;;  %1292 = vmatpush.msra.mxu1 %v1218_v53  ;;  %1367 = vmatpush.msra.mxu2 %v1338_v62  ;;  %v1336_v20 = vld [vmem:[%s4048_s9 + $0x88] sm:$0xff] }
 0x124   :  { %2366 = vmatmul.msk.f32.vlgmr.msrb.gmra.mxu2 %vm322_vm1, %v822_v2  ;;  %2380 = vmatmul.msk.f32.gmra.mxu3 %vm322_vm1, %v976_v0 }
 0x125   :  { %1368 = vmatpush.msra.mxu2 %v1337_v26 }
 0x127   :  { %1369 = vmatpush.msra.mxu2 %v1336_v20 }
 0x129   :  { %1370 = vmatpush.msra.mxu2 %v1335_v37  ;;  %v3229_v37 = vadd.s32 8, %v2634_v1 }
 0x12c   :  { %2367 = vmatmul.msk.f32.gmra.mxu2 %vm322_vm1, %v820_v4  ;;  %2381 = vmatmul.msk.f32.gmra.mxu3 %vm322_vm1, %v991_v5  ;;  %v1217_v5 = vld [vmem:[%s4048_s9 + $0x20] sm:$0xff] }
 0x12d   :  { %1293 = vmatpush.msra.mxu1 %v1217_v5 }
 0x134   :  { %2368 = vmatmul.msk.f32.gmra.mxu2 %vm322_vm1, %v819_v44 }
 0x13c   :  { %2369 = vmatmul.msk.f32.gmra.mxu2 %vm322_vm1, %v818_v46 }
 0x144   :  { %2370 = vmatmul.msk.f32.gmra.mxu2 %vm322_vm1, %v826_v19 }
 0x14c   :  { %2371 = vmatmul.msk.f32.gmra.mxu2 %vm322_vm1, %v816_v11 }
 0x154   :  { %2372 = vmatmul.msk.f32.gmra.mxu2 %vm322_vm1, %v815_v58 }
 0x15c   :  { %2373 = vmatmul.msk.f32.gmra.mxu2 %vm322_vm1, %v814_v12 }
 0x165   :  { %v879_v7 = vpop.f32.mrf.mxu1 }
 0x16d   :  { %v882_v17 = vpop.f32.mrf.mxu1 }
 0x175   :  { %v885_v40 = vpop.f32.mrf.mxu1 }
 0x176   :  { %v1037_v13 = vpop.f32.mrf.mxu3 }
 0x17d   :  { %v888_v50 = vpop.f32.mrf.mxu1 }
 0x17e   :  { %v1040_v22 = vpop.f32.mrf.mxu3 }
 0x185   :  { %v891_v46 = vpop.f32.mrf.mxu1 }
 0x186   :  { %v1043_v42 = vpop.f32.mrf.mxu3 }
 0x18f   :  { %v1046_v15 = vpop.f32.mrf.mxu3 }
 0x197   :  { %v1049_v8 = vpop.f32.mrf.mxu3 }
 0x19f   :  { %v1052_v30 = vpop.f32.mrf.mxu3 }
 0x1a7   :  { %v944_v29 = vpop.f32.mrf.mxu2 }
 0x1a8   :  { %v945_v3 = vadd.f32 %v944_v29, %v879_v7 }
 0x1aa   :  { %v1061_v35 = vadd.f32 %v1037_v13, %v945_v3  ;;  %v1216_v13 = vld [vmem:[%s4048_s9 + $0x18] sm:$0xff] }
 0x1ab   :  { %1294 = vmatpush.msra.mxu1 %v1216_v13 }
 0x1ac   :  { %v1073_v41 = vmul.f32 %v3124_v36, %v1061_v35 }
 0x1ae   :  { %v1085_v33 = vadd.f32 %v3136_v23, %v1073_v41  ;;  %v1214_v41 = vld [vmem:[%s4048_s9 + $0x8] sm:$0xff] }
 0x1af   :  { %v947_v18 = vpop.f32.mrf.mxu2 }
 0x1b0   :  { %v948_v43 = vadd.f32 %v947_v18, %v882_v17  ;;  %v1093_v47 = vmax.f32 %v1085_v33, 0.0  ;;  %v1213_v18 = vld [vmem:[%s4048_s9] sm:$0xff] }
 0x1b2   :  { %v1062_v45 = vadd.f32 %v1040_v22, %v948_v43  ;;  %v3159_v57 = vrot.slane %v1093_v47, 1  ;;  %v894_v22 = vpop.f32.mrf.mxu1 }
 0x1b4   :  { %v1074_v61 = vmul.f32 %v3124_v36, %v1062_v45 }
 0x1b6   :  { %v1086_v48 = vadd.f32 %v3136_v23, %v1074_v61  ;;  %v1055_v61 = vpop.f32.mrf.mxu3 }
 0x1b7   :  { %v950_v51 = vpop.f32.mrf.mxu2 }
 0x1b8   :  { %v1094_v54 = vmax.f32 %v1086_v48, 0.0  ;;  %v951_v55 = vadd.f32 %v950_v51, %v885_v40  ;;  %v1215_v40 = vld [vmem:[%s4048_s9 + $0x10] sm:$0xff]  ;;  %s2308_s9 = sshll.u32 %s4015_s27, 4  ;;  %s2309_s9 = int_to_ptr.hbm [resolvable:$true] %s2308_s9 }
 0x1b9   :  { %1295 = vmatpush.msra.mxu1 %v1215_v40 }
 0x1ba   :  { %v1102_v59 = vrot.slane %v1094_v54, 1  ;;  %v1063_v60 = vadd.f32 %v1043_v42, %v951_v55  ;;  %v897_v43 = vpop.f32.mrf.mxu1 }
 0x1bb   :  { %1296 = vmatpush.msra.mxu1 %v1214_v41 }
 0x1bc   :  { %v1115_v63 = vsel %vm538_vm2, %v3159_v57, %v1102_v59  ;;  %v1075_v0 = vmul.f32 %v3124_v36, %v1063_v60 }
 0x1bd   :  { %v1117_v2 = vmax.f32 %v1093_v47, %v1115_v63  ;;  %1297 = vmatpush.msra.mxu1 %v1213_v18  ;;  %v1854_v18 = vld [vmem:[#allocation6 + $0xc8] sm:$0xff] }
 0x1be   :  { %v1087_v32 = vadd.f32 %v3136_v23, %v1075_v0  ;;  %v1058_v26 = vpop.f32.mrf.mxu3 }
 0x1bf   :  { %1126 = vst.msk [vmem:[#allocation2] sm:$0xff] %vm1125_vm13, %v1117_v2  ;;  %v953_v4 = vpop.f32.mrf.mxu2 }
 0x1c0   :  { %v1095_v44 = vmax.f32 %v1087_v32, 0.0  ;;  %v954_v39 = vadd.f32 %v953_v4, %v888_v50 }
 0x1c2   :  { %v1103_v6 = vrot.slane %v1095_v44, 1  ;;  %v1064_v19 = vadd.f32 %v1046_v15, %v954_v39 }
 0x1c4   :  { %v1114_v11 = vsel %vm538_vm2, %v1102_v59, %v1103_v6  ;;  %v1076_v10 = vmul.f32 %v3124_v36, %v1064_v19  ;;  %v900_v59 = vpop.f32.mrf.mxu1 }
 0x1c5   :  { %v1118_v58 = vmax.f32 %v1094_v54, %v1114_v11 }
 0x1c6   :  { %v1088_v12 = vadd.f32 %v3136_v23, %v1076_v10 }
 0x1c7   :  { %1127 = vst.msk [vmem:[#allocation2 + $0x8] sm:$0xff] %vm1125_vm13, %v1118_v58  ;;  %v956_v7 = vpop.f32.mrf.mxu2 }
 0x1c8   :  { %v1096_v14 = vmax.f32 %v1088_v12, 0.0  ;;  %v957_v16 = vadd.f32 %v956_v7, %v891_v46 }
 0x1ca   :  { %v1104_v17 = vrot.slane %v1096_v14, 1  ;;  %v1065_v21 = vadd.f32 %v1049_v8, %v957_v16  ;;  %v1152_v8 = vand.u32 15, %v3229_v37 }
 0x1cc   :  { %v1113_v24 = vsel %vm538_vm2, %v1103_v6, %v1104_v17  ;;  %v1077_v29 = vmul.f32 %v3124_v36, %v1065_v21  ;;  %vm3239_vm14 = vcmp.lt.s32.totalorder %v1152_v8, 15  ;;  %v1432_v8 = vld [vmem:[%s4059_s7 + $0x60] sm:$0xff] }
 0x1cd   :  { %v1119_v31 = vmax.f32 %v1095_v44, %v1113_v24 }
 0x1ce   :  { %v1089_v3 = vadd.f32 %v3136_v23, %v1077_v29  ;;  %v3194_v34 = vld [vmem:[#allocation2] ss:$2 sm:$0xff] }
 0x1cf   :  { %1128 = vst.msk [vmem:[#allocation2 + $0x10] sm:$0xff] %vm1125_vm13, %v1119_v31  ;;  %v959_v35 = vpop.f32.mrf.mxu2  ;;  %2382 = vmatmul.msk.f32.vlgmr.msra.gmra.mxu0 %vm1125_vm13, %v3194_v34  ;;  %v1311_v60 = vrot.slane %v3194_v34, 1 }
 0x1d0   :  { %v1097_v38 = vmax.f32 %v1089_v3, 0.0  ;;  %v960_v28 = vadd.f32 %v959_v35, %v894_v22  ;;  %v1166_v3 = vand.u32 15, %v2775_v49 }
 0x1d2   :  { %v1105_v25 = vrot.slane %v1097_v38, 1  ;;  %v1066_v42 = vadd.f32 %v1052_v30, %v960_v28  ;;  %vm3267_vm3 = vcmp.lt.s32.totalorder %v1166_v3, 15  ;;  %v114_v28 = vadd.s32 16, %v2634_v1  ;;  %v1422_v3 = vld [vmem:[%s4059_s7 + $0x10] sm:$0xff] }
 0x1d4   :  { %v1112_v9 = vsel %vm538_vm2, %v1104_v17, %v1105_v25  ;;  %v1078_v27 = vmul.f32 %v3124_v36, %v1066_v42  ;;  %v1189_v17 = vrot.slane %v3194_v34, 7 }
 0x1d5   :  { %v1120_v33 = vmax.f32 %v1096_v14, %v1112_v9  ;;  %v1145_v14 = vand.u32 15, %v2634_v1 }
 0x1d6   :  { %v1090_v45 = vadd.f32 %v3136_v23, %v1078_v27 }
 0x1d7   :  { %1129 = vst.msk [vmem:[#allocation2 + $0x18] sm:$0xff] %vm1125_vm13, %v1120_v33  ;;  %v962_v47 = vpop.f32.mrf.mxu2  ;;  %vm3252_vm15 = vcmp.ge.s32.totalorder %v1145_v14, 1  ;;  %v1450_v33 = vld [vmem:[%s4059_s7 + $0xf0] sm:$0xff]  ;;  %v1522_v14 = vld [vmem:[%s4059_s7 + $0x100] sm:$0xff] }
 0x1d8   :  { %v1098_v48 = vmax.f32 %v1090_v45, 0.0  ;;  %v963_v50 = vadd.f32 %v962_v47, %v897_v43  ;;  %v1451_v43 = vld [vmem:[%s4059_s7 + $0xf8] sm:$0xff]  ;;  %v1449_v45 = vld [vmem:[%s4059_s7 + $0xe8] sm:$0xff] }
 0x1d9   :  { %1452 = vmatpush.msra.mxu3 %v1451_v43  ;;  %v1447_v47 = vld [vmem:[%s4059_s7 + $0xd8] sm:$0xff] }
 0x1da   :  { %v1106_v51 = vrot.slane %v1098_v48, 1  ;;  %v1067_v52 = vadd.f32 %v1055_v61, %v963_v50  ;;  %v1448_v61 = vld [vmem:[%s4059_s7 + $0xe0] sm:$0xff]  ;;  %v1537_v50 = vld [vmem:[%s4059_s7 + $0x178] sm:$0xff] }
 0x1db   :  { %1453 = vmatpush.msra.mxu3 %v1450_v33  ;;  %1538 = vmatpush.msrb.mxu1 %v1537_v50 }
 0x1dc   :  { %v1111_v53 = vsel %vm538_vm2, %v1105_v25, %v1106_v51  ;;  %v1079_v54 = vmul.f32 %v3124_v36, %v1067_v52  ;;  %v1159_v25 = vand.u32 15, %v114_v28  ;;  %v1536_v52 = vld [vmem:[%s4059_s7 + $0x170] sm:$0xff] }
 0x1dd   :  { %v1121_v55 = vmax.f32 %v1097_v38, %v1111_v53  ;;  %1454 = vmatpush.msra.mxu3 %v1449_v45  ;;  %v1444_v53 = vld [vmem:[%s4059_s7 + $0xc0] sm:$0xff]  ;;  %1539 = vmatpush.msrb.mxu1 %v1536_v52  ;;  %v1856_v38 = vld [vmem:[#allocation6 + $0xd8] sm:$0xff] }
 0x1de   :  { %v1091_v15 = vadd.f32 %v3136_v23, %v1079_v54  ;;  %v1136_v56 = vld [vmem:[#allocation2 + $0x10] ss:$2 sm:$0xff]  ;;  %vm3280_vm4 = vcmp.ge.s32.totalorder %v1159_v25, 1  ;;  %v1535_v54 = vld [vmem:[%s4059_s7 + $0x168] sm:$0xff]  ;;  %v1420_v25 = vld [vmem:[%s4059_s7] sm:$0xff] }
 0x1df   :  { %1130 = vst.msk [vmem:[#allocation2 + $0x20] sm:$0xff] %vm1125_vm13, %v1121_v55  ;;  %v965_v62 = vpop.f32.mrf.mxu2  ;;  %2383 = vmatmul.msk.f32.gmra.mxu0 %vm1125_vm13, %v1136_v56  ;;  %v1312_v63 = vrot.slane %v1136_v56, 1  ;;  %v1190_v34 = vrot.slane %v1136_v56, 7  ;;  %1455 = vmatpush.msra.mxu3 %v1448_v61  ;;  %v1443_v55 = vld [vmem:[%s4059_s7 + $0xb8] sm:$0xff]  ;;  %v1442_v56 = vld [vmem:[%s4059_s7 + $0xb0] sm:$0xff] }
 0x1e0   :  { %v1099_v0 = vmax.f32 %v1091_v15, 0.0  ;;  %v966_v2 = vadd.f32 %v965_v62, %v900_v59  ;;  %1540 = vmatpush.msrb.mxu1 %v1535_v54  ;;  %v1534_v15 = vld [vmem:[%s4059_s7 + $0x160] sm:$0xff]  ;;  %v1533_v59 = vld [vmem:[%s4059_s7 + $0x158] sm:$0xff]  ;;  %v1532_v62 = vld [vmem:[%s4059_s7 + $0x150] sm:$0xff] }
 0x1e1   :  { %v1317_v32 = vsel %vm538_vm2, %v1311_v60, %v1312_v63  ;;  %v1195_v41 = vsel %vm277_vm0, %v1189_v17, %v1190_v34  ;;  %1456 = vmatpush.msra.mxu3 %v1447_v47 }
 0x1e2   :  { %v1107_v4 = vrot.slane %v1099_v0, 1  ;;  %v1068_v5 = vadd.f32 %v1058_v26, %v966_v2  ;;  %2390 = vmatmul.msk.f32.vlgmr.msra.gmra.mxu2 %vm1125_vm13, %v1317_v32  ;;  %1541 = vmatpush.msrb.mxu1 %v1534_v15  ;;  %v1439_v2 = vld [vmem:[%s4059_s7 + $0x98] sm:$0xff]  ;;  %v1530_v26 = vld [vmem:[%s4059_s7 + $0x140] sm:$0xff]  ;;  %v1438_v32 = vld [vmem:[%s4059_s7 + $0x90] sm:$0xff] }
 0x1e4   :  { %v1110_v20 = vsel %vm538_vm2, %v1106_v51, %v1107_v4  ;;  %v1080_v44 = vmul.f32 %v3124_v36, %v1068_v5  ;;  %v1445_v51 = vld [vmem:[%s4059_s7 + $0xc8] sm:$0xff]  ;;  %1542 = vmatpush.msrb.mxu1 %v1533_v59  ;;  %v1529_v5 = vld [vmem:[%s4059_s7 + $0x138] sm:$0xff] }
 0x1e5   :  { %v1122_v39 = vmax.f32 %v1098_v48, %v1110_v20  ;;  %v1446_v48 = vld [vmem:[%s4059_s7 + $0xd0] sm:$0xff]  ;;  %v1437_v20 = vld [vmem:[%s4059_s7 + $0x88] sm:$0xff] }
 0x1e6   :  { %v1092_v46 = vadd.f32 %v3136_v23, %v1080_v44  ;;  %1457 = vmatpush.msra.mxu3 %v1446_v48  ;;  %1543 = vmatpush.msrb.mxu1 %v1532_v62  ;;  %v1434_v44 = vld [vmem:[%s4059_s7 + $0x70] sm:$0xff] }
 0x1e7   :  { %1131 = vst.msk [vmem:[#allocation2 + $0x28] sm:$0xff] %vm1125_vm13, %v1122_v39  ;;  %v1528_v39 = vld [vmem:[%s4059_s7 + $0x130] sm:$0xff] }
 0x1e8   :  { %v1100_v6 = vmax.f32 %v1092_v46, 0.0  ;;  %1458 = vmatpush.msra.mxu3 %v1445_v51  ;;  %v1436_v46 = vld [vmem:[%s4059_s7 + $0x80] sm:$0xff] }
 0x1ea   :  { %v1108_v19 = vrot.slane %v1100_v6, 1  ;;  %1459 = vmatpush.msra.mxu3 %v1444_v53 }
 0x1ec   :  { %v1109_v11 = vsel %vm538_vm2, %v1107_v4, %v1108_v19  ;;  %v1116_v10 = vsel %vm538_vm2, %v1108_v19, %v3159_v57  ;;  %1460 = vmatpush.msra.mxu3 %v1443_v55  ;;  %v1435_v4 = vld [vmem:[%s4059_s7 + $0x78] sm:$0xff]  ;;  %v1527_v19 = vld [vmem:[%s4059_s7 + $0x128] sm:$0xff] }
 0x1ed   :  { %v1123_v36 = vmax.f32 %v1099_v0, %v1109_v11  ;;  %v1124_v58 = vmax.f32 %v1100_v6, %v1116_v10  ;;  %v1531_v0 = vld [vmem:[%s4059_s7 + $0x148] sm:$0xff]  ;;  %1481 = vmatpush.msrb.mxu0 %v1435_v4  ;;  %v1526_v11 = vld [vmem:[%s4059_s7 + $0x120] sm:$0xff]  ;;  %v1431_v10 = vld [vmem:[%s4059_s7 + $0x58] sm:$0xff] }
 0x1ee   :  { %v1138_v12 = vld [vmem:[#allocation2 + $0x20] ss:$2 sm:$0xff]  ;;  %1461 = vmatpush.msra.mxu3 %v1442_v56  ;;  %1544 = vmatpush.msrb.mxu1 %v1531_v0 }
 0x1ef   :  { %1132 = vst.msk [vmem:[#allocation2 + $0x30] sm:$0xff] %vm1125_vm13, %v1123_v36  ;;  %2384 = vmatmul.msk.f32.gmra.mxu0 %vm1125_vm13, %v1138_v12  ;;  %v1313_v23 = vrot.slane %v1138_v12, 1  ;;  %v1191_v49 = vrot.slane %v1138_v12, 7  ;;  %v1433_v6 = vld [vmem:[%s4059_s7 + $0x68] sm:$0xff]  ;;  %v1525_v36 = vld [vmem:[%s4059_s7 + $0x118] sm:$0xff]  ;;  %v1524_v12 = vld [vmem:[%s4059_s7 + $0x110] sm:$0xff] }
 0x1f0   :  { %1133 = vst.msk [vmem:[#allocation2 + $0x38] sm:$0xff] %vm1125_vm13, %v1124_v58  ;;  %1545 = vmatpush.msrb.mxu1 %v1530_v26  ;;  %1482 = vmatpush.msrb.mxu0 %v1434_v44  ;;  %v1430_v58 = vld [vmem:[%s4059_s7 + $0x50] sm:$0xff] }
 0x1f1   :  { %v1316_v13 = vsel %vm538_vm2, %v1312_v63, %v1313_v23  ;;  %v1194_v42 = vsel %vm277_vm0, %v1190_v34, %v1191_v49  ;;  %v1440_v63 = vld [vmem:[%s4059_s7 + $0xa0] sm:$0xff] }
 0x1f2   :  { %v1332_v57 = vsel %vm3239_vm14, %v1316_v13, 0.0  ;;  %v1211_v9 = vsel %vm3280_vm4, %v1194_v42, 0.0  ;;  %1546 = vmatpush.msrb.mxu1 %v1529_v5  ;;  %1483 = vmatpush.msrb.mxu0 %v1433_v6  ;;  %v1523_v13 = vld [vmem:[%s4059_s7 + $0x108] sm:$0xff] }
 0x1f3   :  { %2391 = vmatmul.msk.f32.gmra.mxu2 %vm1125_vm13, %v1332_v57  ;;  %v1428_v57 = vld [vmem:[%s4059_s7 + $0x40] sm:$0xff] }
 0x1f4   :  { %1547 = vmatpush.msrb.mxu1 %v1528_v39  ;;  %1484 = vmatpush.msrb.mxu0 %v1432_v8 }
 0x1f6   :  { %1548 = vmatpush.msrb.mxu1 %v1527_v19  ;;  %1485 = vmatpush.msrb.mxu0 %v1431_v10 }
 0x1f7   :  { %v1140_v16 = vld [vmem:[#allocation2 + $0x30] ss:$2 sm:$0xff] }
 0x1f8   :  { %v1192_v21 = vrot.slane %v1140_v16, 7  ;;  %2385 = vmatmul.msk.f32.gmra.mxu0 %vm1125_vm13, %v1140_v16  ;;  %v1314_v22 = vrot.slane %v1140_v16, 1  ;;  %1549 = vmatpush.msrb.mxu1 %v1526_v11  ;;  %v1427_v16 = vld [vmem:[%s4059_s7 + $0x38] sm:$0xff] }
 0x1f9   :  { %1486 = vmatpush.msrb.mxu0 %v1430_v58 }
 0x1fa   :  { %v1196_v29 = vsel %vm277_vm0, %v1192_v21, %v1189_v17  ;;  %v1315_v30 = vsel %vm538_vm2, %v1313_v23, %v1314_v22  ;;  %v1318_v35 = vsel %vm538_vm2, %v1314_v22, %v1311_v60  ;;  %v1193_v27 = vsel %vm277_vm0, %v1191_v49, %v1192_v21  ;;  %v1441_v60 = vld [vmem:[%s4059_s7 + $0xa8] sm:$0xff]  ;;  %1550 = vmatpush.msrb.mxu1 %v1525_v36  ;;  %v1426_v17 = vld [vmem:[%s4059_s7 + $0x30] sm:$0xff]  ;;  %v1424_v22 = vld [vmem:[%s4059_s7 + $0x20] sm:$0xff] }
 0x1fb   :  { %v1209_v31 = vsel %vm3252_vm15, %v1196_v29, 0.0  ;;  %2392 = vmatmul.msk.f32.gmra.mxu2 %vm1125_vm13, %v1315_v30  ;;  %v1334_v40 = vsel %vm3267_vm3, %v1318_v35, 0.0  ;;  %1462 = vmatpush.msra.mxu3 %v1441_v60  ;;  %v1429_v23 = vld [vmem:[%s4059_s7 + $0x48] sm:$0xff]  ;;  %v1423_v29 = vld [vmem:[%s4059_s7 + $0x18] sm:$0xff]  ;;  %v2423_v49 = vld [vmem:[%s4061_s0] ss:$0 sm:$0xff] }
 0x1fc   :  { %2386 = vmatmul.msk.f32.vlgmr.msra.gmra.mxu1 %vm1125_vm13, %v1209_v31  ;;  %1487 = vmatpush.msrb.mxu0 %v1429_v23  ;;  %v1425_v21 = vld [vmem:[%s4059_s7 + $0x28] sm:$0xff] }
 0x1fd   :  { %1463 = vmatpush.msra.mxu3 %v1440_v63  ;;  %1551 = vmatpush.msrb.mxu1 %v1524_v12  ;;  %v1421_v35 = vld [vmem:[%s4059_s7 + $0x8] sm:$0xff]  ;;  %s4062_s7 = sld [smem:[#allocation23_spill]] }
 0x1fe   :  { %1488 = vmatpush.msrb.mxu0 %v1428_v57 }
 0x1ff   :  { %1464 = vmatpush.msra.mxu3 %v1439_v2  ;;  %1552 = vmatpush.msrb.mxu1 %v1523_v13 }
 0x200   :  { %1489 = vmatpush.msrb.mxu0 %v1427_v16  ;;  %v1634_v16 = vld [vmem:[%s4001_s13 + $0xf8] sm:$0xff] }
 0x201   :  { %1465 = vmatpush.msra.mxu3 %v1438_v32  ;;  %1553 = vmatpush.msrb.mxu1 %v1522_v14 }
 0x202   :  { %1490 = vmatpush.msrb.mxu0 %v1426_v17  ;;  %v1633_v17 = vld [vmem:[%s4001_s13 + $0xf0] sm:$0xff]  ;;  %1635 = vmatpush.msrb.mxu2 %v1634_v16 }
 0x203   :  { %2393 = vmatmul.msk.f32.gmra.mxu2 %vm1125_vm13, %v1334_v40  ;;  %1466 = vmatpush.msra.mxu3 %v1437_v20  ;;  %v2422_v40 = vld [vmem:[%s4060_s5] ss:$0 sm:$0xff] }
 0x204   :  { %2387 = vmatmul.msk.f32.gmra.mxu1 %vm1125_vm13, %v1195_v41  ;;  %1491 = vmatpush.msrb.mxu0 %v1425_v21  ;;  %v1632_v21 = vld [vmem:[%s4001_s13 + $0xe8] sm:$0xff] }
 0x205   :  { %1467 = vmatpush.msra.mxu3 %v1436_v46  ;;  %1636 = vmatpush.msrb.mxu2 %v1633_v17 }
 0x206   :  { %1492 = vmatpush.msrb.mxu0 %v1424_v22  ;;  %v1631_v22 = vld [vmem:[%s4001_s13 + $0xe0] sm:$0xff] }
 0x207   :  { %1637 = vmatpush.msrb.mxu2 %v1632_v21 }
 0x208   :  { %1493 = vmatpush.msrb.mxu0 %v1423_v29  ;;  %v1630_v29 = vld [vmem:[%s4001_s13 + $0xd8] sm:$0xff] }
 0x209   :  { %1638 = vmatpush.msrb.mxu2 %v1631_v22 }
 0x20a   :  { %1494 = vmatpush.msrb.mxu0 %v1422_v3  ;;  %v1628_v3 = vld [vmem:[%s4001_s13 + $0xc8] sm:$0xff] }
 0x20b   :  { %1639 = vmatpush.msrb.mxu2 %v1630_v29 }
 0x20c   :  { %2388 = vmatmul.msk.f32.gmra.mxu1 %vm1125_vm13, %v1211_v9  ;;  %1495 = vmatpush.msrb.mxu0 %v1421_v35  ;;  %v1627_v35 = vld [vmem:[%s4001_s13 + $0xc0] sm:$0xff] }
 0x20e   :  { %1496 = vmatpush.msrb.mxu0 %v1420_v25  ;;  %v1716_v25 = vld [vmem:[%s4001_s13 + $0x158] sm:$0xff] }
 0x214   :  { %2389 = vmatmul.msk.f32.gmra.mxu1 %vm1125_vm13, %v1193_v27 }
 0x24c   :  { %v1258_v30 = vpop.f32.mrf.mxu0 }
 0x25c   :  { %v1261_v9 = vpop.f32.mrf.mxu0 }
 0x265   :  { %v1372_v31 = vpop.f32.mrf.mxu2 }
 0x26c   :  { %v1264_v50 = vpop.f32.mrf.mxu0 }
 0x275   :  { %v1267_v0 = vpop.f32.mrf.mxu0 }
 0x276   :  { %v1375_v27 = vpop.f32.mrf.mxu2 }
 0x279   :  { %v1299_v34 = vpop.f32.mrf.mxu1 }
 0x27a   :  { %v1300_v28 = vadd.f32 %v1299_v34, %v1258_v30  ;;  %v1629_v30 = vld [vmem:[%s4001_s13 + $0xd0] sm:$0xff] }
 0x27b   :  { %1640 = vmatpush.msrb.mxu2 %v1629_v30  ;;  %v1719_v34 = vld [vmem:[%s4001_s13 + $0x170] sm:$0xff] }
 0x27c   :  { %v1384_v41 = vadd.f32 %v1372_v31, %v1300_v28  ;;  %v1720_v31 = vld [vmem:[%s4001_s13 + $0x178] sm:$0xff]  ;;  %v1718_v28 = vld [vmem:[%s4001_s13 + $0x168] sm:$0xff] }
 0x27d   :  { %1721 = vmatpush.msra.mxu0 %v1720_v31  ;;  %1641 = vmatpush.msrb.mxu2 %v1628_v3 }
 0x27e   :  { %v1392_v42 = vmul.f32 %v2422_v40, %v1384_v41  ;;  %v1378_v52 = vpop.f32.mrf.mxu2  ;;  %v1717_v41 = vld [vmem:[%s4001_s13 + $0x160] sm:$0xff] }
 0x27f   :  { %1722 = vmatpush.msra.mxu0 %v1719_v34  ;;  %1642 = vmatpush.msrb.mxu2 %v1627_v35 }
 0x280   :  { %v1400_v43 = vadd.f32 %v2423_v49, %v1392_v42  ;;  %v1624_v42 = vld [vmem:[%s4001_s13 + $0xa8] sm:$0xff] }
 0x281   :  { %v1302_v33 = vpop.f32.mrf.mxu1  ;;  %1723 = vmatpush.msra.mxu0 %v1718_v28 }
 0x282   :  { %v1404_v45 = vmax.f32 %v1400_v43, 0.0  ;;  %v1303_v61 = vadd.f32 %v1302_v33, %v1261_v9  ;;  %v1715_v9 = vld [vmem:[%s4001_s13 + $0x150] sm:$0xff]  ;;  %v1714_v43 = vld [vmem:[%s4001_s13 + $0x148] sm:$0xff]  ;;  %v1622_v33 = vld [vmem:[%s4001_s13 + $0x98] sm:$0xff] }
 0x283   :  { %1724 = vmatpush.msra.mxu0 %v1717_v41 }
 0x284   :  { %v1385_v47 = vadd.f32 %v1375_v27, %v1303_v61  ;;  %1468 = vmatmul.f32.vlgmr.msra.gmra.mxu3 %v1404_v45  ;;  %v1510_v56 = vrot.slane %v1404_v45, 1  ;;  %v1408_v8 = vrot.slane %v1404_v45, 7  ;;  %v1623_v27 = vld [vmem:[%s4001_s13 + $0xa0] sm:$0xff]  ;;  %v1621_v61 = vld [vmem:[%s4001_s13 + $0x90] sm:$0xff] }
 0x285   :  { %1725 = vmatpush.msra.mxu0 %v1716_v25  ;;  %v1713_v45 = vld [vmem:[%s4001_s13 + $0x140] sm:$0xff] }
 0x286   :  { %v1393_v48 = vmul.f32 %v2422_v40, %v1385_v47  ;;  %v1381_v4 = vpop.f32.mrf.mxu2  ;;  %v1618_v47 = vld [vmem:[%s4001_s13 + $0x78] sm:$0xff] }
 0x287   :  { %1726 = vmatpush.msra.mxu0 %v1715_v9  ;;  %1664 = vmatpush.msrb.mxu3 %v1618_v47 }
 0x288   :  { %v1401_v51 = vadd.f32 %v2423_v49, %v1393_v48  ;;  %v1712_v48 = vld [vmem:[%s4001_s13 + $0x138] sm:$0xff] }
 0x289   :  { %v1305_v53 = vpop.f32.mrf.mxu1  ;;  %1727 = vmatpush.msra.mxu0 %v1714_v43 }
 0x28a   :  { %v1306_v54 = vadd.f32 %v1305_v53, %v1264_v50  ;;  %v1405_v55 = vmax.f32 %v1401_v51, 0.0  ;;  %v1620_v50 = vld [vmem:[%s4001_s13 + $0x88] sm:$0xff]  ;;  %v1617_v51 = vld [vmem:[%s4001_s13 + $0x70] sm:$0xff]  ;;  %v1619_v53 = vld [vmem:[%s4001_s13 + $0x80] sm:$0xff] }
 0x28b   :  { %1728 = vmatpush.msra.mxu0 %v1713_v45  ;;  %1665 = vmatpush.msrb.mxu3 %v1617_v51 }
 0x28c   :  { %v1386_v15 = vadd.f32 %v1378_v52, %v1306_v54  ;;  %1471 = vmatmul.f32.gmra.mxu3 %v1405_v55  ;;  %v1511_v59 = vrot.slane %v1405_v55, 1  ;;  %v1409_v58 = vrot.slane %v1405_v55, 7  ;;  %v1711_v52 = vld [vmem:[%s4001_s13 + $0x130] sm:$0xff]  ;;  %v1616_v54 = vld [vmem:[%s4001_s13 + $0x68] sm:$0xff] }
 0x28d   :  { %1729 = vmatpush.msra.mxu0 %v1712_v48  ;;  %v1710_v55 = vld [vmem:[%s4001_s13 + $0x128] sm:$0xff]  ;;  %1666 = vmatpush.msrb.mxu3 %v1616_v54 }
 0x28e   :  { %v1394_v60 = vmul.f32 %v2422_v40, %v1386_v15  ;;  %v1516_v62 = vsel %vm538_vm2, %v1510_v56, %v1511_v59  ;;  %v1414_v12 = vsel %vm277_vm0, %v1408_v8, %v1409_v58  ;;  %v1615_v15 = vld [vmem:[%s4001_s13 + $0x60] sm:$0xff] }
 0x28f   :  { %1554 = vmatmul.f32.vlgmr.msrb.gmra.mxu1 %v1516_v62  ;;  %1730 = vmatpush.msra.mxu0 %v1711_v52  ;;  %v1613_v62 = vld [vmem:[%s4001_s13 + $0x50] sm:$0xff] }
 0x290   :  { %v1402_v63 = vadd.f32 %v2423_v49, %v1394_v60  ;;  %1667 = vmatpush.msrb.mxu3 %v1615_v15  ;;  %v1708_v60 = vld [vmem:[%s4001_s13 + $0x118] sm:$0xff] }
 0x291   :  { %v1308_v2 = vpop.f32.mrf.mxu1  ;;  %1731 = vmatpush.msra.mxu0 %v1710_v55 }
 0x292   :  { %v1309_v26 = vadd.f32 %v1308_v2, %v1267_v0  ;;  %v1406_v32 = vmax.f32 %v1402_v63, 0.0  ;;  %v1707_v63 = vld [vmem:[%s4001_s13 + $0x110] sm:$0xff]  ;;  %v1612_v0 = vld [vmem:[%s4001_s13 + $0x48] sm:$0xff] }
 0x293   :  { %v1706_v2 = vld [vmem:[%s4001_s13 + $0x108] sm:$0xff] }
 0x294   :  { %v1387_v5 = vadd.f32 %v1381_v4, %v1309_v26  ;;  %1474 = vmatmul.f32.gmra.mxu3 %v1406_v32  ;;  %v1512_v20 = vrot.slane %v1406_v32, 1  ;;  %v1410_v13 = vrot.slane %v1406_v32, 7  ;;  %v1611_v26 = vld [vmem:[%s4001_s13 + $0x40] sm:$0xff]  ;;  %v1610_v4 = vld [vmem:[%s4001_s13 + $0x38] sm:$0xff] }
 0x295   :  { %v1705_v32 = vld [vmem:[%s4001_s13 + $0x100] sm:$0xff] }
 0x296   :  { %v1395_v44 = vmul.f32 %v2422_v40, %v1387_v5  ;;  %v1515_v39 = vsel %vm538_vm2, %v1511_v59, %v1512_v20  ;;  %v1413_v57 = vsel %vm277_vm0, %v1409_v58, %v1410_v13  ;;  %v1626_v40 = vld [vmem:[%s4001_s13 + $0xb8] sm:$0xff]  ;;  %v1609_v5 = vld [vmem:[%s4001_s13 + $0x30] sm:$0xff] }
 0x297   :  { %2396 = vmatmul.msk.f32.gmra.mxu1 %vm3239_vm14, %v1515_v39  ;;  %1643 = vmatpush.msrb.mxu2 %v1626_v40  ;;  %v1614_v59 = vld [vmem:[%s4001_s13 + $0x58] sm:$0xff] }
 0x298   :  { %v1403_v46 = vadd.f32 %v2423_v49, %v1395_v44  ;;  %v1625_v49 = vld [vmem:[%s4001_s13 + $0xb0] sm:$0xff]  ;;  %1668 = vmatpush.msrb.mxu3 %v1614_v59  ;;  %v1608_v44 = vld [vmem:[%s4001_s13 + $0x28] sm:$0xff] }
 0x299   :  { %1644 = vmatpush.msrb.mxu2 %v1625_v49 }
 0x29a   :  { %v1407_v6 = vmax.f32 %v1403_v46, 0.0  ;;  %1669 = vmatpush.msrb.mxu3 %v1613_v62  ;;  %v1607_v46 = vld [vmem:[%s4001_s13 + $0x20] sm:$0xff] }
 0x29b   :  { %1645 = vmatpush.msrb.mxu2 %v1624_v42 }
 0x29c   :  { %v1411_v19 = vrot.slane %v1407_v6, 7  ;;  %1477 = vmatmul.f32.gmra.mxu3 %v1407_v6  ;;  %v1513_v11 = vrot.slane %v1407_v6, 1  ;;  %v1606_v6 = vld [vmem:[%s4001_s13 + $0x18] sm:$0xff] }
 0x29d   :  { %1646 = vmatpush.msrb.mxu2 %v1623_v27  ;;  %1670 = vmatpush.msrb.mxu3 %v1612_v0 }
 0x29e   :  { %v1415_v10 = vsel %vm277_vm0, %v1411_v19, %v1408_v8  ;;  %v1514_v36 = vsel %vm538_vm2, %v1512_v20, %v1513_v11  ;;  %v1517_v23 = vsel %vm538_vm2, %v1513_v11, %v1510_v56  ;;  %v1412_v14 = vsel %vm277_vm0, %v1410_v13, %v1411_v19  ;;  %v1709_v56 = vld [vmem:[%s4001_s13 + $0x120] sm:$0xff]  ;;  %v1605_v19 = vld [vmem:[%s4001_s13 + $0x10] sm:$0xff]  ;;  %v1604_v11 = vld [vmem:[%s4001_s13 + $0x8] sm:$0xff] }
 0x29f   :  { %2394 = vmatmul.msk.f32.vlgmr.msrb.gmra.mxu0 %vm3252_vm15, %v1415_v10  ;;  %1560 = vmatmul.f32.gmra.mxu1 %v1514_v36  ;;  %v2424_v36 = vld [vmem:[%s4062_s7] ss:$0 sm:$0xff] }
 0x2a0   :  { %1647 = vmatpush.msrb.mxu2 %v1622_v33  ;;  %1732 = vmatpush.msra.mxu0 %v1709_v56 }
 0x2a1   :  { %1671 = vmatpush.msrb.mxu3 %v1611_v26  ;;  %v1860_v26 = vld [vmem:[#allocation6 + $0xf8] sm:$0xff] }
 0x2a2   :  { %1648 = vmatpush.msrb.mxu2 %v1621_v61  ;;  %1733 = vmatpush.msra.mxu0 %v1708_v60 }
 0x2a3   :  { %1672 = vmatpush.msrb.mxu3 %v1610_v4  ;;  %1861 = vmatpush.msra.mxu1 %v1860_v26  ;;  %v1858_v4 = vld [vmem:[#allocation6 + $0xe8] sm:$0xff] }
 0x2a4   :  { %1649 = vmatpush.msrb.mxu2 %v1620_v50  ;;  %1734 = vmatpush.msra.mxu0 %v1707_v63 }
 0x2a5   :  { %1673 = vmatpush.msrb.mxu3 %v1609_v5  ;;  %v1857_v5 = vld [vmem:[#allocation6 + $0xe0] sm:$0xff] }
 0x2a6   :  { %1650 = vmatpush.msrb.mxu2 %v1619_v53  ;;  %1735 = vmatpush.msra.mxu0 %v1706_v2 }
 0x2a7   :  { %1500 = vmatmul.f32.gmra.mxu0 %v1414_v12  ;;  %2397 = vmatmul.msk.f32.gmra.mxu1 %vm3267_vm3, %v1517_v23  ;;  %v2425_v12 = vld [vmem:[%s4000_s12] ss:$0 sm:$0xff] }
 0x2a8   :  { %1736 = vmatpush.msra.mxu0 %v1705_v32  ;;  %1674 = vmatpush.msrb.mxu3 %v1608_v44  ;;  %v1603_v23 = vld [vmem:[%s4001_s13] sm:$0xff]  ;;  %v1859_v32 = vld [vmem:[#allocation6 + $0xf0] sm:$0xff]  ;;  %v1844_v44 = vld [vmem:[#allocation6 + $0x78] sm:$0xff] }
 0x2a9   :  { %1862 = vmatpush.msra.mxu1 %v1859_v32  ;;  %1884 = vmatpush.msra.mxu2 %v1844_v44  ;;  %v1829_v44 = vld [vmem:[#allocation6] sm:$0xff] }
 0x2aa   :  { %1675 = vmatpush.msrb.mxu3 %v1607_v46  ;;  %v1843_v46 = vld [vmem:[#allocation6 + $0x70] sm:$0xff] }
 0x2ab   :  { %1863 = vmatpush.msra.mxu1 %v1858_v4  ;;  %1885 = vmatpush.msra.mxu2 %v1843_v46 }
 0x2ac   :  { %1676 = vmatpush.msrb.mxu3 %v1606_v6  ;;  %v1933_v6 = vld [vmem:[#allocation6 + $0x170] sm:$0xff] }
 0x2ad   :  { %1864 = vmatpush.msra.mxu1 %v1857_v5  ;;  %v1920_v5 = vld [vmem:[#allocation6 + $0x108] sm:$0xff] }
 0x2ae   :  { %1677 = vmatpush.msrb.mxu3 %v1605_v19  ;;  %v1853_v19 = vld [vmem:[#allocation6 + $0xc0] sm:$0xff] }
 0x2af   :  { %2395 = vmatmul.msk.f32.gmra.mxu0 %vm3280_vm4, %v1413_v57  ;;  %1865 = vmatpush.msra.mxu1 %v1856_v38 }
 0x2b0   :  { %1678 = vmatpush.msrb.mxu3 %v1604_v11  ;;  %v1932_v11 = vld [vmem:[#allocation6 + $0x168] sm:$0xff] }
 0x2b2   :  { %1679 = vmatpush.msrb.mxu3 %v1603_v23  ;;  %v1851_v23 = vld [vmem:[#allocation6 + $0xb0] sm:$0xff] }
 0x2b7   :  { %1506 = vmatmul.f32.gmra.mxu0 %v1412_v14 }
 0x307   :  { %v1469_v20 = vpop.f32.mrf.mxu3 }
 0x30c   :  { %v1555_v39 = vpop.f32.mrf.mxu1 }
 0x30f   :  { %v1472_v13 = vpop.f32.mrf.mxu3 }
 0x314   :  { %v1558_v14 = vpop.f32.mrf.mxu1 }
 0x317   :  { %v1475_v31 = vpop.f32.mrf.mxu3 }
 0x31c   :  { %v1498_v8 = vpop.f32.mrf.mxu0  ;;  %v1561_v34 = vpop.f32.mrf.mxu1 }
 0x31d   :  { %v1499_v10 = vadd.f32 %v1498_v8, %v1469_v20  ;;  %v1855_v20 = vld [vmem:[#allocation6 + $0xd0] sm:$0xff]  ;;  %v1842_v8 = vld [vmem:[#allocation6 + $0x68] sm:$0xff] }
 0x31e   :  { %1866 = vmatpush.msra.mxu1 %v1855_v20  ;;  %1886 = vmatpush.msra.mxu2 %v1842_v8 }
 0x31f   :  { %v1567_v58 = vadd.f32 %v1555_v39, %v1499_v10  ;;  %v1478_v43 = vpop.f32.mrf.mxu3  ;;  %v1934_v39 = vld [vmem:[#allocation6 + $0x178] sm:$0xff] }
 0x320   :  { %1935 = vmatpush.msra.mxu3 %v1934_v39  ;;  %1867 = vmatpush.msra.mxu1 %v1854_v18  ;;  %v1852_v10 = vld [vmem:[#allocation6 + $0xb8] sm:$0xff]  ;;  %v1919_v39 = vld [vmem:[#allocation6 + $0x100] sm:$0xff] }
 0x321   :  { %v1575_v57 = vmul.f32 %v2424_v36, %v1567_v58  ;;  %v1841_v58 = vld [vmem:[#allocation6 + $0x60] sm:$0xff] }
 0x322   :  { %1936 = vmatpush.msra.mxu3 %v1933_v6  ;;  %1868 = vmatpush.msra.mxu1 %v1853_v19 }
 0x323   :  { %v1583_v16 = vadd.f32 %v2425_v12, %v1575_v57  ;;  %1887 = vmatpush.msra.mxu2 %v1841_v58  ;;  %v1840_v57 = vld [vmem:[#allocation6 + $0x58] sm:$0xff] }
 0x324   :  { %v1501_v17 = vpop.f32.mrf.mxu0  ;;  %v1564_v47 = vpop.f32.mrf.mxu1  ;;  %1937 = vmatpush.msra.mxu3 %v1932_v11  ;;  %1869 = vmatpush.msra.mxu1 %v1852_v10 }
 0x325   :  { %v1587_v21 = vmax.f32 %v1583_v16, 0.0  ;;  %v1502_v22 = vadd.f32 %v1501_v17, %v1472_v13  ;;  %1888 = vmatpush.msra.mxu2 %v1840_v57  ;;  %v1850_v16 = vld [vmem:[#allocation6 + $0xa8] sm:$0xff]  ;;  %v1839_v17 = vld [vmem:[#allocation6 + $0x50] sm:$0xff] }
 0x326   :  { %1870 = vmatpush.msra.mxu1 %v1851_v23 }
 0x327   :  { %v1568_v29 = vadd.f32 %v1558_v14, %v1502_v22  ;;  %1651 = vmatmul.f32.vlgmr.msrb.gmra.mxu2 %v1587_v21  ;;  %v1693_v25 = vrot.slane %v1587_v21, 1  ;;  %v1591_v15 = vrot.slane %v1587_v21, 7  ;;  %v1930_v14 = vld [vmem:[#allocation6 + $0x158] sm:$0xff]  ;;  %v1929_v21 = vld [vmem:[#allocation6 + $0x150] sm:$0xff]  ;;  %v1849_v22 = vld [vmem:[#allocation6 + $0xa0] sm:$0xff] }
 0x328   :  { %1871 = vmatpush.msra.mxu1 %v1850_v16  ;;  %1889 = vmatpush.msra.mxu2 %v1839_v17  ;;  %v2011_v16 = vld [vmem:[%s4007_s19 + $0xf8] sm:$0xff]  ;;  %v2010_v17 = vld [vmem:[%s4007_s19 + $0xf0] sm:$0xff] }
 0x329   :  { %v1576_v30 = vmul.f32 %v2424_v36, %v1568_v29  ;;  %2012 = vmatpush.msrb.mxu0 %v2011_v16  ;;  %v2069_v16 = vld [vmem:[%s4007_s19 + $0x128] sm:$0xff] }
 0x32a   :  { %1872 = vmatpush.msra.mxu1 %v1849_v22 }
 0x32b   :  { %v1584_v3 = vadd.f32 %v2425_v12, %v1576_v30  ;;  %v1838_v30 = vld [vmem:[#allocation6 + $0x48] sm:$0xff]  ;;  %2013 = vmatpush.msrb.mxu0 %v2010_v17 }
 0x32c   :  { %v1504_v35 = vpop.f32.mrf.mxu0  ;;  %1890 = vmatpush.msra.mxu2 %v1838_v30  ;;  %v1984_v17 = vld [vmem:[%s4007_s19 + $0x20] sm:$0xff] }
 0x32d   :  { %v1505_v28 = vadd.f32 %v1504_v35, %v1475_v31  ;;  %v1588_v40 = vmax.f32 %v1584_v3, 0.0  ;;  %v1928_v31 = vld [vmem:[#allocation6 + $0x148] sm:$0xff]  ;;  %v1837_v35 = vld [vmem:[#allocation6 + $0x40] sm:$0xff] }
 0x32e   :  { %1891 = vmatpush.msra.mxu2 %v1837_v35 }
 0x32f   :  { %v1569_v41 = vadd.f32 %v1561_v34, %v1505_v28  ;;  %1654 = vmatmul.f32.gmra.mxu2 %v1588_v40  ;;  %v1694_v49 = vrot.slane %v1588_v40, 1  ;;  %v1592_v62 = vrot.slane %v1588_v40, 7  ;;  %v1848_v34 = vld [vmem:[#allocation6 + $0x98] sm:$0xff]  ;;  %v1927_v28 = vld [vmem:[#allocation6 + $0x140] sm:$0xff] }
 0x330   :  { %1873 = vmatpush.msra.mxu1 %v1848_v34 }
 0x331   :  { %v1577_v42 = vmul.f32 %v2424_v36, %v1569_v41  ;;  %v1699_v9 = vsel %vm538_vm2, %v1693_v25, %v1694_v49  ;;  %v1597_v7 = vsel %vm277_vm0, %v1591_v15, %v1592_v62  ;;  %v3641_v41 = vld [vmem:[%s4002_s14] ss:$0 sm:$0xff] }
 0x332   :  { %1737 = vmatmul.f32.vlgmr.msra.gmra.mxu0 %v1699_v9  ;;  %v1926_v9 = vld [vmem:[#allocation6 + $0x138] sm:$0xff] }
 0x333   :  { %v1585_v27 = vadd.f32 %v2425_v12, %v1577_v42  ;;  %v1836_v42 = vld [vmem:[#allocation6 + $0x38] sm:$0xff] }
 0x334   :  { %v1507_v33 = vpop.f32.mrf.mxu0  ;;  %1892 = vmatpush.msra.mxu2 %v1836_v42  ;;  %v2160_v42 = vld [vmem:[%s4010_s22 + $0x78] sm:$0xff] }
 0x335   :  { %v1508_v45 = vadd.f32 %v1507_v33, %v1478_v43  ;;  %v1589_v61 = vmax.f32 %v1585_v27, 0.0  ;;  %v1846_v27 = vld [vmem:[#allocation6 + $0x88] sm:$0xff]  ;;  %v1835_v33 = vld [vmem:[#allocation6 + $0x30] sm:$0xff] }
 0x336   :  { %1893 = vmatpush.msra.mxu2 %v1835_v33 }
 0x337   :  { %v1570_v48 = vadd.f32 %v1564_v47, %v1508_v45  ;;  %1657 = vmatmul.f32.gmra.mxu2 %v1589_v61  ;;  %v1695_v50 = vrot.slane %v1589_v61, 1  ;;  %v1593_v0 = vrot.slane %v1589_v61, 7  ;;  %v1925_v45 = vld [vmem:[#allocation6 + $0x130] sm:$0xff]  ;;  %v2427_v47 = vld [vmem:[%s4003_s15] ss:$0 sm:$0xff] }
 0x339   :  { %v1578_v51 = vmul.f32 %v2424_v36, %v1570_v48  ;;  %v1698_v52 = vsel %vm538_vm2, %v1694_v49, %v1695_v50  ;;  %v1596_v2 = vsel %vm277_vm0, %v1592_v62, %v1593_v0  ;;  %v1847_v49 = vld [vmem:[#allocation6 + $0x90] sm:$0xff]  ;;  %v1845_v48 = vld [vmem:[#allocation6 + $0x80] sm:$0xff] }
 0x33a   :  { %2400 = vmatmul.msk.f32.gmra.mxu0 %vm3239_vm14, %v1698_v52  ;;  %1874 = vmatpush.msra.mxu1 %v1847_v49  ;;  %v1924_v52 = vld [vmem:[#allocation6 + $0x128] sm:$0xff]  ;;  %v1831_v62 = vld [vmem:[#allocation6 + $0x10] sm:$0xff] }
 0x33b   :  { %v1586_v53 = vadd.f32 %v2425_v12, %v1578_v51  ;;  %v1931_v12 = vld [vmem:[#allocation6 + $0x160] sm:$0xff]  ;;  %v1834_v51 = vld [vmem:[#allocation6 + $0x28] sm:$0xff] }
 0x33c   :  { %1938 = vmatpush.msra.mxu3 %v1931_v12  ;;  %1875 = vmatpush.msra.mxu1 %v1846_v27 }
 0x33d   :  { %v1590_v54 = vmax.f32 %v1586_v53, 0.0  ;;  %1894 = vmatpush.msra.mxu2 %v1834_v51  ;;  %v2156_v51 = vld [vmem:[%s4010_s22 + $0x58] sm:$0xff] }
 0x33e   :  { %1939 = vmatpush.msra.mxu3 %v1930_v14  ;;  %1876 = vmatpush.msra.mxu1 %v1845_v48  ;;  %v1804_v48 = vand.u32 7, %v3229_v37  ;;  %v2009_v37 = vld [vmem:[%s4007_s19 + $0xe8] sm:$0xff] }
 0x33f   :  { %v1594_v55 = vrot.slane %v1590_v54, 7  ;;  %1660 = vmatmul.f32.gmra.mxu2 %v1590_v54  ;;  %v1696_v56 = vrot.slane %v1590_v54, 1  ;;  %v1833_v54 = vld [vmem:[#allocation6 + $0x20] sm:$0xff]  ;;  %2014 = vmatpush.msrb.mxu0 %v2009_v37 }
 0x340   :  { %1940 = vmatpush.msra.mxu3 %v1929_v21  ;;  %1895 = vmatpush.msra.mxu2 %v1833_v54  ;;  %vm3682_vm7 = vcmp.ge.s32.totalorder %v1804_v48, 1  ;;  %vm3686_vm8 = vcmp.lt.s32.totalorder %v1804_v48, 7  ;;  %v2008_v54 = vld [vmem:[%s4007_s19 + $0xe0] sm:$0xff] }
 0x341   :  { %v1598_v59 = vsel %vm277_vm0, %v1594_v55, %v1591_v15  ;;  %v1697_v60 = vsel %vm538_vm2, %v1695_v50, %v1696_v56  ;;  %v1700_v63 = vsel %vm538_vm2, %v1696_v56, %v1693_v25  ;;  %v1595_v24 = vsel %vm277_vm0, %v1593_v0, %v1594_v55  ;;  %v1923_v55 = vld [vmem:[#allocation6 + $0x120] sm:$0xff]  ;;  %v1832_v15 = vld [vmem:[#allocation6 + $0x18] sm:$0xff]  ;;  %2015 = vmatpush.msrb.mxu0 %v2008_v54 }
 0x342   :  { %2398 = vmatmul.msk.f32.vlgmr.msrb.gmra.mxu3 %vm3252_vm15, %v1598_v59  ;;  %1743 = vmatmul.f32.gmra.mxu0 %v1697_v60  ;;  %v1922_v56 = vld [vmem:[#allocation6 + $0x118] sm:$0xff] }
 0x343   :  { %1941 = vmatpush.msra.mxu3 %v1928_v31  ;;  %1896 = vmatpush.msra.mxu2 %v1832_v15  ;;  %v2006_v15 = vld [vmem:[%s4007_s19 + $0xd0] sm:$0xff] }
 0x345   :  { %1942 = vmatpush.msra.mxu3 %v1927_v28  ;;  %1897 = vmatpush.msra.mxu2 %v1831_v62  ;;  %v1994_v62 = vld [vmem:[%s4007_s19 + $0x70] sm:$0xff] }
 0x347   :  { %1943 = vmatpush.msra.mxu3 %v1926_v9  ;;  %v2159_v9 = vld [vmem:[%s4010_s22 + $0x70] sm:$0xff] }
 0x349   :  { %1944 = vmatpush.msra.mxu3 %v1925_v45 }
 0x34a   :  { %1683 = vmatmul.f32.gmra.mxu3 %v1597_v7  ;;  %2401 = vmatmul.msk.f32.gmra.mxu0 %vm3267_vm3, %v1700_v63  ;;  %v1921_v7 = vld [vmem:[#allocation6 + $0x110] sm:$0xff] }
 0x34b   :  { %1945 = vmatpush.msra.mxu3 %v1924_v52 }
 0x34d   :  { %1946 = vmatpush.msra.mxu3 %v1923_v55  ;;  %v2007_v55 = vld [vmem:[%s4007_s19 + $0xd8] sm:$0xff] }
 0x34e   :  { %2016 = vmatpush.msrb.mxu0 %v2007_v55 }
 0x34f   :  { %1947 = vmatpush.msra.mxu3 %v1922_v56  ;;  %v1995_v56 = vld [vmem:[%s4007_s19 + $0x78] sm:$0xff] }
 0x350   :  { %2017 = vmatpush.msrb.mxu0 %v2006_v15  ;;  %2035 = vmatpush.msrb.mxu1 %v1995_v56 }
 0x351   :  { %1948 = vmatpush.msra.mxu3 %v1921_v7  ;;  %v2078_v7 = vld [vmem:[%s4007_s19 + $0x170] sm:$0xff] }
 0x352   :  { %2399 = vmatmul.msk.f32.gmra.mxu3 %vm3280_vm4, %v1596_v2  ;;  %v1830_v2 = vld [vmem:[#allocation6 + $0x8] sm:$0xff]  ;;  %2036 = vmatpush.msrb.mxu1 %v1994_v62 }
 0x353   :  { %1898 = vmatpush.msra.mxu2 %v1830_v2  ;;  %1949 = vmatpush.msra.mxu3 %v1920_v5  ;;  %v2077_v2 = vld [vmem:[%s4007_s19 + $0x168] sm:$0xff]  ;;  %v1991_v5 = vld [vmem:[%s4007_s19 + $0x58] sm:$0xff] }
 0x355   :  { %1899 = vmatpush.msra.mxu2 %v1829_v44  ;;  %1950 = vmatpush.msra.mxu3 %v1919_v39  ;;  %v1990_v44 = vld [vmem:[%s4007_s19 + $0x50] sm:$0xff] }
 0x356   :  { %v2074_v39 = vld [vmem:[%s4007_s19 + $0x150] sm:$0xff] }
 0x357   :  { %2172 = vmatpush.msrb.mxu3 %v2160_v42 }
 0x359   :  { %2173 = vmatpush.msrb.mxu3 %v2159_v9 }
 0x35a   :  { %1689 = vmatmul.f32.gmra.mxu3 %v1595_v24 }
 0x3aa   :  { %v1652_v36 = vpop.f32.mrf.mxu2 }
 0x3af   :  { %v1738_v13 = vpop.f32.mrf.mxu0 }
 0x3b2   :  { %v1655_v25 = vpop.f32.mrf.mxu2 }
 0x3b7   :  { %v1741_v43 = vpop.f32.mrf.mxu0 }
 0x3ba   :  { %v1658_v0 = vpop.f32.mrf.mxu2 }
 0x3bf   :  { %v1744_v32 = vpop.f32.mrf.mxu0 }
 0x3c5   :  { %v1681_v29 = vpop.f32.mrf.mxu3 }
 0x3c6   :  { %v1682_v3 = vadd.f32 %v1681_v29, %v1652_v36  ;;  %v1661_v36 = vpop.f32.mrf.mxu2 }
 0x3c8   :  { %v1750_v40 = vadd.f32 %v1738_v13, %v1682_v3  ;;  %v1747_v13 = vpop.f32.mrf.mxu0 }
 0x3ca   :  { %v1758_v61 = vmul.f32 %v3641_v41, %v1750_v40 }
 0x3cc   :  { %v1766_v59 = vadd.f32 %v2427_v47, %v1758_v61 }
 0x3cd   :  { %v1684_v50 = vpop.f32.mrf.mxu3 }
 0x3ce   :  { %v1685_v53 = vadd.f32 %v1684_v50, %v1655_v25  ;;  %v1770_v24 = vmax.f32 %v1766_v59, 0.0  ;;  %v2079_v59 = vld [vmem:[%s4007_s19 + $0x178] sm:$0xff]  ;;  %v2157_v50 = vld [vmem:[%s4010_s22 + $0x60] sm:$0xff] }
 0x3cf   :  { %2080 = vmatpush.msrb.mxu2 %v2079_v59 }
 0x3d0   :  { %v1751_v60 = vadd.f32 %v1741_v43, %v1685_v53  ;;  %v1774_v18 = vrot.slane %v1770_v24, 1 }
 0x3d1   :  { %2081 = vmatpush.msrb.mxu2 %v2078_v7 }
 0x3d2   :  { %v1759_v63 = vmul.f32 %v3641_v41, %v1751_v60  ;;  %v2005_v60 = vld [vmem:[%s4007_s19 + $0xc8] sm:$0xff] }
 0x3d3   :  { %2018 = vmatpush.msrb.mxu0 %v2005_v60  ;;  %2082 = vmatpush.msrb.mxu2 %v2077_v2 }
 0x3d4   :  { %v1767_v26 = vadd.f32 %v2427_v47, %v1759_v63  ;;  %v2004_v63 = vld [vmem:[%s4007_s19 + $0xc0] sm:$0xff] }
 0x3d5   :  { %v1687_v4 = vpop.f32.mrf.mxu3  ;;  %2019 = vmatpush.msrb.mxu0 %v2004_v63 }
 0x3d6   :  { %v1771_v38 = vmax.f32 %v1767_v26, 0.0  ;;  %v1688_v20 = vadd.f32 %v1687_v4, %v1658_v0  ;;  %v1993_v0 = vld [vmem:[%s4007_s19 + $0x68] sm:$0xff]  ;;  %v1992_v26 = vld [vmem:[%s4007_s19 + $0x60] sm:$0xff]  ;;  %v2002_v4 = vld [vmem:[%s4007_s19 + $0xb0] sm:$0xff] }
 0x3d7   :  { %2037 = vmatpush.msrb.mxu1 %v1993_v0 }
 0x3d8   :  { %v1775_v46 = vrot.slane %v1771_v38, 1  ;;  %v1752_v6 = vadd.f32 %v1744_v32, %v1688_v20  ;;  %v2076_v32 = vld [vmem:[%s4007_s19 + $0x160] sm:$0xff]  ;;  %v2001_v20 = vld [vmem:[%s4007_s19 + $0xa8] sm:$0xff] }
 0x3d9   :  { %2038 = vmatpush.msrb.mxu1 %v1992_v26  ;;  %2083 = vmatpush.msrb.mxu2 %v2076_v32  ;;  %v2158_v26 = vld [vmem:[%s4010_s22 + $0x68] sm:$0xff]  ;;  %v2155_v32 = vld [vmem:[%s4010_s22 + $0x50] sm:$0xff] }
 0x3da   :  { %v1780_v19 = vsel %vm538_vm2, %v1774_v18, %v1775_v46  ;;  %v1760_v8 = vmul.f32 %v3641_v41, %v1752_v6  ;;  %v2073_v6 = vld [vmem:[%s4007_s19 + $0x148] sm:$0xff]  ;;  %2174 = vmatpush.msrb.mxu3 %v2158_v26  ;;  %v2433_v26 = vld [vmem:[%s4012_s24] ss:$0 sm:$0xff] }
 0x3db   :  { %v1782_v11 = vmax.f32 %v1770_v24, %v1780_v19  ;;  %v2003_v24 = vld [vmem:[%s4007_s19 + $0xb8] sm:$0xff]  ;;  %2039 = vmatpush.msrb.mxu1 %v1991_v5  ;;  %v2154_v5 = vld [vmem:[%s4010_s22 + $0x48] sm:$0xff] }
 0x3dc   :  { %v1768_v10 = vadd.f32 %v2427_v47, %v1760_v8  ;;  %2020 = vmatpush.msrb.mxu0 %v2003_v24  ;;  %v1999_v19 = vld [vmem:[%s4007_s19 + $0x98] sm:$0xff]  ;;  %v1988_v8 = vld [vmem:[%s4007_s19 + $0x40] sm:$0xff]  ;;  %2175 = vmatpush.msrb.mxu3 %v2157_v50 }
 0x3dd   :  { %1786 = vst [vmem:[#allocation3] sm:$0xff] %v1782_v11  ;;  %v1690_v58 = vpop.f32.mrf.mxu3  ;;  %2040 = vmatpush.msrb.mxu1 %v1990_v44  ;;  %v2072_v11 = vld [vmem:[%s4007_s19 + $0x140] sm:$0xff]  ;;  %v2217_v44 = vld [vmem:[%s4010_s22 + $0xa8] sm:$0xff] }
 0x3de   :  { %v1772_v12 = vmax.f32 %v1768_v10, 0.0  ;;  %v1691_v23 = vadd.f32 %v1690_v58, %v1661_v36  ;;  %2021 = vmatpush.msrb.mxu0 %v2002_v4  ;;  %v1998_v10 = vld [vmem:[%s4007_s19 + $0x90] sm:$0xff]  ;;  %v1987_v36 = vld [vmem:[%s4007_s19 + $0x38] sm:$0xff]  ;;  %2176 = vmatpush.msrb.mxu3 %v2156_v51 }
 0x3df   :  { %v2071_v58 = vld [vmem:[%s4007_s19 + $0x138] sm:$0xff] }
 0x3e0   :  { %v1776_v57 = vrot.slane %v1772_v12, 1  ;;  %v1753_v14 = vadd.f32 %v1747_v13, %v1691_v23  ;;  %2022 = vmatpush.msrb.mxu0 %v2001_v20  ;;  %v1986_v23 = vld [vmem:[%s4007_s19 + $0x30] sm:$0xff]  ;;  %v2219_v4 = vld [vmem:[%s4010_s22 + $0xb8] sm:$0xff]  ;;  %2177 = vmatpush.msrb.mxu3 %v2155_v32  ;;  %v2153_v20 = vld [vmem:[%s4010_s22 + $0x40] sm:$0xff] }
 0x3e1   :  { %v2070_v13 = vld [vmem:[%s4007_s19 + $0x130] sm:$0xff] }
 0x3e2   :  { %v1779_v21 = vsel %vm538_vm2, %v1775_v46, %v1776_v57  ;;  %v1761_v22 = vmul.f32 %v3641_v41, %v1753_v14  ;;  %v1797_v41 = vand.u32 7, %v2634_v1  ;;  %v1989_v46 = vld [vmem:[%s4007_s19 + $0x48] sm:$0xff]  ;;  %2178 = vmatpush.msrb.mxu3 %v2154_v5 }
 0x3e3   :  { %v1783_v29 = vmax.f32 %v1771_v38, %v1779_v21  ;;  %v2075_v38 = vld [vmem:[%s4007_s19 + $0x158] sm:$0xff]  ;;  %2041 = vmatpush.msrb.mxu1 %v1989_v46  ;;  %v1985_v14 = vld [vmem:[%s4007_s19 + $0x28] sm:$0xff]  ;;  %v2068_v21 = vld [vmem:[%s4007_s19 + $0x120] sm:$0xff] }
 0x3e4   :  { %v1769_v30 = vadd.f32 %v2427_v47, %v1761_v22  ;;  %vm3665_vm5 = vcmp.ge.s32.totalorder %v1797_v41, 1  ;;  %vm3669_vm6 = vcmp.lt.s32.totalorder %v1797_v41, 7  ;;  %2084 = vmatpush.msrb.mxu2 %v2075_v38  ;;  %v1983_v22 = vld [vmem:[%s4007_s19 + $0x18] sm:$0xff]  ;;  %v2218_v38 = vld [vmem:[%s4010_s22 + $0xb0] sm:$0xff]  ;;  %2179 = vmatpush.msrb.mxu3 %v2153_v20 }
 0x3e5   :  { %1787 = vst [vmem:[#allocation3 + $0x8] sm:$0xff] %v1783_v29  ;;  %2042 = vmatpush.msrb.mxu1 %v1988_v8  ;;  %v2067_v29 = vld [vmem:[%s4007_s19 + $0x118] sm:$0xff]  ;;  %v2151_v46 = vld [vmem:[%s4010_s22 + $0x30] sm:$0xff] }
 0x3e6   :  { %v1773_v31 = vmax.f32 %v1769_v30, 0.0  ;;  %2085 = vmatpush.msrb.mxu2 %v2074_v39  ;;  %v1982_v30 = vld [vmem:[%s4007_s19 + $0x10] sm:$0xff]  ;;  %v2152_v39 = vld [vmem:[%s4010_s22 + $0x38] sm:$0xff] }
 0x3e7   :  { %2043 = vmatpush.msrb.mxu1 %v1987_v36 }
 0x3e8   :  { %v1777_v3 = vrot.slane %v1773_v31, 1  ;;  %2086 = vmatpush.msrb.mxu2 %v2073_v6  ;;  %v2215_v6 = vld [vmem:[%s4010_s22 + $0x98] sm:$0xff] }
 0x3e9   :  { %2044 = vmatpush.msrb.mxu1 %v1986_v23  ;;  %v2148_v23 = vld [vmem:[%s4010_s22 + $0x18] sm:$0xff] }
 0x3ea   :  { %v1778_v34 = vsel %vm538_vm2, %v1776_v57, %v1777_v3  ;;  %v1781_v35 = vsel %vm538_vm2, %v1777_v3, %v1774_v18  ;;  %v2000_v18 = vld [vmem:[%s4007_s19 + $0xa0] sm:$0xff]  ;;  %2087 = vmatpush.msrb.mxu2 %v2072_v11  ;;  %v1981_v3 = vld [vmem:[%s4007_s19 + $0x8] sm:$0xff]  ;;  %v2214_v11 = vld [vmem:[%s4010_s22 + $0x90] sm:$0xff] }
 0x3eb   :  { %v1784_v28 = vmax.f32 %v1772_v12, %v1778_v34  ;;  %v1785_v40 = vmax.f32 %v1773_v31, %v1781_v35  ;;  %2023 = vmatpush.msrb.mxu0 %v2000_v18  ;;  %v1997_v12 = vld [vmem:[%s4007_s19 + $0x88] sm:$0xff]  ;;  %v1996_v57 = vld [vmem:[%s4007_s19 + $0x80] sm:$0xff]  ;;  %2045 = vmatpush.msrb.mxu1 %v1985_v14  ;;  %v2066_v31 = vld [vmem:[%s4007_s19 + $0x110] sm:$0xff] }
 0x3ec   :  { %v1790_v49 = vld [vmem:[#allocation3] ss:$2 sm:$0xff]  ;;  %2088 = vmatpush.msrb.mxu2 %v2071_v58 }
 0x3ed   :  { %1788 = vst [vmem:[#allocation3 + $0x10] sm:$0xff] %v1784_v28  ;;  %1877 = vmatmul.f32.vlgmr.msra.gmra.mxu1 %v1790_v49  ;;  %v1817_v27 = vrot.slane %v1790_v49, 7  ;;  %v1907_v43 = vrot.slane %v1790_v49, 1  ;;  %2024 = vmatpush.msrb.mxu0 %v1999_v19  ;;  %v2065_v34 = vld [vmem:[%s4007_s19 + $0x108] sm:$0xff]  ;;  %v1980_v35 = vld [vmem:[%s4007_s19] sm:$0xff] }
 0x3ee   :  { %1789 = vst [vmem:[#allocation3 + $0x18] sm:$0xff] %v1785_v40  ;;  %2089 = vmatpush.msrb.mxu2 %v2070_v13  ;;  %2046 = vmatpush.msrb.mxu1 %v1984_v17  ;;  %v2064_v28 = vld [vmem:[%s4007_s19 + $0x100] sm:$0xff]  ;;  %v2150_v19 = vld [vmem:[%s4010_s22 + $0x28] sm:$0xff] }
 0x3ef   :  { %2025 = vmatpush.msrb.mxu0 %v1998_v10  ;;  %v2216_v18 = vld [vmem:[%s4010_s22 + $0xa0] sm:$0xff]  ;;  %v2213_v58 = vld [vmem:[%s4010_s22 + $0x88] sm:$0xff] }
 0x3f0   :  { %2090 = vmatpush.msrb.mxu2 %v2069_v16  ;;  %2047 = vmatpush.msrb.mxu1 %v1983_v22  ;;  %v2149_v10 = vld [vmem:[%s4010_s22 + $0x20] sm:$0xff] }
 0x3f1   :  { %2026 = vmatpush.msrb.mxu0 %v1997_v12  ;;  %v2212_v13 = vld [vmem:[%s4010_s22 + $0x80] sm:$0xff] }
 0x3f2   :  { %2091 = vmatpush.msrb.mxu2 %v2068_v21  ;;  %2048 = vmatpush.msrb.mxu1 %v1982_v30  ;;  %v2430_v17 = vld [vmem:[%s4008_s20] ss:$0 sm:$0xff]  ;;  %v2146_v21 = vld [vmem:[%s4010_s22 + $0x8] sm:$0xff] }
 0x3f3   :  { %2027 = vmatpush.msrb.mxu0 %v1996_v57  ;;  %v2147_v57 = vld [vmem:[%s4010_s22 + $0x10] sm:$0xff]  ;;  %v2145_v22 = vld [vmem:[%s4010_s22] sm:$0xff] }
 0x3f4   :  { %2092 = vmatpush.msrb.mxu2 %v2067_v29  ;;  %2049 = vmatpush.msrb.mxu1 %v1981_v3 }
 0x3f5   :  { %v1792_v25 = vld [vmem:[#allocation3 + $0x10] ss:$2 sm:$0xff]  ;;  %2231 = vmatpush.msra.mxu0 %v2219_v4 }
 0x3f6   :  { %v1818_v33 = vrot.slane %v1792_v25, 7  ;;  %1880 = vmatmul.f32.gmra.mxu1 %v1792_v25  ;;  %v1908_v45 = vrot.slane %v1792_v25, 1  ;;  %2093 = vmatpush.msrb.mxu2 %v2066_v31  ;;  %v2431_v31 = vld [vmem:[%s4009_s21] ss:$0 sm:$0xff] }
 0x3f7   :  { %2050 = vmatpush.msrb.mxu1 %v1980_v35  ;;  %2232 = vmatpush.msra.mxu0 %v2218_v38 }
 0x3f8   :  { %v1820_v61 = vsel %vm277_vm0, %v1818_v33, %v1817_v27  ;;  %v1909_v47 = vsel %vm538_vm2, %v1907_v43, %v1908_v45  ;;  %v1819_v52 = vsel %vm277_vm0, %v1817_v27, %v1818_v33  ;;  %v1910_v53 = vsel %vm538_vm2, %v1908_v45, %v1907_v43  ;;  %2094 = vmatpush.msrb.mxu2 %v2065_v34  ;;  %v2428_v27 = vld [vmem:[%s4005_s17] ss:$0 sm:$0xff] }
 0x3f9   :  { %2402 = vmatmul.msk.f32.vlgmr.msra.gmra.mxu2 %vm3665_vm5, %v1820_v61  ;;  %2404 = vmatmul.msk.f32.vlgmr.msra.gmra.mxu3 %vm3669_vm6, %v1909_v47  ;;  %v2429_v33 = vld [vmem:[%s4006_s18] ss:$0 sm:$0xff] }
 0x3fa   :  { %2095 = vmatpush.msrb.mxu2 %v2064_v28  ;;  %2233 = vmatpush.msra.mxu0 %v2217_v44 }
 0x3fb   :  { %2195 = vmatpush.msra.mxu3 %v2152_v39 }
 0x3fc   :  { %2234 = vmatpush.msra.mxu0 %v2216_v18 }
 0x3fd   :  { %2196 = vmatpush.msra.mxu3 %v2151_v46 }
 0x3fe   :  { %2235 = vmatpush.msra.mxu0 %v2215_v6  ;;  %v2434_v6 = vld [vmem:[%s4014_s26] ss:$0 sm:$0xff] }
 0x3ff   :  { %2197 = vmatpush.msra.mxu3 %v2150_v19 }
 0x400   :  { %2236 = vmatpush.msra.mxu0 %v2214_v11 }
 0x401   :  { %2403 = vmatmul.msk.f32.gmra.mxu2 %vm3682_vm7, %v1819_v52  ;;  %2405 = vmatmul.msk.f32.gmra.mxu3 %vm3686_vm8, %v1910_v53 }
 0x402   :  { %2198 = vmatpush.msra.mxu3 %v2149_v10  ;;  %2237 = vmatpush.msra.mxu0 %v2213_v58 }
 0x404   :  { %2199 = vmatpush.msra.mxu3 %v2148_v23  ;;  %2238 = vmatpush.msra.mxu0 %v2212_v13 }
 0x406   :  { %2200 = vmatpush.msra.mxu3 %v2147_v57 }
 0x408   :  { %2201 = vmatpush.msra.mxu3 %v2146_v21 }
 0x40a   :  { %2202 = vmatpush.msra.mxu3 %v2145_v22 }
 0x46a   :  { %v1878_v40 = vpop.f32.mrf.mxu1 }
 0x473   :  { %v1881_v47 = vpop.f32.mrf.mxu1 }
 0x47c   :  { %v1901_v49 = vpop.f32.mrf.mxu2  ;;  %v1952_v41 = vpop.f32.mrf.mxu3 }
 0x47d   :  { %v1902_v25 = vadd.f32 %v1901_v49, %v1878_v40 }
 0x47f   :  { %v1958_v43 = vadd.f32 %v1952_v41, %v1902_v25 }
 0x481   :  { %v1964_v45 = vmul.f32 %v2428_v27, %v1958_v43 }
 0x483   :  { %v1970_v61 = vadd.f32 %v2429_v33, %v1964_v45 }
 0x484   :  { %v1904_v48 = vpop.f32.mrf.mxu2  ;;  %v1955_v37 = vpop.f32.mrf.mxu3 }
 0x485   :  { %v1972_v52 = vmax.f32 %v1970_v61, 0.0  ;;  %v1905_v53 = vadd.f32 %v1904_v48, %v1881_v47 }
 0x487   :  { %v1959_v54 = vadd.f32 %v1955_v37, %v1905_v53  ;;  %2028 = vmatmul.f32.vlgmr.msrb.gmra.mxu0 %v1972_v52  ;;  %v1974_v59 = vrot.slane %v1972_v52, 7  ;;  %v2058_v60 = vrot.slane %v1972_v52, 1  ;;  %v2132_v52 = vand.u32 3, %v2634_v1 }
 0x489   :  { %v1965_v55 = vmul.f32 %v2428_v27, %v1959_v54 }
 0x48b   :  { %v1971_v15 = vadd.f32 %v2429_v33, %v1965_v55 }
 0x48d   :  { %v1973_v56 = vmax.f32 %v1971_v15, 0.0 }
 0x48f   :  { %v1975_v62 = vrot.slane %v1973_v56, 7  ;;  %2031 = vmatmul.f32.gmra.mxu0 %v1973_v56  ;;  %v2059_v7 = vrot.slane %v1973_v56, 1 }
 0x491   :  { %v1977_v63 = vsel %vm277_vm0, %v1975_v62, %v1974_v59  ;;  %v2060_v0 = vsel %vm538_vm2, %v2058_v60, %v2059_v7  ;;  %v1976_v2 = vsel %vm277_vm0, %v1974_v59, %v1975_v62  ;;  %v2061_v24 = vsel %vm538_vm2, %v2059_v7, %v2058_v60  ;;  %v2271_v59 = vld [vmem:[%s4013_s25 + $0x18] sm:$0xff]  ;;  %v2270_v60 = vld [vmem:[%s4013_s25 + $0x10] sm:$0xff]  ;;  %v2269_v62 = vld [vmem:[%s4013_s25 + $0x8] sm:$0xff] }
 0x492   :  { %2406 = vmatmul.msk.f32.vlgmr.msrb.gmra.mxu1 %vm3665_vm5, %v1977_v63  ;;  %2408 = vmatmul.msk.f32.vlgmr.msrb.gmra.mxu2 %vm3669_vm6, %v2060_v0  ;;  %vm3943_vm0 = vcmp.lt.s32.totalorder %v2132_v52, 3  ;;  %v2268_v7 = vld [vmem:[%s4013_s25] sm:$0xff]  ;;  %s2490_s25 = smov [#allocation9]  }
 0x493   :  { %s2306_s16 = sshll.u32 %s2490_s25, 4  ;;  %s2307_s16 = int_to_ptr.vmem [resolvable:$true] %s2306_s16 }
 0x49a   :  { %2407 = vmatmul.msk.f32.gmra.mxu1 %vm3682_vm7, %v1976_v2  ;;  %2409 = vmatmul.msk.f32.gmra.mxu2 %vm3686_vm8, %v2061_v24  ;;  %v2432_v24 = vld [vmem:[%s4011_s23] ss:$0 sm:$0xff] }
 0x504   :  { %v2029_v36 = vpop.f32.mrf.mxu0 }
 0x50c   :  { %v2032_v3 = vpop.f32.mrf.mxu0 }
 0x50f   :  { %v2052_v8 = vpop.f32.mrf.mxu1 }
 0x510   :  { %v2053_v12 = vadd.f32 %v2052_v8, %v2029_v36 }
 0x515   :  { %v2097_v14 = vpop.f32.mrf.mxu2 }
 0x516   :  { %v2103_v16 = vadd.f32 %v2097_v14, %v2053_v12 }
 0x517   :  { %v2055_v29 = vpop.f32.mrf.mxu1 }
 0x518   :  { %v2109_v30 = vmul.f32 %v2430_v17, %v2103_v16  ;;  %v2056_v34 = vadd.f32 %v2055_v29, %v2032_v3 }
 0x51a   :  { %v2115_v28 = vadd.f32 %v2431_v31, %v2109_v30 }
 0x51c   :  { %v2117_v41 = vmax.f32 %v2115_v28, 0.0 }
 0x51d   :  { %v2100_v35 = vpop.f32.mrf.mxu2 }
 0x51e   :  { %v2104_v40 = vadd.f32 %v2100_v35, %v2056_v34  ;;  %v2119_v43 = vrot.slane %v2117_v41, 1 }
 0x520   :  { %v2110_v49 = vmul.f32 %v2430_v17, %v2104_v40 }
 0x522   :  { %v2116_v25 = vadd.f32 %v2431_v31, %v2110_v49 }
 0x524   :  { %v2118_v27 = vmax.f32 %v2116_v25, 0.0 }
 0x526   :  { %v2120_v33 = vrot.slane %v2118_v27, 1 }
 0x528   :  { %v2121_v45 = vsel %vm538_vm2, %v2119_v43, %v2120_v33  ;;  %v2122_v61 = vsel %vm538_vm2, %v2120_v33, %v2119_v43  ;;  %vm3951_vm2 = vcmp.ge.s32.totalorder %v2132_v52, 1 }
 0x529   :  { %v2123_v47 = vmax.f32 %v2117_v41, %v2121_v45  ;;  %v2124_v48 = vmax.f32 %v2118_v27, %v2122_v61  ;;  %vm2255_vm9 = vmand %vm3951_vm2, %vm3943_vm0 }
 0x52b   :  { %2125 = vst.msk [vmem:[#allocation4] sm:$0xff] %vm1125_vm13, %v2123_v47 }
 0x52c   :  { %2126 = vst.msk [vmem:[#allocation4 + $0x8] sm:$0xff] %vm1125_vm13, %v2124_v48 }
 0x533   :  { %v2127_v53 = vld [vmem:[#allocation4] ss:$2 sm:$0xff] }
 0x534   :  { %2410 = vmatmul.msk.f32.vlgmr.msrb.gmra.mxu3 %vm1125_vm13, %v2127_v53  ;;  %v2207_v54 = vrot.slane %v2127_v53, 1  ;;  %v2140_v15 = vrot.slane %v2127_v53, 7 }
 0x535   :  { %2291 = vmatpush.msrb.mxu3 %v2271_v59 }
 0x536   :  { %v2211_v55 = vsel %vm3943_vm0, %v2207_v54, 0.0  ;;  %v2144_v1 = vsel %vm3951_vm2, %v2140_v15, 0.0 }
 0x537   :  { %2412 = vmatmul.msk.f32.vlgmr.msra.gmra.mxu0 %vm1125_vm13, %v2211_v55  ;;  %2292 = vmatpush.msrb.mxu3 %v2270_v60 }
 0x539   :  { %2293 = vmatpush.msrb.mxu3 %v2269_v62 }
 0x53b   :  { %2294 = vmatpush.msrb.mxu3 %v2268_v7 }
 0x53c   :  { %2411 = vmatmul.msk.f32.vlgmr.msra.gmra.mxu3 %vm1125_vm13, %v2144_v1 }
 0x5b4   :  { %v2240_v42 = vpop.f32.mrf.mxu0 }
 0x5b7   :  { %v2181_v63 = vpop.f32.mrf.mxu3 }
 0x5bf   :  { %v2204_v0 = vpop.f32.mrf.mxu3 }
 0x5c0   :  { %v2205_v2 = vadd.f32 %v2204_v0, %v2181_v63 }
 0x5c2   :  { %v2243_v9 = vadd.f32 %v2240_v42, %v2205_v2 }
 0x5c4   :  { %v2248_v50 = vmul.f32 %v2432_v24, %v2243_v9 }
 0x5c6   :  { %v2253_v51 = vadd.f32 %v2433_v26, %v2248_v50 }
 0x5c8   :  { %v2254_v32 = vmax.f32 %v2253_v51, 0.0 }
 0x5ca   :  { %v2256_v4 = vsel %vm2255_vm9, %v2254_v32, 0.0 }
 0x5cb   :  { %2257 = vst.msk [vmem:[#allocation5] sm:$0xff] %vm322_vm1, %v2256_v4 }
 0x5d2   :  { %v2258_v5 = vld [vmem:[#allocation5] ss:$4 sm:$0x3]  ;;  %v2260_v38 = vld [vmem:[#allocation5 + $0x1] ss:$4 sm:$0x3] }
 0x5d3   :  { %v2261_v20 = vmax.f32 %v2258_v5, %v2260_v38  ;;  %v2263_v44 = vld [vmem:[#allocation5 + $0x2] ss:$4 sm:$0x3]  ;;  %v2266_v18 = vld [vmem:[#allocation5 + $0x3] ss:$4 sm:$0x3] }
 0x5d5   :  { %v2264_v39 = vmax.f32 %v2261_v20, %v2263_v44 }
 0x5d7   :  { %v2267_v46 = vmax.f32 %v2264_v39, %v2266_v18 }
 0x5d9   :  { %2413 = vmatmul.msk.f32.vlgmr.msrb.gmra.mxu3 %vm322_vm1, %v2267_v46 }
 0x65c   :  { %v2296_v19 = vpop.f32.mrf.mxu3 }
 0x65d   :  { %v2297_v8 = vadd.f32 %v2434_v6, %v2296_v19 }
 0x65f   :  { %2300 = vst.msk [vmem:[#allocation9] sm:$0x3] %vm2299_vm10, %v2297_v8 }
 0x660   :  { %2311 = dma.vmem_to_hbm [thread:$0]  %s2307_s16, 32, %s2309_s9, [#allocation8]  }
 0x661   :  { %2485 = dma.done.wait [#allocation8], 32  }
 0x662   :  { %2486 = vsyncadd [#allocation8], 4294967264 }
 0x663   :  { %2316 = vsyncpa [#allocation7], 1 }
 0x664   :  { %2317 = vsyncpa [#allocation8], 1 }

</bundles_post_ra>
